<compile_context>
chip_gen: v7x
topology: tpu7x:2x2x1
jax: 0.10.0
libtpu: 0.0.40
codegen_flags: <defaults>
</compile_context>

<pallas_src>
import functools

import numpy as np
import jax
import jax.numpy as jnp
from jax.experimental import pallas as pl
from jax.experimental.pallas import tpu as pltpu


def _label_relation_kernel(feat_ref, logits_ref, w1_ref, b1_ref, w2_ref, b2_ref,
                           onesblk_ref, repmat_ref, out_ref, *,
                           num_classes, matmul_dtype):
    C = num_classes
    CC = C * C

    feats = feat_ref[...]            # [TB, F]  (bf16 if matmul_dtype=bf16, pre-cast in wrapper)
    lg = logits_ref[...]             # [TB, C]  f32 throughout

    # ---- relation_encoder: Linear -> ReLU -> Linear (MXU, f32 accumulation) ----
    h = jnp.dot(feats, w1_ref[...], preferred_element_type=jnp.float32) + b1_ref[...]
    h = jnp.maximum(h, 0.0)                                           # [TB, R] f32
    if matmul_dtype is not None:
        h = h.astype(matmul_dtype)                                    # only the activation is cast in-kernel
    rel = jnp.dot(h, w2_ref[...], preferred_element_type=jnp.float32) + b2_ref[...]   # [TB, CC] f32

    TB = rel.shape[0]

    # ---- exact per-relation-row max (segments of C lanes), VPU/XLU only --------
    # (replaces the old permutation-matmul max tree; no MXU work, no perms constant)
    lane = jax.lax.broadcasted_iota(jnp.int32, (TB, CC), 1)
    m = jnp.zeros_like(rel)
    for i in range(C):
        seg_max = jnp.max(rel[:, i * C:(i + 1) * C], axis=-1, keepdims=True)   # [TB, 1]
        in_seg = (lane >= i * C) & (lane < (i + 1) * C)
        m = jnp.where(in_seg, seg_max, m)

    e = jnp.exp(rel - m)                                              # [TB, CC] f32 on the EUP

    # ---- softmax denom + bmm numer via ONE block-diagonal-ones matmul ----------
    # lg_rep[b, k] = logits[b, k % C]  (exact: rep_mat has a single 1 per column)
    lg_rep = jnp.dot(lg, repmat_ref[...], preferred_element_type=jnp.float32)   # [TB, CC]
    lhs = jnp.concatenate([e, e * lg_rep], axis=0)                              # [2TB, CC]
    dn = jnp.dot(lhs, onesblk_ref[...], preferred_element_type=jnp.float32)     # [2TB, C]
    denom = dn[:TB]                                                   # per-row softmax sums
    numer = dn[TB:]                                                   # per-row bmm numerators

    # EUP reciprocal + one Newton step (~f32 accuracy, no VPU divide).
    inv = pl.reciprocal(denom, approx=True)
    inv = inv * (2.0 - denom * inv)

    out_ref[...] = numer * inv + lg                                   # residual add of original logits


@functools.lru_cache(maxsize=None)
def _relation_constants(num_classes):
    """Tiny 0/1 structured matrices, built once per num_classes."""
    C = num_classes
    CC = C * C
    k = np.arange(CC)
    ones_blk = (k[:, None] // C == np.arange(C)[None, :]).astype(np.float32)   # [CC, C]: 1 iff k//C == i
    rep_mat = (np.arange(C)[:, None] == (k[None, :] % C)).astype(np.float32)   # [C, CC]: 1 iff k% C == j
    return jnp.asarray(ones_blk), jnp.asarray(rep_mat)


def label_relation_encoder(features, logits, w1, b1, w2, b2, num_classes, *,
                           block_b=256, matmul_dtype=jnp.bfloat16):
    B, Fdim = features.shape
    C = num_classes
    R = w1.shape[1]
    CC = C * C
    assert logits.shape == (B, C)
    assert w1.shape == (Fdim, R) and b1.shape == (1, R)
    assert w2.shape == (R, CC) and b2.shape == (1, CC)

    # Batch tile: multiple of 8 sublanes; large so the MXU gets full row blocks.
    TB = max(8, min(int(block_b), ((B + 7) // 8) * 8))
    TB = (TB // 8) * 8
    Bp = ((B + TB - 1) // TB) * TB
    if Bp != B:                                  # pad batch; zero rows are benign, sliced off
        features = jnp.pad(features, ((0, Bp - B), (0, 0)))
        logits = jnp.pad(logits, ((0, Bp - B), (0, 0)))

    # Pre-cast MXU operands ONCE in the wrapper (halves their DMA / resident VMEM,
    # avoids re-casting grid-invariant weights every grid step).
    if matmul_dtype is not None:
        features = features.astype(matmul_dtype)
        w1 = w1.astype(matmul_dtype)
        w2 = w2.astype(matmul_dtype)

    ones_blk, rep_mat = _relation_constants(C)

    kernel = functools.partial(_label_relation_kernel, num_classes=C,
                               matmul_dtype=matmul_dtype)

    # Cost estimate (max tree removed): two GEMMs + logits replication + fused reduction.
    flops = 2 * Bp * (Fdim * R + R * CC + C * CC + 2 * CC * C)
    bytes_accessed = (features.dtype.itemsize * Bp * Fdim + 4 * Bp * C
                      + w1.dtype.itemsize * Fdim * R + 4 * R
                      + w2.dtype.itemsize * R * CC + 4 * CC
                      + 4 * (CC * C + C * CC)
                      + 4 * Bp * C)

    out = pl.pallas_call(
        kernel,
        out_shape=jax.ShapeDtypeStruct((Bp, C), jnp.float32),
        grid=(Bp // TB,),
        in_specs=[
            pl.BlockSpec((TB, Fdim), lambda i: (i, 0)),   # streamed per batch tile
            pl.BlockSpec((TB, C), lambda i: (i, 0)),
            pl.BlockSpec((Fdim, R), lambda i: (0, 0)),    # grid-invariant weights / constants
            pl.BlockSpec((1, R), lambda i: (0, 0)),
            pl.BlockSpec((R, CC), lambda i: (0, 0)),
            pl.BlockSpec((1, CC), lambda i: (0, 0)),
            pl.BlockSpec((CC, C), lambda i: (0, 0)),
            pl.BlockSpec((C, CC), lambda i: (0, 0)),
        ],
        out_specs=pl.BlockSpec((TB, C), lambda i: (i, 0)),
        compiler_params=pltpu.CompilerParams(
            dimension_semantics=("parallel",),            # megacore sharding on v7x (>=2 steps)
            vmem_limit_bytes=32 * 1024 * 1024),           # safe on v5e/v6e/v7x
        cost_estimate=pl.CostEstimate(flops=int(flops),
                                      transcendentals=int(Bp * CC),
                                      bytes_accessed=int(bytes_accessed)),
    )(features, logits, w1, b1, w2, b2, ones_blk, rep_mat)

    return out[:B]


def _reference_forward(features, logits, w1, b1, w2, b2, num_classes, matmul_dtype=None):
    """Pure-JAX reference matching the PyTorch module (optionally with bf16 GEMM inputs)."""
    if matmul_dtype is not None:
        features = features.astype(matmul_dtype)
        w1 = w1.astype(matmul_dtype)
        w2 = w2.astype(matmul_dtype)
    h = jnp.dot(features, w1, preferred_element_type=jnp.float32) + b1
    h = jnp.maximum(h, 0.0)
    if matmul_dtype is not None:
        h = h.astype(matmul_dtype)
        w2 = w2.astype(matmul_dtype)
    rel = (jnp.dot(h, w2, preferred_element_type=jnp.float32) + b2)
    rel = rel.reshape(-1, num_classes, num_classes)
    sm = jax.nn.softmax(rel, axis=-1)
    refined = jnp.einsum('bij,bj->bi', sm, logits)
    return refined + logits


if __name__ == "__main__":
    # Small shapes consistent with the module (scaled-down defaults).
    B = 200                 # not a multiple of the tile -> exercises padding
    FEATURE_DIM = 128
    NUM_CLASSES = 16
    RELATION_DIM = 64

    key = jax.random.PRNGKey(0)
    k_feat, k_logit, k_w1, k_b1, k_w2 = jax.random.split(key, 5)

    features = jax.random.normal(k_feat, (B, FEATURE_DIM), dtype=jnp.float32)
    logits = jax.random.normal(k_logit, (B, NUM_CLASSES), dtype=jnp.float32)

    # Deterministic parameter init (mirrors nn.Linear defaults / xavier_uniform + zero bias).
    bound1 = 1.0 / (FEATURE_DIM ** 0.5)
    w1 = jax.random.uniform(k_w1, (FEATURE_DIM, RELATION_DIM),
                            minval=-bound1, maxval=bound1, dtype=jnp.float32)
    b1 = jax.random.uniform(k_b1, (1, RELATION_DIM),
                            minval=-bound1, maxval=bound1, dtype=jnp.float32)
    xavier_limit = (6.0 / (RELATION_DIM + NUM_CLASSES * NUM_CLASSES)) ** 0.5
    w2 = jax.random.uniform(k_w2, (RELATION_DIM, NUM_CLASSES * NUM_CLASSES),
                            minval=-xavier_limit, maxval=xavier_limit, dtype=jnp.float32)
    b2 = jnp.zeros((1, NUM_CLASSES * NUM_CLASSES), dtype=jnp.float32)

    # block_b=128 -> 2 batch tiles (exercises pipelining, padding, megacore sharding).
    # 1) Full-f32 path: exact parity with the f32 reference.
    out_f32 = label_relation_encoder(features, logits, w1, b1, w2, b2, NUM_CLASSES,
                                     block_b=128, matmul_dtype=None)
    out_f32 = jax.block_until_ready(out_f32)
    ref_f32 = _reference_forward(features, logits, w1, b1, w2, b2, NUM_CLASSES)
    assert out_f32.shape == (B, NUM_CLASSES)
    assert jnp.allclose(out_f32, ref_f32, rtol=1e-4, atol=1e-4), (out_f32, ref_f32)

    # 2) Default bf16-MXU path: compare against a precision-matched reference.
    out_bf16 = label_relation_encoder(features, logits, w1, b1, w2, b2, NUM_CLASSES,
                                      block_b=128)
    out_bf16 = jax.block_until_ready(out_bf16)
    ref_bf16 = _reference_forward(features, logits, w1, b1, w2, b2, NUM_CLASSES,
                                  matmul_dtype=jnp.bfloat16)
    assert out_bf16.shape == (B, NUM_CLASSES)
    assert jnp.allclose(out_bf16, ref_bf16, rtol=1e-3, atol=1e-3), (out_bf16, ref_bf16)

    print("KERNEL_OK")
</pallas_src>

<mosaic_0001>
module attributes {stable_mosaic.version = 11 : i64} {
  func.func @_label_relation_kernel(%arg0: i32, %arg1: memref<128x128xf32, #tpu.memory_space<vmem>>, %arg2: memref<128x16xf32, #tpu.memory_space<vmem>>, %arg3: memref<128x64xf32, #tpu.memory_space<vmem>>, %arg4: memref<1x64xf32, #tpu.memory_space<vmem>>, %arg5: memref<64x256xf32, #tpu.memory_space<vmem>>, %arg6: memref<1x256xf32, #tpu.memory_space<vmem>>, %arg7: memref<256x16xf32, #tpu.memory_space<vmem>>, %arg8: memref<16x256xf32, #tpu.memory_space<vmem>>, %arg9: memref<128x16xf32, #tpu.memory_space<vmem>>) attributes {dimension_semantics = [#tpu.dimension_semantics<parallel>], iteration_bounds = array<i64: 2>, scalar_prefetch = 0 : i64, scratch_operands = 0 : i64, tpu.core_type = #tpu.core_type<tc>, window_params = [{transform_indices = @transform_0, window_bounds = array<i64: 128, 128>}, {transform_indices = @transform_1, window_bounds = array<i64: 128, 16>}, {pipeline_mode = #tpu.pipeline_mode<synchronous>, transform_indices = @transform_2, window_bounds = array<i64: 128, 64>}, {pipeline_mode = #tpu.pipeline_mode<synchronous>, transform_indices = @transform_3, window_bounds = array<i64: 1, 64>}, {pipeline_mode = #tpu.pipeline_mode<synchronous>, transform_indices = @transform_4, window_bounds = array<i64: 64, 256>}, {pipeline_mode = #tpu.pipeline_mode<synchronous>, transform_indices = @transform_5, window_bounds = array<i64: 1, 256>}, {pipeline_mode = #tpu.pipeline_mode<synchronous>, transform_indices = @transform_6, window_bounds = array<i64: 256, 16>}, {pipeline_mode = #tpu.pipeline_mode<synchronous>, transform_indices = @transform_7, window_bounds = array<i64: 16, 256>}, {transform_indices = @transform_8, window_bounds = array<i64: 128, 16>}]} {
    %c0 = arith.constant 0 : index
    %c0_0 = arith.constant 0 : index
    %0 = vector.load %arg1[%c0, %c0_0] : memref<128x128xf32, #tpu.memory_space<vmem>>, vector<128x128xf32>
    %c0_1 = arith.constant 0 : index
    %c0_2 = arith.constant 0 : index
    %1 = vector.load %arg2[%c0_1, %c0_2] : memref<128x16xf32, #tpu.memory_space<vmem>>, vector<128x16xf32>
    %c0_3 = arith.constant 0 : index
    %c0_4 = arith.constant 0 : index
    %2 = vector.load %arg3[%c0_3, %c0_4] : memref<128x64xf32, #tpu.memory_space<vmem>>, vector<128x64xf32>
    %cst = arith.constant dense<0.000000e+00> : vector<128x64xf32>
    %3 = tpu.matmul %0, %2, %cst {dimension_numbers = #tpu.dot_dimension_numbers<[1], [0], [0], [1], [0, 0, 1, 1], [], []>} : vector<128x128xf32>, vector<128x64xf32>, vector<128x64xf32> -> vector<128x64xf32>
    %c0_5 = arith.constant 0 : index
    %c0_6 = arith.constant 0 : index
    %4 = vector.load %arg4[%c0_5, %c0_6] : memref<1x64xf32, #tpu.memory_space<vmem>>, vector<1x64xf32>
    %5 = vector.broadcast %4 : vector<1x64xf32> to vector<128x64xf32>
    %6 = arith.addf %3, %5 : vector<128x64xf32>
    %cst_7 = arith.constant 0.000000e+00 : f32
    %7 = vector.broadcast %cst_7 : f32 to vector<128x64xf32>
    %8 = arith.maximumf %6, %7 : vector<128x64xf32>
    %c0_8 = arith.constant 0 : index
    %c0_9 = arith.constant 0 : index
    %9 = vector.load %arg5[%c0_8, %c0_9] : memref<64x256xf32, #tpu.memory_space<vmem>>, vector<64x256xf32>
    %cst_10 = arith.constant dense<0.000000e+00> : vector<128x256xf32>
    %10 = tpu.matmul %8, %9, %cst_10 {dimension_numbers = #tpu.dot_dimension_numbers<[1], [0], [0], [1], [0, 0, 1, 1], [], []>} : vector<128x64xf32>, vector<64x256xf32>, vector<128x256xf32> -> vector<128x256xf32>
    %c0_11 = arith.constant 0 : index
    %c0_12 = arith.constant 0 : index
    %11 = vector.load %arg6[%c0_11, %c0_12] : memref<1x256xf32, #tpu.memory_space<vmem>>, vector<1x256xf32>
    %12 = vector.broadcast %11 : vector<1x256xf32> to vector<128x256xf32>
    %13 = arith.addf %10, %12 : vector<128x256xf32>
    %14 = tpu.iota {dimensions = array<i32: 1>} : vector<128x256xi32>
    %cst_13 = arith.constant 0.000000e+00 : f32
    %15 = vector.broadcast %cst_13 : f32 to vector<128x256xf32>
    %16 = vector.extract_strided_slice %13 {offsets = [0, 0], sizes = [128, 16], strides = [1, 1]} : vector<128x256xf32> to vector<128x16xf32>
    %cst_14 = arith.constant dense<0xFF800000> : vector<128xf32>
    %17 = vector.multi_reduction <maximumf>, %16, %cst_14 [1] : vector<128x16xf32> to vector<128xf32>
    %18 = vector.shape_cast %17 : vector<128xf32> to vector<128x1xf32>
    %c0_i32 = arith.constant 0 : i32
    %19 = vector.broadcast %c0_i32 : i32 to vector<128x256xi32>
    %20 = arith.cmpi sge, %14, %19 : vector<128x256xi32>
    %c16_i32 = arith.constant 16 : i32
    %21 = vector.broadcast %c16_i32 : i32 to vector<128x256xi32>
    %22 = arith.cmpi slt, %14, %21 : vector<128x256xi32>
    %23 = arith.andi %20, %22 : vector<128x256xi1>
    %24 = vector.shape_cast %18 : vector<128x1xf32> to vector<128x1xf32>
    %25 = vector.broadcast %24 : vector<128x1xf32> to vector<128x256xf32>
    %26 = arith.select %23, %25, %15 : vector<128x256xi1>, vector<128x256xf32>
    %27 = vector.extract_strided_slice %13 {offsets = [0, 16], sizes = [128, 16], strides = [1, 1]} : vector<128x256xf32> to vector<128x16xf32>
    %cst_15 = arith.constant dense<0xFF800000> : vector<128xf32>
    %28 = vector.multi_reduction <maximumf>, %27, %cst_15 [1] : vector<128x16xf32> to vector<128xf32>
    %29 = vector.shape_cast %28 : vector<128xf32> to vector<128x1xf32>
    %c16_i32_16 = arith.constant 16 : i32
    %30 = vector.broadcast %c16_i32_16 : i32 to vector<128x256xi32>
    %31 = arith.cmpi sge, %14, %30 : vector<128x256xi32>
    %c32_i32 = arith.constant 32 : i32
    %32 = vector.broadcast %c32_i32 : i32 to vector<128x256xi32>
    %33 = arith.cmpi slt, %14, %32 : vector<128x256xi32>
    %34 = arith.andi %31, %33 : vector<128x256xi1>
    %35 = vector.shape_cast %29 : vector<128x1xf32> to vector<128x1xf32>
    %36 = vector.broadcast %35 : vector<128x1xf32> to vector<128x256xf32>
    %37 = arith.select %34, %36, %26 : vector<128x256xi1>, vector<128x256xf32>
    %38 = vector.extract_strided_slice %13 {offsets = [0, 32], sizes = [128, 16], strides = [1, 1]} : vector<128x256xf32> to vector<128x16xf32>
    %cst_17 = arith.constant dense<0xFF800000> : vector<128xf32>
    %39 = vector.multi_reduction <maximumf>, %38, %cst_17 [1] : vector<128x16xf32> to vector<128xf32>
    %40 = vector.shape_cast %39 : vector<128xf32> to vector<128x1xf32>
    %c32_i32_18 = arith.constant 32 : i32
    %41 = vector.broadcast %c32_i32_18 : i32 to vector<128x256xi32>
    %42 = arith.cmpi sge, %14, %41 : vector<128x256xi32>
    %c48_i32 = arith.constant 48 : i32
    %43 = vector.broadcast %c48_i32 : i32 to vector<128x256xi32>
    %44 = arith.cmpi slt, %14, %43 : vector<128x256xi32>
    %45 = arith.andi %42, %44 : vector<128x256xi1>
    %46 = vector.shape_cast %40 : vector<128x1xf32> to vector<128x1xf32>
    %47 = vector.broadcast %46 : vector<128x1xf32> to vector<128x256xf32>
    %48 = arith.select %45, %47, %37 : vector<128x256xi1>, vector<128x256xf32>
    %49 = vector.extract_strided_slice %13 {offsets = [0, 48], sizes = [128, 16], strides = [1, 1]} : vector<128x256xf32> to vector<128x16xf32>
    %cst_19 = arith.constant dense<0xFF800000> : vector<128xf32>
    %50 = vector.multi_reduction <maximumf>, %49, %cst_19 [1] : vector<128x16xf32> to vector<128xf32>
    %51 = vector.shape_cast %50 : vector<128xf32> to vector<128x1xf32>
    %c48_i32_20 = arith.constant 48 : i32
    %52 = vector.broadcast %c48_i32_20 : i32 to vector<128x256xi32>
    %53 = arith.cmpi sge, %14, %52 : vector<128x256xi32>
    %c64_i32 = arith.constant 64 : i32
    %54 = vector.broadcast %c64_i32 : i32 to vector<128x256xi32>
    %55 = arith.cmpi slt, %14, %54 : vector<128x256xi32>
    %56 = arith.andi %53, %55 : vector<128x256xi1>
    %57 = vector.shape_cast %51 : vector<128x1xf32> to vector<128x1xf32>
    %58 = vector.broadcast %57 : vector<128x1xf32> to vector<128x256xf32>
    %59 = arith.select %56, %58, %48 : vector<128x256xi1>, vector<128x256xf32>
    %60 = vector.extract_strided_slice %13 {offsets = [0, 64], sizes = [128, 16], strides = [1, 1]} : vector<128x256xf32> to vector<128x16xf32>
    %cst_21 = arith.constant dense<0xFF800000> : vector<128xf32>
    %61 = vector.multi_reduction <maximumf>, %60, %cst_21 [1] : vector<128x16xf32> to vector<128xf32>
    %62 = vector.shape_cast %61 : vector<128xf32> to vector<128x1xf32>
    %c64_i32_22 = arith.constant 64 : i32
    %63 = vector.broadcast %c64_i32_22 : i32 to vector<128x256xi32>
    %64 = arith.cmpi sge, %14, %63 : vector<128x256xi32>
    %c80_i32 = arith.constant 80 : i32
    %65 = vector.broadcast %c80_i32 : i32 to vector<128x256xi32>
    %66 = arith.cmpi slt, %14, %65 : vector<128x256xi32>
    %67 = arith.andi %64, %66 : vector<128x256xi1>
    %68 = vector.shape_cast %62 : vector<128x1xf32> to vector<128x1xf32>
    %69 = vector.broadcast %68 : vector<128x1xf32> to vector<128x256xf32>
    %70 = arith.select %67, %69, %59 : vector<128x256xi1>, vector<128x256xf32>
    %71 = vector.extract_strided_slice %13 {offsets = [0, 80], sizes = [128, 16], strides = [1, 1]} : vector<128x256xf32> to vector<128x16xf32>
    %cst_23 = arith.constant dense<0xFF800000> : vector<128xf32>
    %72 = vector.multi_reduction <maximumf>, %71, %cst_23 [1] : vector<128x16xf32> to vector<128xf32>
    %73 = vector.shape_cast %72 : vector<128xf32> to vector<128x1xf32>
    %c80_i32_24 = arith.constant 80 : i32
    %74 = vector.broadcast %c80_i32_24 : i32 to vector<128x256xi32>
    %75 = arith.cmpi sge, %14, %74 : vector<128x256xi32>
    %c96_i32 = arith.constant 96 : i32
    %76 = vector.broadcast %c96_i32 : i32 to vector<128x256xi32>
    %77 = arith.cmpi slt, %14, %76 : vector<128x256xi32>
    %78 = arith.andi %75, %77 : vector<128x256xi1>
    %79 = vector.shape_cast %73 : vector<128x1xf32> to vector<128x1xf32>
    %80 = vector.broadcast %79 : vector<128x1xf32> to vector<128x256xf32>
    %81 = arith.select %78, %80, %70 : vector<128x256xi1>, vector<128x256xf32>
    %82 = vector.extract_strided_slice %13 {offsets = [0, 96], sizes = [128, 16], strides = [1, 1]} : vector<128x256xf32> to vector<128x16xf32>
    %cst_25 = arith.constant dense<0xFF800000> : vector<128xf32>
    %83 = vector.multi_reduction <maximumf>, %82, %cst_25 [1] : vector<128x16xf32> to vector<128xf32>
    %84 = vector.shape_cast %83 : vector<128xf32> to vector<128x1xf32>
    %c96_i32_26 = arith.constant 96 : i32
    %85 = vector.broadcast %c96_i32_26 : i32 to vector<128x256xi32>
    %86 = arith.cmpi sge, %14, %85 : vector<128x256xi32>
    %c112_i32 = arith.constant 112 : i32
    %87 = vector.broadcast %c112_i32 : i32 to vector<128x256xi32>
    %88 = arith.cmpi slt, %14, %87 : vector<128x256xi32>
    %89 = arith.andi %86, %88 : vector<128x256xi1>
    %90 = vector.shape_cast %84 : vector<128x1xf32> to vector<128x1xf32>
    %91 = vector.broadcast %90 : vector<128x1xf32> to vector<128x256xf32>
    %92 = arith.select %89, %91, %81 : vector<128x256xi1>, vector<128x256xf32>
    %93 = vector.extract_strided_slice %13 {offsets = [0, 112], sizes = [128, 16], strides = [1, 1]} : vector<128x256xf32> to vector<128x16xf32>
    %cst_27 = arith.constant dense<0xFF800000> : vector<128xf32>
    %94 = vector.multi_reduction <maximumf>, %93, %cst_27 [1] : vector<128x16xf32> to vector<128xf32>
    %95 = vector.shape_cast %94 : vector<128xf32> to vector<128x1xf32>
    %c112_i32_28 = arith.constant 112 : i32
    %96 = vector.broadcast %c112_i32_28 : i32 to vector<128x256xi32>
    %97 = arith.cmpi sge, %14, %96 : vector<128x256xi32>
    %c128_i32 = arith.constant 128 : i32
    %98 = vector.broadcast %c128_i32 : i32 to vector<128x256xi32>
    %99 = arith.cmpi slt, %14, %98 : vector<128x256xi32>
    %100 = arith.andi %97, %99 : vector<128x256xi1>
    %101 = vector.shape_cast %95 : vector<128x1xf32> to vector<128x1xf32>
    %102 = vector.broadcast %101 : vector<128x1xf32> to vector<128x256xf32>
    %103 = arith.select %100, %102, %92 : vector<128x256xi1>, vector<128x256xf32>
    %104 = vector.extract_strided_slice %13 {offsets = [0, 128], sizes = [128, 16], strides = [1, 1]} : vector<128x256xf32> to vector<128x16xf32>
    %cst_29 = arith.constant dense<0xFF800000> : vector<128xf32>
    %105 = vector.multi_reduction <maximumf>, %104, %cst_29 [1] : vector<128x16xf32> to vector<128xf32>
    %106 = vector.shape_cast %105 : vector<128xf32> to vector<128x1xf32>
    %c128_i32_30 = arith.constant 128 : i32
    %107 = vector.broadcast %c128_i32_30 : i32 to vector<128x256xi32>
    %108 = arith.cmpi sge, %14, %107 : vector<128x256xi32>
    %c144_i32 = arith.constant 144 : i32
    %109 = vector.broadcast %c144_i32 : i32 to vector<128x256xi32>
    %110 = arith.cmpi slt, %14, %109 : vector<128x256xi32>
    %111 = arith.andi %108, %110 : vector<128x256xi1>
    %112 = vector.shape_cast %106 : vector<128x1xf32> to vector<128x1xf32>
    %113 = vector.broadcast %112 : vector<128x1xf32> to vector<128x256xf32>
    %114 = arith.select %111, %113, %103 : vector<128x256xi1>, vector<128x256xf32>
    %115 = vector.extract_strided_slice %13 {offsets = [0, 144], sizes = [128, 16], strides = [1, 1]} : vector<128x256xf32> to vector<128x16xf32>
    %cst_31 = arith.constant dense<0xFF800000> : vector<128xf32>
    %116 = vector.multi_reduction <maximumf>, %115, %cst_31 [1] : vector<128x16xf32> to vector<128xf32>
    %117 = vector.shape_cast %116 : vector<128xf32> to vector<128x1xf32>
    %c144_i32_32 = arith.constant 144 : i32
    %118 = vector.broadcast %c144_i32_32 : i32 to vector<128x256xi32>
    %119 = arith.cmpi sge, %14, %118 : vector<128x256xi32>
    %c160_i32 = arith.constant 160 : i32
    %120 = vector.broadcast %c160_i32 : i32 to vector<128x256xi32>
    %121 = arith.cmpi slt, %14, %120 : vector<128x256xi32>
    %122 = arith.andi %119, %121 : vector<128x256xi1>
    %123 = vector.shape_cast %117 : vector<128x1xf32> to vector<128x1xf32>
    %124 = vector.broadcast %123 : vector<128x1xf32> to vector<128x256xf32>
    %125 = arith.select %122, %124, %114 : vector<128x256xi1>, vector<128x256xf32>
    %126 = vector.extract_strided_slice %13 {offsets = [0, 160], sizes = [128, 16], strides = [1, 1]} : vector<128x256xf32> to vector<128x16xf32>
    %cst_33 = arith.constant dense<0xFF800000> : vector<128xf32>
    %127 = vector.multi_reduction <maximumf>, %126, %cst_33 [1] : vector<128x16xf32> to vector<128xf32>
    %128 = vector.shape_cast %127 : vector<128xf32> to vector<128x1xf32>
    %c160_i32_34 = arith.constant 160 : i32
    %129 = vector.broadcast %c160_i32_34 : i32 to vector<128x256xi32>
    %130 = arith.cmpi sge, %14, %129 : vector<128x256xi32>
    %c176_i32 = arith.constant 176 : i32
    %131 = vector.broadcast %c176_i32 : i32 to vector<128x256xi32>
    %132 = arith.cmpi slt, %14, %131 : vector<128x256xi32>
    %133 = arith.andi %130, %132 : vector<128x256xi1>
    %134 = vector.shape_cast %128 : vector<128x1xf32> to vector<128x1xf32>
    %135 = vector.broadcast %134 : vector<128x1xf32> to vector<128x256xf32>
    %136 = arith.select %133, %135, %125 : vector<128x256xi1>, vector<128x256xf32>
    %137 = vector.extract_strided_slice %13 {offsets = [0, 176], sizes = [128, 16], strides = [1, 1]} : vector<128x256xf32> to vector<128x16xf32>
    %cst_35 = arith.constant dense<0xFF800000> : vector<128xf32>
    %138 = vector.multi_reduction <maximumf>, %137, %cst_35 [1] : vector<128x16xf32> to vector<128xf32>
    %139 = vector.shape_cast %138 : vector<128xf32> to vector<128x1xf32>
    %c176_i32_36 = arith.constant 176 : i32
    %140 = vector.broadcast %c176_i32_36 : i32 to vector<128x256xi32>
    %141 = arith.cmpi sge, %14, %140 : vector<128x256xi32>
    %c192_i32 = arith.constant 192 : i32
    %142 = vector.broadcast %c192_i32 : i32 to vector<128x256xi32>
    %143 = arith.cmpi slt, %14, %142 : vector<128x256xi32>
    %144 = arith.andi %141, %143 : vector<128x256xi1>
    %145 = vector.shape_cast %139 : vector<128x1xf32> to vector<128x1xf32>
    %146 = vector.broadcast %145 : vector<128x1xf32> to vector<128x256xf32>
    %147 = arith.select %144, %146, %136 : vector<128x256xi1>, vector<128x256xf32>
    %148 = vector.extract_strided_slice %13 {offsets = [0, 192], sizes = [128, 16], strides = [1, 1]} : vector<128x256xf32> to vector<128x16xf32>
    %cst_37 = arith.constant dense<0xFF800000> : vector<128xf32>
    %149 = vector.multi_reduction <maximumf>, %148, %cst_37 [1] : vector<128x16xf32> to vector<128xf32>
    %150 = vector.shape_cast %149 : vector<128xf32> to vector<128x1xf32>
    %c192_i32_38 = arith.constant 192 : i32
    %151 = vector.broadcast %c192_i32_38 : i32 to vector<128x256xi32>
    %152 = arith.cmpi sge, %14, %151 : vector<128x256xi32>
    %c208_i32 = arith.constant 208 : i32
    %153 = vector.broadcast %c208_i32 : i32 to vector<128x256xi32>
    %154 = arith.cmpi slt, %14, %153 : vector<128x256xi32>
    %155 = arith.andi %152, %154 : vector<128x256xi1>
    %156 = vector.shape_cast %150 : vector<128x1xf32> to vector<128x1xf32>
    %157 = vector.broadcast %156 : vector<128x1xf32> to vector<128x256xf32>
    %158 = arith.select %155, %157, %147 : vector<128x256xi1>, vector<128x256xf32>
    %159 = vector.extract_strided_slice %13 {offsets = [0, 208], sizes = [128, 16], strides = [1, 1]} : vector<128x256xf32> to vector<128x16xf32>
    %cst_39 = arith.constant dense<0xFF800000> : vector<128xf32>
    %160 = vector.multi_reduction <maximumf>, %159, %cst_39 [1] : vector<128x16xf32> to vector<128xf32>
    %161 = vector.shape_cast %160 : vector<128xf32> to vector<128x1xf32>
    %c208_i32_40 = arith.constant 208 : i32
    %162 = vector.broadcast %c208_i32_40 : i32 to vector<128x256xi32>
    %163 = arith.cmpi sge, %14, %162 : vector<128x256xi32>
    %c224_i32 = arith.constant 224 : i32
    %164 = vector.broadcast %c224_i32 : i32 to vector<128x256xi32>
    %165 = arith.cmpi slt, %14, %164 : vector<128x256xi32>
    %166 = arith.andi %163, %165 : vector<128x256xi1>
    %167 = vector.shape_cast %161 : vector<128x1xf32> to vector<128x1xf32>
    %168 = vector.broadcast %167 : vector<128x1xf32> to vector<128x256xf32>
    %169 = arith.select %166, %168, %158 : vector<128x256xi1>, vector<128x256xf32>
    %170 = vector.extract_strided_slice %13 {offsets = [0, 224], sizes = [128, 16], strides = [1, 1]} : vector<128x256xf32> to vector<128x16xf32>
    %cst_41 = arith.constant dense<0xFF800000> : vector<128xf32>
    %171 = vector.multi_reduction <maximumf>, %170, %cst_41 [1] : vector<128x16xf32> to vector<128xf32>
    %172 = vector.shape_cast %171 : vector<128xf32> to vector<128x1xf32>
    %c224_i32_42 = arith.constant 224 : i32
    %173 = vector.broadcast %c224_i32_42 : i32 to vector<128x256xi32>
    %174 = arith.cmpi sge, %14, %173 : vector<128x256xi32>
    %c240_i32 = arith.constant 240 : i32
    %175 = vector.broadcast %c240_i32 : i32 to vector<128x256xi32>
    %176 = arith.cmpi slt, %14, %175 : vector<128x256xi32>
    %177 = arith.andi %174, %176 : vector<128x256xi1>
    %178 = vector.shape_cast %172 : vector<128x1xf32> to vector<128x1xf32>
    %179 = vector.broadcast %178 : vector<128x1xf32> to vector<128x256xf32>
    %180 = arith.select %177, %179, %169 : vector<128x256xi1>, vector<128x256xf32>
    %181 = vector.extract_strided_slice %13 {offsets = [0, 240], sizes = [128, 16], strides = [1, 1]} : vector<128x256xf32> to vector<128x16xf32>
    %cst_43 = arith.constant dense<0xFF800000> : vector<128xf32>
    %182 = vector.multi_reduction <maximumf>, %181, %cst_43 [1] : vector<128x16xf32> to vector<128xf32>
    %183 = vector.shape_cast %182 : vector<128xf32> to vector<128x1xf32>
    %c240_i32_44 = arith.constant 240 : i32
    %184 = vector.broadcast %c240_i32_44 : i32 to vector<128x256xi32>
    %185 = arith.cmpi sge, %14, %184 : vector<128x256xi32>
    %c256_i32 = arith.constant 256 : i32
    %186 = vector.broadcast %c256_i32 : i32 to vector<128x256xi32>
    %187 = arith.cmpi slt, %14, %186 : vector<128x256xi32>
    %188 = arith.andi %185, %187 : vector<128x256xi1>
    %189 = vector.shape_cast %183 : vector<128x1xf32> to vector<128x1xf32>
    %190 = vector.broadcast %189 : vector<128x1xf32> to vector<128x256xf32>
    %191 = arith.select %188, %190, %180 : vector<128x256xi1>, vector<128x256xf32>
    %192 = arith.subf %13, %191 : vector<128x256xf32>
    %193 = math.exp %192 : vector<128x256xf32>
    %c0_45 = arith.constant 0 : index
    %c0_46 = arith.constant 0 : index
    %194 = vector.load %arg8[%c0_45, %c0_46] : memref<16x256xf32, #tpu.memory_space<vmem>>, vector<16x256xf32>
    %cst_47 = arith.constant dense<0.000000e+00> : vector<128x256xf32>
    %195 = tpu.matmul %1, %194, %cst_47 {dimension_numbers = #tpu.dot_dimension_numbers<[1], [0], [0], [1], [0, 0, 1, 1], [], []>} : vector<128x16xf32>, vector<16x256xf32>, vector<128x256xf32> -> vector<128x256xf32>
    %196 = arith.mulf %193, %195 : vector<128x256xf32>
    %197 = tpu.concatenate %193, %196 in 0 : vector<128x256xf32>, vector<128x256xf32> -> vector<256x256xf32>
    %c0_48 = arith.constant 0 : index
    %c0_49 = arith.constant 0 : index
    %198 = vector.load %arg7[%c0_48, %c0_49] : memref<256x16xf32, #tpu.memory_space<vmem>>, vector<256x16xf32>
    %cst_50 = arith.constant dense<0.000000e+00> : vector<256x16xf32>
    %199 = tpu.matmul %197, %198, %cst_50 {dimension_numbers = #tpu.dot_dimension_numbers<[1], [0], [0], [1], [0, 0, 1, 1], [], []>} : vector<256x256xf32>, vector<256x16xf32>, vector<256x16xf32> -> vector<256x16xf32>
    %200 = vector.extract_strided_slice %199 {offsets = [0, 0], sizes = [128, 16], strides = [1, 1]} : vector<256x16xf32> to vector<128x16xf32>
    %201 = vector.extract_strided_slice %199 {offsets = [128, 0], sizes = [128, 16], strides = [1, 1]} : vector<256x16xf32> to vector<128x16xf32>
    %202 = tpu.reciprocal %200 {approx = true} : vector<128x16xf32> -> vector<128x16xf32>
    %203 = arith.mulf %200, %202 : vector<128x16xf32>
    %cst_51 = arith.constant 2.000000e+00 : f32
    %204 = vector.broadcast %cst_51 : f32 to vector<128x16xf32>
    %205 = arith.subf %204, %203 : vector<128x16xf32>
    %206 = arith.mulf %202, %205 : vector<128x16xf32>
    %207 = arith.mulf %201, %206 : vector<128x16xf32>
    %208 = arith.addf %207, %1 : vector<128x16xf32>
    %c0_52 = arith.constant 0 : index
    %c0_53 = arith.constant 0 : index
    %209 = vector.load %arg9[%c0_52, %c0_53] : memref<128x16xf32, #tpu.memory_space<vmem>>, vector<128x16xf32>
    tpu.vector_store %arg9[%c0_52, %c0_53], %208 {strides = array<i32>} : memref<128x16xf32, #tpu.memory_space<vmem>>, vector<128x16xf32>,
    return
  }
  func.func @transform_0(%arg0: i32) -> (i32, i32) {
    %c0_i32 = arith.constant 0 : i32
    %c0_i32_0 = arith.constant 0 : i32
    return %arg0, %c0_i32 : i32, i32
  }
  func.func @transform_1(%arg0: i32) -> (i32, i32) {
    %c0_i32 = arith.constant 0 : i32
    %c0_i32_0 = arith.constant 0 : i32
    return %arg0, %c0_i32 : i32, i32
  }
  func.func @transform_2(%arg0: i32) -> (i32, i32) {
    %c0_i32 = arith.constant 0 : i32
    %c0_i32_0 = arith.constant 0 : i32
    %c0_i32_1 = arith.constant 0 : i32
    return %c0_i32, %c0_i32_0 : i32, i32
  }
  func.func @transform_3(%arg0: i32) -> (i32, i32) {
    %c0_i32 = arith.constant 0 : i32
    %c0_i32_0 = arith.constant 0 : i32
    %c0_i32_1 = arith.constant 0 : i32
    return %c0_i32, %c0_i32_0 : i32, i32
  }
  func.func @transform_4(%arg0: i32) -> (i32, i32) {
    %c0_i32 = arith.constant 0 : i32
    %c0_i32_0 = arith.constant 0 : i32
    %c0_i32_1 = arith.constant 0 : i32
    return %c0_i32, %c0_i32_0 : i32, i32
  }
  func.func @transform_5(%arg0: i32) -> (i32, i32) {
    %c0_i32 = arith.constant 0 : i32
    %c0_i32_0 = arith.constant 0 : i32
    %c0_i32_1 = arith.constant 0 : i32
    return %c0_i32, %c0_i32_0 : i32, i32
  }
  func.func @transform_6(%arg0: i32) -> (i32, i32) {
    %c0_i32 = arith.constant 0 : i32
    %c0_i32_0 = arith.constant 0 : i32
    %c0_i32_1 = arith.constant 0 : i32
    return %c0_i32, %c0_i32_0 : i32, i32
  }
  func.func @transform_7(%arg0: i32) -> (i32, i32) {
    %c0_i32 = arith.constant 0 : i32
    %c0_i32_0 = arith.constant 0 : i32
    %c0_i32_1 = arith.constant 0 : i32
    return %c0_i32, %c0_i32_0 : i32, i32
  }
  func.func @transform_8(%arg0: i32) -> (i32, i32) {
    %c0_i32 = arith.constant 0 : i32
    %c0_i32_0 = arith.constant 0 : i32
    return %arg0, %c0_i32 : i32, i32
  }
}

</mosaic_0001>

<bundles_post_ra>
// kernel: tpu_custom_call.1
= control target key start
LH: loop header
LB: loop body
LE: loop exit
PB: predicated region body
PF: predicated region fallthrough
CT: control target
= control target key end

     0   :  { %s3393_s27 = smov 0   ;;  %s5447_s0 = inlined_call_operand.vmem [shape: f32[256,128], index: 0, kind: input, shape index: {}]   ;;  %s5448_s1 = inlined_call_operand.vmem [shape: f32[256,16], index: 1, kind: input, shape index: {}]   ;;  %s5449_s2 = inlined_call_operand.vmem [shape: f32[128,64], index: 2, kind: input, shape index: {}]   ;;  %s5450_s3 = inlined_call_operand.vmem [shape: f32[1,64], index: 3, kind: input, shape index: {}]   ;;  %s5451_s4 = inlined_call_operand.vmem [shape: f32[64,256], index: 4, kind: input, shape index: {}]   ;;  %s5452_s5 = inlined_call_operand.vmem [shape: f32[1,256], index: 5, kind: input, shape index: {}]   ;;  %s5453_s6 = inlined_call_operand.vmem [shape: f32[256,16], index: 6, kind: input, shape index: {}]   ;;  %s5454_s7 = inlined_call_operand.vmem [shape: f32[16,256], index: 7, kind: input, shape index: {}]   ;;  %s5455_s8 = inlined_call_operand.vmem [shape: f32[256,16], index: 8, kind: output, shape index: {}]  }
   0x1 LB: > { %s2950_s28 = sadd.s32 4294967295, %s3344_s27   ;;  %p2954_p0 = scmp.ge.s32.totalorder %s3344_s27, 1  ;;  %s3344_s27 = sphi %s3393_s27, %s18_s27  }
   0x2   : > { %p274_p1 = scmp.lt.s32.totalorder %s3344_s27, 3 }
   0x4   : > { %p275_p2 = pnand %p2954_p0, %p274_p1 }
   0x6   : > { %278 = sbr.rel (%p275_p2) target bundleno = 1391 (0x56f), region = 52 }
   0xd   : > { %v363_v0 = vld [vmem:[%s5449_s2] sm:$0xff]  ;;  %v364_v1 = vld [vmem:[%s5449_s2 + $0x8] sm:$0xff]  ;;  %v365_v2 = vld [vmem:[%s5449_s2 + $0x10] sm:$0xff]  ;;  %s2955_s13 = sshll.u32 %s2950_s28, 4  ;;  %v3346_v56 = vmov 0.0   ;;  %vm5459_vm0 = vcmask 130048  }
   0xe   : > { %v3084_v3 = vpack.c.bf16 %v364_v1, %v363_v0  ;;  %v366_v4 = vld [vmem:[%s5449_s2 + $0x18] sm:$0xff]  ;;  %p314_p3 = scmp.lt.s32.totalorder %s2955_s13, 31  ;;  %v367_v6 = vld [vmem:[%s5449_s2 + $0x20] sm:$0xff]  ;;  %v368_v7 = vld [vmem:[%s5449_s2 + $0x28] sm:$0xff]  ;;  %688 = vmatprep.mubr.f32.mxu1 %v3346_v56  ;;  %vm575_vm1 = vcmask 523264   ;;  %vm5461_vm2 = vcmask 654848  }
   0xf   : > { %v3088_v5 = vpack.c.bf16 %v366_v4, %v365_v2  ;;  %v3092_v8 = vpack.c.bf16 %v368_v7, %v367_v6  ;;  %v369_v9 = vld [vmem:[%s5449_s2 + $0x30] sm:$0xff]  ;;  %v548_v10 = vld [vmem:[%s5451_s4 + $0x8] sm:$0xff]  ;;  %v550_v11 = vld [vmem:[%s5451_s4 + $0x18] sm:$0xff]  ;;  %vm5464_vm3 = vcmask 1048448   ;;  %vm5463_vm4 = vcmask 261248  }
  0x10   : > { %3085 = vmatprep.subr.bf16.mxu0 %v3084_v3  ;;  %s5819_s13 = smov (!%p314_p3, %s2955_s13), 31  ;;  %v370_v12 = vld [vmem:[%s5449_s2 + $0x38] sm:$0xff]  ;;  %v3116_v13 = vpack.c.bf16 %v550_v11, %v548_v10  ;;  %v547_v14 = vld [vmem:[%s5451_s4] sm:$0xff]  ;;  %v549_v15 = vld [vmem:[%s5451_s4 + $0x10] sm:$0xff]  ;;  %vm5462_vm5 = vcmask 392448   ;;  %vm5456_vm6 = vcmask 523648  }
  0x11   : > { %3087 = vmatpush3.bf16.msra.mxu0 %v3084_v3  ;;  %s3422_s22 = sshll.u32 %s5819_s13, 3  ;;  %v3118_v17 = vpack.c.bf16 %v549_v15, %v547_v14  ;;  %v552_v18 = vld [vmem:[%s5451_s4 + $0x28] sm:$0xff]  ;;  %v3096_v19 = vpack.c.bf16 %v370_v12, %v369_v9  ;;  %v371_v20 = vld [vmem:[%s5449_s2 + $0x40] sm:$0xff]  ;;  %v554_v22 = vld [vmem:[%s5451_s4 + $0x38] sm:$0xff]  ;;  %vm5460_vm7 = vcmask 786048   ;;  %vm5457_vm8 = vcmask 917248  }
  0x12   : > { %3089 = vmatprep.subr.bf16.mxu0 %v3088_v5  ;;  %s3437_s10 = scalar_lea.vmem %s5447_s0, %s3422_s22  ;;  %v372_v21 = vld [vmem:[%s5449_s2 + $0x48] sm:$0xff]  ;;  %3117 = vmatprep.subr.bf16.mxu1 %v3116_v13  ;;  %v3120_v23 = vpack.c.bf16 %v554_v22, %v552_v18  ;;  %v551_v24 = vld [vmem:[%s5451_s4 + $0x20] sm:$0xff]  ;;  %v553_v25 = vld [vmem:[%s5451_s4 + $0x30] sm:$0xff]  ;;  %s5375_s21 = scalar_lea.vmem %s5455_s8, %s3422_s22 }
  0x13   : > { %v331_v16 = vld [vmem:[%s3437_s10] sm:$0xff]  ;;  %3119 = vmatpush1.bf16.msra.mxu1 %v3118_v17  ;;  %v556_v26 = vld [vmem:[%s5451_s4 + $0x48] sm:$0xff]  ;;  %v3122_v27 = vpack.c.bf16 %v553_v25, %v551_v24  ;;  %v558_v28 = vld [vmem:[%s5451_s4 + $0x58] sm:$0xff]  ;;  %v3100_v32 = vpack.c.bf16 %v372_v21, %v371_v20 }
  0x14   : > { %3060 = vmatprep.mubr.f32.mxu0 %v331_v16  ;;  %v555_v29 = vld [vmem:[%s5451_s4 + $0x40] sm:$0xff]  ;;  %v557_v30 = vld [vmem:[%s5451_s4 + $0x50] sm:$0xff]  ;;  %3121 = vmatprep.subr.bf16.mxu1 %v3120_v23  ;;  %v3124_v31 = vpack.c.bf16 %v558_v28, %v556_v26  ;;  %v374_v34 = vld [vmem:[%s5449_s2 + $0x58] sm:$0xff] }
  0x15   : > { %3091 = vmatpush3.bf16.msra.mxu0 %v3088_v5  ;;  %v373_v33 = vld [vmem:[%s5449_s2 + $0x50] sm:$0xff]  ;;  %v3126_v35 = vpack.c.bf16 %v557_v30, %v555_v29  ;;  %v375_v37 = vld [vmem:[%s5449_s2 + $0x60] sm:$0xff]  ;;  %v376_v38 = vld [vmem:[%s5449_s2 + $0x68] sm:$0xff] }
  0x16   : > { %3093 = vmatprep.subr.bf16.mxu0 %v3092_v8  ;;  %v3104_v36 = vpack.c.bf16 %v374_v34, %v373_v33  ;;  %v3108_v39 = vpack.c.bf16 %v376_v38, %v375_v37  ;;  %v377_v40 = vld [vmem:[%s5449_s2 + $0x70] sm:$0xff]  ;;  %v378_v41 = vld [vmem:[%s5449_s2 + $0x78] sm:$0xff]  ;;  %v332_v43 = vld [vmem:[%s3437_s10 + $0x8] sm:$0xff] }
  0x17   : > { %3123 = vmatpush1.bf16.msra.mxu1 %v3122_v27  ;;  %v3112_v42 = vpack.c.bf16 %v378_v41, %v377_v40  ;;  %v333_v44 = vld [vmem:[%s3437_s10 + $0x10] sm:$0xff]  ;;  %v334_v45 = vld [vmem:[%s3437_s10 + $0x18] sm:$0xff]  ;;  %v335_v46 = vld [vmem:[%s3437_s10 + $0x20] sm:$0xff] }
  0x18   : > { %3125 = vmatprep.subr.bf16.mxu1 %v3124_v31  ;;  %v336_v47 = vld [vmem:[%s3437_s10 + $0x28] sm:$0xff]  ;;  %v337_v48 = vld [vmem:[%s3437_s10 + $0x30] sm:$0xff]  ;;  %v338_v49 = vld [vmem:[%s3437_s10 + $0x38] sm:$0xff] }
  0x19   : > { %3095 = vmatpush3.bf16.msra.mxu0 %v3092_v8  ;;  %v560_v50 = vld [vmem:[%s5451_s4 + $0x68] sm:$0xff]  ;;  %v562_v51 = vld [vmem:[%s5451_s4 + $0x78] sm:$0xff]  ;;  %v559_v53 = vld [vmem:[%s5451_s4 + $0x60] sm:$0xff] }
  0x1a   : > { %3097 = vmatprep.subr.bf16.mxu0 %v3096_v19  ;;  %v3128_v52 = vpack.c.bf16 %v562_v51, %v560_v50  ;;  %v561_v54 = vld [vmem:[%s5451_s4 + $0x70] sm:$0xff]  ;;  %v339_v57 = vld [vmem:[%s3437_s10 + $0x40] sm:$0xff]  ;;  %v340_v58 = vld [vmem:[%s3437_s10 + $0x48] sm:$0xff] }
  0x1b   : > { %3127 = vmatpush1.bf16.msra.mxu1 %v3126_v35  ;;  %v3130_v55 = vpack.c.bf16 %v561_v54, %v559_v53  ;;  %v341_v59 = vld [vmem:[%s3437_s10 + $0x50] sm:$0xff]  ;;  %v342_v60 = vld [vmem:[%s3437_s10 + $0x58] sm:$0xff]  ;;  %v343_v61 = vld [vmem:[%s3437_s10 + $0x60] sm:$0xff] }
  0x1c   : > { %3129 = vmatprep.subr.bf16.mxu1 %v3128_v52  ;;  %v344_v62 = vld [vmem:[%s3437_s10 + $0x68] sm:$0xff]  ;;  %v345_v63 = vld [vmem:[%s3437_s10 + $0x70] sm:$0xff]  ;;  %v346_v0 = vld [vmem:[%s3437_s10 + $0x78] sm:$0xff]  ;;  %s3538_s10 = scalar_lea.vmem %s5448_s1, %s3422_s22 }
  0x1d   : > { %3099 = vmatpush3.bf16.msra.mxu0 %v3096_v19  ;;  %v2269_v1 = vld [vmem:[%s5454_s7 + $0x8] sm:$0xff]  ;;  %v2271_v2 = vld [vmem:[%s5454_s7 + $0x18] sm:$0xff]  ;;  %v2268_v3 = vld [vmem:[%s5454_s7] sm:$0xff] }
  0x1e   : > { %3101 = vmatprep.subr.bf16.mxu0 %v3100_v32  ;;  %v2270_v4 = vld [vmem:[%s5454_s7 + $0x10] sm:$0xff]  ;;  %v3132_v5 = vpack.c.bf16 %v2271_v2, %v2269_v1  ;;  %v347_v7 = vld [vmem:[%s3538_s10] sm:$0xff]  ;;  %v348_v8 = vld [vmem:[%s3538_s10 + $0x8] sm:$0xff] }
  0x1f   : > { %3131 = vmatpush1.bf16.msra.mxu1 %v3130_v55  ;;  %v3134_v6 = vpack.c.bf16 %v2270_v4, %v2268_v3  ;;  %v3550_v9 = vld [vmem:[%s5450_s3] ss:$0 sm:$0xff]  ;;  %v349_v35 = vld [vmem:[%s3538_s10 + $0x10] sm:$0xff]  ;;  %v2514_v1 = vld [vmem:[%s5453_s6 + $0x8] sm:$0xff]  ;;  %v3347_v4 = vmov 0.0|0.0  }
  0x20   : > { %v563_v54 = vld [vmem:[%s5452_s5] sm:$0x3]  ;;  %3184 = vmatprep.subr.bf16.mxu1 %v3347_v4 }
  0x21   : > { %3103 = vmatpush3.bf16.msra.mxu0 %v3100_v32 }
  0x22   : > { %3105 = vmatprep.subr.bf16.mxu0 %v3104_v36 }
  0x25   : > { %3107 = vmatpush3.bf16.msra.mxu0 %v3104_v36 }
  0x26   : > { %3109 = vmatprep.subr.bf16.mxu0 %v3108_v39 }
  0x29   : > { %3111 = vmatpush3.bf16.msra.mxu0 %v3108_v39 }
  0x2a   : > { %3113 = vmatprep.subr.bf16.mxu0 %v3112_v42 }
  0x2d   : > { %3115 = vmatpush3.bf16.msra.mxu0 %v3112_v42 }
  0x2e   : > { %3133 = vmatprep.subr.bf16.mxu0 %v3132_v5 }
  0x30   : > { %3061 = vmatmul.mubr.f32.vlgmr.msra.gmra.mrb[0].mxu0 %v332_v43 }
  0x31   : > { %3063 = vmatprep.mubr.f32.mxu0 %v333_v44  ;;  %3135 = vmatpush1.bf16.msra.mxu0 %v3134_v6 }
  0x32   : > { %3136 = vmatprep.subr.bf16.mxu0 %v3347_v4 }
  0x34   : > { %3064 = vmatmul.mubr.f32.gmra.mrb[2].mxu0 %v334_v45 }
  0x35   : > { %3066 = vmatprep.mubr.f32.mxu0 %v335_v46 }
  0x38   : > { %3067 = vmatmul.mubr.f32.gmra.mrb[4].mxu0 %v336_v47  ;;  %v350_v47 = vld [vmem:[%s3538_s10 + $0x18] sm:$0xff] }
  0x39   : > { %3069 = vmatprep.mubr.f32.mxu0 %v337_v48  ;;  %v351_v48 = vld [vmem:[%s3538_s10 + $0x20] sm:$0xff] }
  0x3c   : > { %3070 = vmatmul.mubr.f32.gmra.mrb[6].mxu0 %v338_v49  ;;  %v565_v49 = vlaneseq }
  0x3d   : > { %3072 = vmatprep.mubr.f32.mxu0 %v339_v57 }
  0x3e   : > { %v566_v50 = vshrl.u32 %v565_v49, 7 }
  0x40   : > { %3073 = vmatmul.mubr.f32.gmra.mrb[8].mxu0 %v340_v58  ;;  %v567_v52 = vsub.s32 0, %v566_v50 }
  0x41   : > { %3075 = vmatprep.mubr.f32.mxu0 %v341_v59  ;;  %v352_v59 = vld [vmem:[%s3538_s10 + $0x28] sm:$0xff] }
  0x44   : > { %3076 = vmatmul.mubr.f32.gmra.mrb[10].mxu0 %v342_v60  ;;  %v3604_v60 = vrot.slane %v563_v54, %v567_v52  ;;  %v2524_v52 = vld [vmem:[%s5453_s6 + $0x58] sm:$0xff] }
  0x45   : > { %3078 = vmatprep.mubr.f32.mxu0 %v343_v61 }
  0x48   : > { %3079 = vmatmul.mubr.f32.gmra.mrb[12].mxu0 %v344_v62  ;;  %v571_v62 = vsub.s32 1, %v566_v50 }
  0x49   : > { %3081 = vmatprep.mubr.f32.mxu0 %v345_v63 }
  0x4a   : > { %v3622_v6 = vrot.slane %v563_v54, %v571_v62 }
  0x4c   : > { %3082 = vmatmul.mubr.f32.gmra.mrb[14].mxu0 %v346_v0  ;;  %v2513_v0 = vld [vmem:[%s5453_s6] sm:$0xff] }
  0x4d   : > { %2384 = vmatprep.mubr.f32.mxu0 %v3346_v56  ;;  %v3137_v5 = vpack.c.bf16 %v2514_v1, %v2513_v0  ;;  %v2527_v0 = vld [vmem:[%s5453_s6 + $0x70] sm:$0xff]  ;;  %v2528_v1 = vld [vmem:[%s5453_s6 + $0x78] sm:$0xff] }
  0x50   : > { %2978 = vmatmul.mubr.msk.f32.vlgmr.msra.gmra.mrb[16].mxu0 %vm5459_vm0, %v347_v7 }
  0x51   : > { %2390 = vmatprep.mubr.f32.mxu0 %v3346_v56  ;;  %3138 = vmatpush1.bf16.msra.mxu0 %v3137_v5 }
  0x52   : > { %3139 = vmatprep.subr.bf16.mxu0 %v3347_v4 }
  0x54   : > { %2979 = vmatmul.mubr.msk.f32.gmra.mrb[18].mxu0 %vm5459_vm0, %v348_v8 }
  0x55   : > { %2396 = vmatprep.mubr.f32.mxu0 %v3346_v56 }
  0x58   : > { %2980 = vmatmul.mubr.msk.f32.gmra.mrb[20].mxu0 %vm5459_vm0, %v349_v35 }
  0x59   : > { %2402 = vmatprep.mubr.f32.mxu0 %v3346_v56 }
  0x5c   : > { %2981 = vmatmul.mubr.msk.f32.gmra.mrb[22].mxu0 %vm5459_vm0, %v350_v47 }
  0x5d   : > { %2408 = vmatprep.mubr.f32.mxu0 %v3346_v56 }
  0x60   : > { %2982 = vmatmul.mubr.msk.f32.gmra.mrb[24].mxu0 %vm5459_vm0, %v351_v48 }
  0x61   : > { %2414 = vmatprep.mubr.f32.mxu0 %v3346_v56 }
  0x64   : > { %2983 = vmatmul.mubr.msk.f32.gmra.mrb[26].mxu0 %vm5459_vm0, %v352_v59  ;;  %v2526_v59 = vld [vmem:[%s5453_s6 + $0x68] sm:$0xff] }
  0x65   : > { %2420 = vmatprep.mubr.f32.mxu0 %v3346_v56 }
 0x103   : > { %v3062_v10 = vpop.f32.mrb[0].mxu0 }
 0x104   : > { %v452_v11 = vpop.f32.mrb[1].mxu0  ;;  %v458_v13 = vadd.f32 %v3062_v10, %v3550_v9 }
 0x105   : > { %v453_v12 = vadd.f32 %v3550_v9, %v452_v11 }
 0x106   : > { %v532_v18 = vmax.f32 %v458_v13, 0.0 }
 0x107   : > { %v531_v14 = vmax.f32 %v453_v12, 0.0  ;;  %v3065_v15 = vpop.f32.mrb[2].mxu0 }
 0x108   : > { %v462_v16 = vpop.f32.mrb[3].mxu0  ;;  %v468_v21 = vadd.f32 %v3065_v15, %v3550_v9 }
 0x109   : > { %2962 = vmatmul.mubr.msk.f32.vlgmr.msra.gmra.mrb[0].mxu1 %vm575_vm1, %v531_v14  ;;  %v463_v17 = vadd.f32 %v3550_v9, %v462_v16 }
 0x10a   : > { %694 = vmatprep.mubr.f32.mxu1 %v3346_v56  ;;  %v534_v25 = vmax.f32 %v468_v21, 0.0  ;;  %3200 = vmatpush1.bf16.msra.mxu1 %v3137_v5 }
 0x10b   : > { %v3068_v19 = vpop.f32.mrb[4].mxu0  ;;  %v533_v22 = vmax.f32 %v463_v17, 0.0  ;;  %3185 = vmatprep.subr.bf16.mxu1 %v3347_v4 }
 0x10c   : > { %v472_v20 = vpop.f32.mrb[5].mxu0  ;;  %v478_v27 = vadd.f32 %v3068_v19, %v3550_v9 }
 0x10d   : > { %2963 = vmatmul.mubr.msk.f32.gmra.mrb[2].mxu1 %vm575_vm1, %v532_v18  ;;  %v473_v26 = vadd.f32 %v3550_v9, %v472_v20 }
 0x10e   : > { %700 = vmatprep.mubr.f32.mxu1 %v3346_v56  ;;  %v536_v29 = vmax.f32 %v478_v27, 0.0 }
 0x10f   : > { %v3071_v23 = vpop.f32.mrb[6].mxu0  ;;  %v535_v28 = vmax.f32 %v473_v26, 0.0  ;;  %v2516_v26 = vld [vmem:[%s5453_s6 + $0x18] sm:$0xff] }
 0x110   : > { %v482_v24 = vpop.f32.mrb[7].mxu0  ;;  %v488_v31 = vadd.f32 %v3071_v23, %v3550_v9 }
 0x111   : > { %2964 = vmatmul.mubr.msk.f32.gmra.mrb[4].mxu1 %vm575_vm1, %v533_v22  ;;  %v483_v30 = vadd.f32 %v3550_v9, %v482_v24 }
 0x112   : > { %706 = vmatprep.mubr.f32.mxu1 %v3346_v56  ;;  %v538_v33 = vmax.f32 %v488_v31, 0.0  ;;  %v2518_v31 = vld [vmem:[%s5453_s6 + $0x28] sm:$0xff] }
 0x113   : > { %v537_v32 = vmax.f32 %v483_v30, 0.0  ;;  %v3074_v34 = vpop.f32.mrb[8].mxu0  ;;  %v2517_v30 = vld [vmem:[%s5453_s6 + $0x20] sm:$0xff] }
 0x114   : > { %v492_v36 = vpop.f32.mrb[9].mxu0  ;;  %v498_v37 = vadd.f32 %v3074_v34, %v3550_v9 }
 0x115   : > { %2965 = vmatmul.mubr.msk.f32.gmra.mrb[6].mxu1 %vm575_vm1, %v534_v25  ;;  %v493_v38 = vadd.f32 %v3550_v9, %v492_v36  ;;  %v2515_v25 = vld [vmem:[%s5453_s6 + $0x10] sm:$0xff]  ;;  %v3143_v36 = vpack.c.bf16 %v2518_v31, %v2517_v30  ;;  %v2533_v31 = vld [vmem:[%s5453_s6 + $0xa0] sm:$0xff] }
 0x116   : > { %712 = vmatprep.mubr.f32.mxu1 %v3346_v56  ;;  %v540_v40 = vmax.f32 %v498_v37, 0.0  ;;  %v2519_v37 = vld [vmem:[%s5453_s6 + $0x30] sm:$0xff] }
 0x117   : > { %v539_v39 = vmax.f32 %v493_v38, 0.0  ;;  %v3077_v41 = vpop.f32.mrb[10].mxu0  ;;  %v2520_v38 = vld [vmem:[%s5453_s6 + $0x38] sm:$0xff] }
 0x118   : > { %v502_v42 = vpop.f32.mrb[11].mxu0  ;;  %v508_v43 = vadd.f32 %v3077_v41, %v3550_v9 }
 0x119   : > { %2966 = vmatmul.mubr.msk.f32.gmra.mrb[8].mxu1 %vm575_vm1, %v535_v28  ;;  %v503_v44 = vadd.f32 %v3550_v9, %v502_v42 }
 0x11a   : > { %718 = vmatprep.mubr.f32.mxu1 %v3346_v56  ;;  %v542_v46 = vmax.f32 %v508_v43, 0.0  ;;  %v3146_v43 = vpack.c.bf16 %v2520_v38, %v2519_v37 }
 0x11b   : > { %v541_v45 = vmax.f32 %v503_v44, 0.0  ;;  %v3080_v51 = vpop.f32.mrb[12].mxu0  ;;  %v2521_v44 = vld [vmem:[%s5453_s6 + $0x40] sm:$0xff] }
 0x11c   : > { %v512_v53 = vpop.f32.mrb[13].mxu0  ;;  %v518_v55 = vadd.f32 %v3080_v51, %v3550_v9  ;;  %v2523_v51 = vld [vmem:[%s5453_s6 + $0x50] sm:$0xff] }
 0x11d   : > { %2967 = vmatmul.mubr.msk.f32.gmra.mrb[10].mxu1 %vm575_vm1, %v536_v29  ;;  %v513_v57 = vadd.f32 %v3550_v9, %v512_v53  ;;  %v355_v53 = vld [vmem:[%s3538_s10 + $0x40] sm:$0xff] }
 0x11e   : > { %724 = vmatprep.mubr.f32.mxu1 %v3346_v56  ;;  %v544_v61 = vmax.f32 %v518_v55, 0.0 }
 0x11f   : > { %v543_v58 = vmax.f32 %v513_v57, 0.0  ;;  %v3152_v57 = vpack.c.bf16 %v2524_v52, %v2523_v51  ;;  %v3083_v38 = vpop.f32.mrb[14].mxu0 }
 0x121   : > { %2968 = vmatmul.mubr.msk.f32.gmra.mrb[12].mxu1 %vm575_vm1, %v537_v32 }
 0x122   : > { %730 = vmatprep.mubr.f32.mxu1 %v3346_v56 }
 0x125   : > { %2969 = vmatmul.mubr.msk.f32.gmra.mrb[14].mxu1 %vm575_vm1, %v538_v33  ;;  %v3140_v33 = vpack.c.bf16 %v2516_v26, %v2515_v25  ;;  %v358_v25 = vld [vmem:[%s3538_s10 + $0x58] sm:$0xff]  ;;  %v2531_v26 = vld [vmem:[%s5453_s6 + $0x90] sm:$0xff] }
 0x126   : > { %736 = vmatprep.mubr.f32.mxu1 %v3346_v56 }
 0x127   : > { %3141 = vmatpush1.bf16.msra.mxu0 %v3140_v33  ;;  %3201 = vmatpush1.bf16.msra.mxu1 %v3140_v33  ;;  %v2534_v33 = vld [vmem:[%s5453_s6 + $0xa8] sm:$0xff] }
 0x128   : > { %3142 = vmatprep.subr.bf16.mxu0 %v3347_v4  ;;  %3186 = vmatprep.subr.bf16.mxu1 %v3347_v4  ;;  %v3167_v37 = vpack.c.bf16 %v2534_v33, %v2533_v31 }
 0x129   : > { %2970 = vmatmul.mubr.msk.f32.gmra.mrb[16].mxu1 %vm575_vm1, %v539_v39  ;;  %v353_v39 = vld [vmem:[%s3538_s10 + $0x30] sm:$0xff] }
 0x12a   : > { %742 = vmatprep.mubr.f32.mxu1 %v3346_v56  ;;  %2984 = vmatmul.mubr.msk.f32.gmra.mrb[28].mxu0 %vm5459_vm0, %v353_v39  ;;  %v360_v39 = vld [vmem:[%s3538_s10 + $0x68] sm:$0xff] }
 0x12b   : > { %3144 = vmatpush1.bf16.msra.mxu0 %v3143_v36  ;;  %3202 = vmatpush1.bf16.msra.mxu1 %v3143_v36 }
 0x12c   : > { %3145 = vmatprep.subr.bf16.mxu0 %v3347_v4  ;;  %2426 = vmatprep.mubr.f32.mxu0 %v3346_v56 }
 0x12d   : > { %2971 = vmatmul.mubr.msk.f32.gmra.mrb[18].mxu1 %vm575_vm1, %v540_v40  ;;  %3187 = vmatprep.subr.bf16.mxu1 %v3347_v4 }
 0x12e   : > { %748 = vmatprep.mubr.f32.mxu1 %v3346_v56 }
 0x12f   : > { %3147 = vmatpush1.bf16.msra.mxu0 %v3146_v43  ;;  %3203 = vmatpush1.bf16.msra.mxu1 %v3146_v43  ;;  %v2536_v43 = vld [vmem:[%s5453_s6 + $0xb8] sm:$0xff] }
 0x130   : > { %3148 = vmatprep.subr.bf16.mxu0 %v3347_v4  ;;  %3188 = vmatprep.subr.bf16.mxu1 %v3347_v4 }
 0x131   : > { %2972 = vmatmul.mubr.msk.f32.gmra.mrb[20].mxu1 %vm575_vm1, %v541_v45  ;;  %v2522_v45 = vld [vmem:[%s5453_s6 + $0x48] sm:$0xff] }
 0x132   : > { %754 = vmatprep.mubr.f32.mxu1 %v3346_v56  ;;  %v3149_v50 = vpack.c.bf16 %v2522_v45, %v2521_v44  ;;  %v522_v44 = vpop.f32.mrb[15].mxu0 }
 0x134   : > { %3150 = vmatpush1.bf16.msra.mxu0 %v3149_v50  ;;  %3204 = vmatpush1.bf16.msra.mxu1 %v3149_v50 }
 0x135   : > { %2973 = vmatmul.mubr.msk.f32.gmra.mrb[22].mxu1 %vm575_vm1, %v542_v46  ;;  %v354_v46 = vld [vmem:[%s3538_s10 + $0x38] sm:$0xff]  ;;  %3151 = vmatprep.subr.bf16.mxu0 %v3347_v4 }
 0x136   : > { %760 = vmatprep.mubr.f32.mxu1 %v3346_v56  ;;  %2985 = vmatmul.mubr.msk.f32.gmra.mrb[30].mxu0 %vm5459_vm0, %v354_v46  ;;  %v528_v46 = vadd.f32 %v3083_v38, %v3550_v9 }
 0x137   : > { %2432 = vmatprep.mubr.f32.mxu0 %v3346_v56  ;;  %3189 = vmatprep.subr.bf16.mxu1 %v3347_v4 }
 0x138   : > { %3153 = vmatpush1.bf16.msra.mxu0 %v3152_v57  ;;  %3205 = vmatpush1.bf16.msra.mxu1 %v3152_v57  ;;  %v2537_v57 = vld [vmem:[%s5453_s6 + $0xc0] sm:$0xff] }
 0x139   : > { %2974 = vmatmul.mubr.msk.f32.gmra.mrb[24].mxu1 %vm575_vm1, %v543_v58  ;;  %v2525_v58 = vld [vmem:[%s5453_s6 + $0x60] sm:$0xff]  ;;  %3154 = vmatprep.subr.bf16.mxu0 %v3347_v4 }
 0x13a   : > { %766 = vmatprep.mubr.f32.mxu1 %v3346_v56  ;;  %2986 = vmatmul.mubr.msk.f32.gmra.mrb[32].mxu0 %vm5459_vm0, %v355_v53 }
 0x13b   : > { %2438 = vmatprep.mubr.f32.mxu0 %v3346_v56  ;;  %3190 = vmatprep.subr.bf16.mxu1 %v3347_v4 }
 0x13d   : > { %2975 = vmatmul.mubr.msk.f32.gmra.mrb[26].mxu1 %vm575_vm1, %v544_v61 }
 0x13e   : > { %772 = vmatprep.mubr.f32.mxu1 %v3346_v56 }
 0x1dc   : > { %v690_v63 = vpop.f32.mrb[0].mxu1 }
 0x1dd   : > { %v3617_v2 = vadd.f32 %v690_v63, %v3604_v60  ;;  %v692_v3 = vpop.f32.mrb[1].mxu1  ;;  %v3155_v63 = vpack.c.bf16 %v2526_v59, %v2525_v58  ;;  %v2538_v58 = vld [vmem:[%s5453_s6 + $0xc8] sm:$0xff] }
 0x1de   : > { %v3634_v12 = vadd.f32 %v692_v3, %v3622_v6  ;;  %v356_v3 = vld [vmem:[%s3538_s10 + $0x48] sm:$0xff] }
 0x1df   : > { %v1137_v7 = vsel %vm5461_vm2, %v3617_v2, -inf  ;;  %v789_v8 = vsel %vm5459_vm0, %v3617_v2, -inf  ;;  %v1398_v13 = vsel %vm5464_vm3, %v3617_v2, -inf  ;;  %v876_v14 = vsel %vm5463_vm4, %v3617_v2, -inf  ;;  %2987 = vmatmul.mubr.msk.f32.gmra.mrb[34].mxu0 %vm5459_vm0, %v356_v3  ;;  %3206 = vmatpush1.bf16.msra.mxu1 %v3155_v63 }
 0x1e0   : > { %v696_v10 = vpop.f32.mrb[2].mxu1  ;;  %1138 = vmax.xlane.f32.xlu1 %v1137_v7  ;;  %790 = vmax.xlane.f32.xlu0 %v789_v8  ;;  %v1484_v17 = vsel %vm5459_vm0, %v3634_v12, -inf  ;;  %v963_v18 = vsel %vm5462_vm5, %v3617_v2, -inf  ;;  %v1570_v21 = vsel %vm5463_vm4, %v3634_v12, -inf  ;;  %v1050_v22 = vsel %vm5456_vm6, %v3617_v2, -inf }
 0x1e1   : > { %v3629_v11 = vpop.f32.mrb[3].mxu1  ;;  %v1742_v27 = vsel %vm5456_vm6, %v3634_v12, -inf  ;;  %v1224_v28 = vsel %vm5460_vm7, %v3617_v2, -inf  ;;  %v1828_v34 = vsel %vm5461_vm2, %v3634_v12, -inf  ;;  %v1311_v35 = vsel %vm5457_vm8, %v3617_v2, -inf  ;;  %3156 = vmatpush1.bf16.msra.mxu0 %v3155_v63  ;;  %2444 = vmatprep.mubr.f32.mxu0 %v3346_v56 }
 0x1e2   : > { %v3694_v40 = vadd.f32 %v696_v10, %v3604_v60  ;;  %v2000_v41 = vsel %vm5457_vm8, %v3634_v12, -inf  ;;  %v1656_v42 = vsel %vm5462_vm5, %v3634_v12, -inf  ;;  %v1914_v48 = vsel %vm5460_vm7, %v3634_v12, -inf  ;;  %v2529_v10 = vld [vmem:[%s5453_s6 + $0x80] sm:$0xff]  ;;  %3157 = vmatprep.subr.bf16.mxu0 %v3347_v4  ;;  %3191 = vmatprep.subr.bf16.mxu1 %v3347_v4 }
 0x1e3   : > { %v2086_v55 = vsel %vm5464_vm3, %v3634_v12, -inf  ;;  %v3158_v8 = vpack.c.bf16 %v2528_v1, %v2527_v0  ;;  %v3173_v0 = vpack.c.bf16 %v2538_v58, %v2537_v57  ;;  %v2540_v1 = vld [vmem:[%s5453_s6 + $0xd8] sm:$0xff] }
 0x1e4   : > { %1399 = vmax.xlane.f32.xlu1 %v1398_v13  ;;  %877 = vmax.xlane.f32.xlu0 %v876_v14  ;;  %v3640_v15 = vpop.f32.mrb[4].mxu1  ;;  %v879_v47 = vsel %vm5463_vm4, %v3694_v40, -inf  ;;  %v966_v54 = vsel %vm5462_vm5, %v3694_v40, -inf  ;;  %v1053_v61 = vsel %vm5456_vm6, %v3694_v40, -inf  ;;  %v792_v62 = vsel %vm5459_vm0, %v3694_v40, -inf  ;;  %v2530_v13 = vld [vmem:[%s5453_s6 + $0x88] sm:$0xff] }
 0x1e5   : > { %v3642_v16 = vpop.f32.mrb[5].mxu1  ;;  %v1227_v5 = vsel %vm5460_vm7, %v3694_v40, -inf  ;;  %v1140_v7 = vsel %vm5461_vm2, %v3694_v40, -inf  ;;  %v357_v14 = vld [vmem:[%s3538_s10 + $0x50] sm:$0xff]  ;;  %3159 = vmatpush1.bf16.msra.mxu0 %v3158_v8  ;;  %3207 = vmatpush1.bf16.msra.mxu1 %v3158_v8  ;;  %v3844_v59 = vadd.f32 %v3640_v15, %v3604_v60  ;;  %v2541_v8 = vld [vmem:[%s5453_s6 + $0xe0] sm:$0xff] }
 0x1e6   : > { %2988 = vmatmul.mubr.msk.f32.gmra.mrb[36].mxu0 %vm5459_vm0, %v357_v14  ;;  %3160 = vmatprep.subr.bf16.mxu0 %v3347_v4  ;;  %v2539_v15 = vld [vmem:[%s5453_s6 + $0xd0] sm:$0xff] }
 0x1e7   : > { %2450 = vmatprep.mubr.f32.mxu0 %v3346_v56  ;;  %3192 = vmatprep.subr.bf16.mxu1 %v3347_v4  ;;  %v795_v3 = vsel %vm5459_vm0, %v3844_v59, -inf  ;;  %v1230_v14 = vsel %vm5460_vm7, %v3844_v59, -inf }
 0x1e8   : > { %1485 = vmax.xlane.f32.xlu1 %v1484_v17  ;;  %964 = vmax.xlane.f32.xlu0 %v963_v18  ;;  %v3648_v19 = vpop.f32.mrb[6].mxu1  ;;  %v3771_v17 = vadd.f32 %v3629_v11, %v3622_v6  ;;  %v1401_v18 = vsel %vm5464_vm3, %v3694_v40, -inf  ;;  %v2532_v11 = vld [vmem:[%s5453_s6 + $0x98] sm:$0xff] }
 0x1e9   : > { %v3650_v20 = vpop.f32.mrb[7].mxu1  ;;  %v3164_v30 = vpack.c.bf16 %v2532_v11, %v2531_v26  ;;  %v3893_v26 = vadd.f32 %v3642_v16, %v3622_v6  ;;  %v1404_v11 = vsel %vm5464_vm3, %v3844_v59, -inf  ;;  %v1143_v16 = vsel %vm5461_vm2, %v3844_v59, -inf }
 0x1ea   : > { %2989 = vmatmul.mubr.msk.f32.gmra.mrb[38].mxu0 %vm5459_vm0, %v358_v25  ;;  %v1659_v36 = vsel %vm5462_vm5, %v3771_v17, -inf  ;;  %v1831_v51 = vsel %vm5461_vm2, %v3771_v17, -inf  ;;  %v1917_v52 = vsel %vm5460_vm7, %v3771_v17, -inf  ;;  %v2089_v63 = vsel %vm5464_vm3, %v3771_v17, -inf  ;;  %v2544_v25 = vld [vmem:[%s5453_s6 + $0xf8] sm:$0xff] }
 0x1eb   : > { %2456 = vmatprep.mubr.f32.mxu0 %v3346_v56  ;;  %v1748_v33 = vsel %vm5456_vm6, %v3893_v26, -inf  ;;  %v2006_v38 = vsel %vm5457_vm8, %v3893_v26, -inf }
 0x1ec   : > { %1571 = vmax.xlane.f32.xlu1 %v1570_v21  ;;  %1051 = vmax.xlane.f32.xlu0 %v1050_v22  ;;  %v3656_v23 = vpop.f32.mrb[8].mxu1  ;;  %v1314_v21 = vsel %vm5457_vm8, %v3694_v40, -inf  ;;  %v3161_v22 = vpack.c.bf16 %v2530_v13, %v2529_v10  ;;  %v2542_v10 = vld [vmem:[%s5453_s6 + $0xe8] sm:$0xff] }
 0x1ed   : > { %v3658_v24 = vpop.f32.mrb[9].mxu1 }
 0x1ee   : > { %3162 = vmatpush1.bf16.msra.mxu0 %v3161_v22  ;;  %3208 = vmatpush1.bf16.msra.mxu1 %v3161_v22  ;;  %v2543_v22 = vld [vmem:[%s5453_s6 + $0xf0] sm:$0xff] }
 0x1ef   : > { %3163 = vmatprep.subr.bf16.mxu0 %v3347_v4  ;;  %3193 = vmatprep.subr.bf16.mxu1 %v3347_v4 }
 0x1f0   : > { %1743 = vmax.xlane.f32.xlu1 %v1742_v27  ;;  %1225 = vmax.xlane.f32.xlu0 %v1224_v28  ;;  %v3670_v29 = vpop.f32.mrb[10].mxu1  ;;  %v1573_v27 = vsel %vm5463_vm4, %v3771_v17, -inf  ;;  %v1487_v28 = vsel %vm5459_vm0, %v3771_v17, -inf }
 0x1f1   : > { %v3678_v32 = vpop.f32.mrb[11].mxu1 }
 0x1f2   : > { %3165 = vmatpush1.bf16.msra.mxu0 %v3164_v30  ;;  %3209 = vmatpush1.bf16.msra.mxu1 %v3164_v30  ;;  %v1576_v30 = vsel %vm5463_vm4, %v3893_v26, -inf }
 0x1f3   : > { %3166 = vmatprep.subr.bf16.mxu0 %v3347_v4  ;;  %3194 = vmatprep.subr.bf16.mxu1 %v3347_v4 }
 0x1f4   : > { %1829 = vmax.xlane.f32.xlu1 %v1828_v34  ;;  %1312 = vmax.xlane.f32.xlu0 %v1311_v35  ;;  %v359_v34 = vld [vmem:[%s3538_s10 + $0x60] sm:$0xff]  ;;  %v1745_v35 = vsel %vm5456_vm6, %v3771_v17, -inf }
 0x1f5   : > { %2990 = vmatmul.mubr.msk.f32.gmra.mrb[40].mxu0 %vm5459_vm0, %v359_v34  ;;  %v1317_v34 = vsel %vm5457_vm8, %v3844_v59, -inf }
 0x1f6   : > { %2462 = vmatprep.mubr.f32.mxu0 %v3346_v56  ;;  %3168 = vmatpush1.bf16.msra.mxu0 %v3167_v37 }
 0x1f7   : > { %3169 = vmatprep.subr.bf16.mxu0 %v3347_v4  ;;  %3210 = vmatpush1.bf16.msra.mxu1 %v3167_v37  ;;  %v3919_v37 = vadd.f32 %v3648_v19, %v3604_v60 }
 0x1f8   : > { %2001 = vmax.xlane.f32.xlu1 %v2000_v41  ;;  %1657 = vmax.xlane.f32.xlu0 %v1656_v42  ;;  %v3809_v41 = vpop.f32.mrb[12].mxu1  ;;  %v2535_v42 = vld [vmem:[%s5453_s6 + $0xb0] sm:$0xff] }
 0x1f9   : > { %v3817_v45 = vpop.f32.mrb[13].mxu1  ;;  %2991 = vmatmul.mubr.msk.f32.gmra.mrb[42].mxu0 %vm5459_vm0, %v360_v39  ;;  %v3170_v53 = vpack.c.bf16 %v2536_v43, %v2535_v42  ;;  %3195 = vmatprep.subr.bf16.mxu1 %v3347_v4  ;;  %v798_v42 = vsel %vm5459_vm0, %v3919_v37, -inf  ;;  %v1920_v43 = vsel %vm5460_vm7, %v3893_v26, -inf  ;;  %v885_v19 = vsel %vm5463_vm4, %v3919_v37, -inf }
 0x1fa   : > { %v3825_v50 = vpop.f32.mrb[14].mxu1  ;;  %2468 = vmatprep.mubr.f32.mxu0 %v3346_v56 }
 0x1fb   : > { %3171 = vmatpush1.bf16.msra.mxu0 %v3170_v53  ;;  %3211 = vmatpush1.bf16.msra.mxu1 %v3170_v53  ;;  %v1320_v53 = vsel %vm5457_vm8, %v3919_v37, -inf }
 0x1fc   : > { %880 = vmax.xlane.f32.xlu1 %v879_v47  ;;  %1915 = vmax.xlane.f32.xlu0 %v1914_v48  ;;  %v523_v47 = vadd.f32 %v3550_v9, %v522_v44  ;;  %v3822_v48 = vpop.f32.mrb[16].mxu0  ;;  %v3833_v9 = vpop.f32.mrb[15].mxu1  ;;  %v2092_v44 = vsel %vm5464_vm3, %v3893_v26, -inf }
 0x1fd   : > { %3172 = vmatprep.subr.bf16.mxu0 %v3347_v4  ;;  %v3876_v13 = vpop.f32.mrb[17].mxu0  ;;  %3196 = vmatprep.subr.bf16.mxu1 %v3347_v4 }
 0x1fe   : > { %v3906_v31 = vpop.f32.mrb[18].mxu0 }
 0x1ff   : > { %3174 = vmatpush1.bf16.msra.mxu0 %v3173_v0  ;;  %3212 = vmatpush1.bf16.msra.mxu1 %v3173_v0  ;;  %v3925_v39 = vpop.f32.mrb[19].mxu0 }
 0x200   : > { %967 = vmax.xlane.f32.xlu1 %v966_v54  ;;  %2087 = vmax.xlane.f32.xlu0 %v2086_v55  ;;  %v545_v54 = vmax.f32 %v523_v47, 0.0  ;;  %v361_v55 = vld [vmem:[%s3538_s10 + $0x70] sm:$0xff]  ;;  %v1146_v47 = vsel %vm5461_vm2, %v3919_v37, -inf  ;;  %v3955_v58 = vpop.f32.mrb[20].mxu0 }
 0x201   : > { %2992 = vmatmul.mubr.msk.f32.gmra.mrb[44].mxu0 %vm5459_vm0, %v361_v55  ;;  %3175 = vmatprep.subr.bf16.mxu0 %v3347_v4 }
 0x202   : > { %2976 = vmatmul.mubr.msk.f32.gmra.mrb[28].mxu1 %vm575_vm1, %v545_v54  ;;  %2474 = vmatprep.mubr.f32.mxu0 %v3346_v56  ;;  %v1233_v54 = vsel %vm5460_vm7, %v3919_v37, -inf }
 0x203   : > { %778 = vmatprep.mubr.f32.mxu1 %v3346_v56  ;;  %v3176_v56 = vpack.c.bf16 %v2540_v1, %v2539_v15  ;;  %3197 = vmatprep.subr.bf16.mxu1 %v3347_v4  ;;  %v3967_v15 = vadd.f32 %v3656_v23, %v3604_v60  ;;  %v3981_v23 = vpop.f32.mrb[21].mxu0 }
 0x204   : > { %1054 = vmax.xlane.f32.xlu1 %v1053_v61  ;;  %793 = vmax.xlane.f32.xlu0 %v792_v62  ;;  %v546_v61 = vmax.f32 %v528_v46, 0.0  ;;  %v2003_v62 = vsel %vm5457_vm8, %v3771_v17, -inf  ;;  %v972_v46 = vsel %vm5462_vm5, %v3919_v37, -inf }
 0x205   : > { %3177 = vmatpush1.bf16.msra.mxu0 %v3176_v56  ;;  %3213 = vmatpush1.bf16.msra.mxu1 %v3176_v56  ;;  %v801_v56 = vsel %vm5459_vm0, %v3967_v15, -inf }
 0x206   : > { %2977 = vmatmul.mubr.msk.f32.gmra.mrb[30].mxu1 %vm575_vm1, %v546_v61  ;;  %3178 = vmatprep.subr.bf16.mxu0 %v3347_v4 }
 0x207   : > { %3198 = vmatprep.subr.bf16.mxu1 %v3347_v4 }
 0x208   : > { %1228 = vmax.xlane.f32.xlu1 %v1227_v5  ;;  %1141 = vmax.xlane.f32.xlu0 %v1140_v7  ;;  %v882_v5 = vsel %vm5463_vm4, %v3844_v59, -inf  ;;  %v362_v7 = vld [vmem:[%s3538_s10 + $0x78] sm:$0xff] }
 0x209   : > { %2993 = vmatmul.mubr.msk.f32.gmra.mrb[46].mxu0 %vm5459_vm0, %v362_v7 }
 0x20c   : > { %1402 = vmax.xlane.f32.xlu1 %v1401_v18  ;;  %1315 = vmax.xlane.f32.xlu0 %v1314_v21  ;;  %v969_v18 = vsel %vm5462_vm5, %v3844_v59, -inf  ;;  %v3179_v21 = vpack.c.bf16 %v2542_v10, %v2541_v8 }
 0x20e   : > { %3180 = vmatpush1.bf16.msra.mxu0 %v3179_v21  ;;  %3214 = vmatpush1.bf16.msra.mxu1 %v3179_v21  ;;  %v975_v21 = vsel %vm5462_vm5, %v3967_v15, -inf }
 0x20f   : > { %3181 = vmatprep.subr.bf16.mxu0 %v3347_v4  ;;  %3199 = vmatprep.subr.bf16.mxu1 %v3347_v4  ;;  %v1662_v4 = vsel %vm5462_vm5, %v3893_v26, -inf }
 0x210   : > { %1574 = vmax.xlane.f32.xlu1 %v1573_v27  ;;  %1488 = vmax.xlane.f32.xlu0 %v1487_v28  ;;  %v1056_v27 = vsel %vm5456_vm6, %v3844_v59, -inf  ;;  %v3182_v28 = vpack.c.bf16 %v2544_v25, %v2543_v22  ;;  %v3993_v22 = vadd.f32 %v3658_v24, %v3622_v6  ;;  %v1410_v25 = vsel %vm5464_vm3, %v3967_v15, -inf }
 0x212   : > { %3183 = vmatpush1.bf16.msra.mxu0 %v3182_v28  ;;  %3215 = vmatpush1.bf16.msra.mxu1 %v3182_v28  ;;  %v1582_v28 = vsel %vm5463_vm4, %v3993_v22, -inf }
 0x214   : > { %1746 = vmax.xlane.f32.xlu1 %v1745_v35  ;;  %1660 = vmax.xlane.f32.xlu0 %v1659_v36  ;;  %v1834_v35 = vsel %vm5461_vm2, %v3893_v26, -inf  ;;  %v1490_v36 = vsel %vm5459_vm0, %v3893_v26, -inf }
 0x218   : > { %1832 = vmax.xlane.f32.xlu1 %v1831_v51  ;;  %1918 = vmax.xlane.f32.xlu0 %v1917_v52  ;;  %v3941_v51 = vadd.f32 %v3650_v20, %v3622_v6  ;;  %v1059_v52 = vsel %vm5456_vm6, %v3919_v37, -inf  ;;  %v1407_v20 = vsel %vm5464_vm3, %v3919_v37, -inf }
 0x21a   : > { %v1493_v55 = vsel %vm5459_vm0, %v3941_v51, -inf  ;;  %v1665_v57 = vsel %vm5462_vm5, %v3941_v51, -inf  ;;  %v1579_v61 = vsel %vm5463_vm4, %v3941_v51, -inf  ;;  %v1837_v8 = vsel %vm5461_vm2, %v3941_v51, -inf }
 0x21b   : > { %v2009_v10 = vsel %vm5457_vm8, %v3941_v51, -inf }
 0x21c   : > { %2004 = vmax.xlane.f32.xlu1 %v2003_v62  ;;  %2090 = vmax.xlane.f32.xlu0 %v2089_v63  ;;  %v1923_v62 = vsel %vm5460_vm7, %v3941_v51, -inf  ;;  %v3961_v63 = vpop.f32.mrb[16].mxu1 }
 0x21d   : > { %v3963_v0 = vpop.f32.mrb[17].mxu1 }
 0x21e   : > { %v3969_v1 = vpop.f32.mrb[18].mxu1 }
 0x21f   : > { %v3975_v7 = vpop.f32.mrb[19].mxu1 }
 0x220   : > { %796 = vmax.xlane.f32.xlu1 %v795_v3  ;;  %883 = vmax.xlane.f32.xlu0 %v882_v5  ;;  %v1751_v3 = vsel %vm5456_vm6, %v3941_v51, -inf  ;;  %v2095_v5 = vsel %vm5464_vm3, %v3941_v51, -inf }
 0x224   : > { %1231 = vmax.xlane.f32.xlu1 %v1230_v14  ;;  %970 = vmax.xlane.f32.xlu0 %v969_v18  ;;  %v888_v14 = vsel %vm5463_vm4, %v3967_v15, -inf  ;;  %v1236_v18 = vsel %vm5460_vm7, %v3967_v15, -inf }
 0x228   : > { %1405 = vmax.xlane.f32.xlu1 %v1404_v11  ;;  %1057 = vmax.xlane.f32.xlu0 %v1056_v27  ;;  %v1062_v11 = vsel %vm5456_vm6, %v3967_v15, -inf  ;;  %v3999_v27 = vpop.f32.mrb[20].mxu1 }
 0x229   : > { %v4005_v24 = vpop.f32.mrb[21].mxu1 }
 0x22c   : > { %1577 = vmax.xlane.f32.xlu1 %v1576_v30  ;;  %1144 = vmax.xlane.f32.xlu0 %v1143_v16  ;;  %v1149_v30 = vsel %vm5461_vm2, %v3967_v15, -inf  ;;  %v4007_v16 = vpop.f32.mrb[22].mxu0 }
 0x230   : > { %1749 = vmax.xlane.f32.xlu1 %v1748_v33  ;;  %1318 = vmax.xlane.f32.xlu0 %v1317_v34 }
 0x234   : > { %1835 = vmax.xlane.f32.xlu1 %v1834_v35  ;;  %1491 = vmax.xlane.f32.xlu0 %v1490_v36  ;;  %v1754_v35 = vsel %vm5456_vm6, %v3993_v22, -inf  ;;  %v1323_v36 = vsel %vm5457_vm8, %v3967_v15, -inf }
 0x238   : > { %2007 = vmax.xlane.f32.xlu1 %v2006_v38  ;;  %1663 = vmax.xlane.f32.xlu0 %v1662_v4 }
 0x23c   : > { %799 = vmax.xlane.f32.xlu1 %v798_v42  ;;  %1921 = vmax.xlane.f32.xlu0 %v1920_v43  ;;  %v4016_v42 = vand.u32 127, %v565_v49  ;;  %v4018_v43 = vpop.f32.mrb[22].mxu1  ;;  %v4030_v49 = vadd.f32 %v3670_v29, %v3604_v60 }
 0x23e   : > { %vm924_vm9 = vcmp.ge.s32.totalorder %v4016_v42, 16  ;;  %vm926_vm10 = vcmp.lt.s32.totalorder %v4016_v42, 32  ;;  %vm5458_vm11 = vcmp.lt.s32.totalorder %v4016_v42, 16  ;;  %vm1011_vm12 = vcmp.ge.s32.totalorder %v4016_v42, 32 }
 0x23f   : > { %vm1013_vm13 = vcmp.lt.s32.totalorder %v4016_v42, 48  ;;  %vm1098_vm14 = vcmp.ge.s32.totalorder %v4016_v42, 48  ;;  %vm1100_vm15 = vcmp.lt.s32.totalorder %v4016_v42, 64  ;;  %vm4041_vm1 = vmand %vm924_vm9, %vm926_vm10  ;;  %vm1185_vm9 = vcmp.ge.s32.totalorder %v4016_v42, 64 }
 0x240   : > { %886 = vmax.xlane.f32.xlu1 %v885_v19  ;;  %2093 = vmax.xlane.f32.xlu0 %v2092_v44  ;;  %v1840_v19 = vsel %vm5461_vm2, %v3993_v22, -inf  ;;  %v1496_v44 = vsel %vm5459_vm0, %v3993_v22, -inf  ;;  %vm4045_vm6 = vmand %vm1011_vm12, %vm1013_vm13  ;;  %vm1187_vm10 = vcmp.lt.s32.totalorder %v4016_v42, 80  ;;  %vm1272_vm12 = vcmp.ge.s32.totalorder %v4016_v42, 80 }
 0x241   : > { %vm1274_vm13 = vcmp.lt.s32.totalorder %v4016_v42, 96 }
 0x244   : > { %973 = vmax.xlane.f32.xlu1 %v972_v46  ;;  %1147 = vmax.xlane.f32.xlu0 %v1146_v47  ;;  %v4024_v46 = vpop.f32.mrb[23].mxu1 }
 0x248   : > { %1060 = vmax.xlane.f32.xlu1 %v1059_v52  ;;  %1321 = vmax.xlane.f32.xlu0 %v1320_v53  ;;  %v2012_v53 = vsel %vm5457_vm8, %v3993_v22, -inf  ;;  %vm4053_vm8 = vmand %vm1098_vm14, %vm1100_vm15  ;;  %vm1359_vm14 = vcmp.ge.s32.totalorder %v4016_v42, 96  ;;  %vm1361_vm15 = vcmp.lt.s32.totalorder %v4016_v42, 112 }
 0x24c   : > { %1234 = vmax.xlane.f32.xlu1 %v1233_v54  ;;  %1494 = vmax.xlane.f32.xlu0 %v1493_v55  ;;  %v1668_v54 = vsel %vm5462_vm5, %v3993_v22, -inf  ;;  %vm4090_vm5 = vmand %vm1359_vm14, %vm1361_vm15  ;;  %vm5500_vm14 = vcmask 392448  }
 0x250   : > { %1408 = vmax.xlane.f32.xlu1 %v1407_v20  ;;  %1666 = vmax.xlane.f32.xlu0 %v1665_v57 }
 0x254   : > { %1580 = vmax.xlane.f32.xlu1 %v1579_v61  ;;  %1924 = vmax.xlane.f32.xlu0 %v1923_v62 }
 0x258   : > { %1752 = vmax.xlane.f32.xlu1 %v1751_v3  ;;  %2096 = vmax.xlane.f32.xlu0 %v2095_v5  ;;  %v804_v3 = vsel %vm5459_vm0, %v4030_v49, -inf  ;;  %vm4080_vm0 = vmand %vm1272_vm12, %vm1274_vm13 }
 0x25c   : > { %1838 = vmax.xlane.f32.xlu1 %v1837_v8  ;;  %802 = vmax.xlane.f32.xlu0 %v801_v56  ;;  %v1926_v56 = vsel %vm5460_vm7, %v3993_v22, -inf }
 0x260   : > { %2010 = vmax.xlane.f32.xlu1 %v2009_v10  ;;  %889 = vmax.xlane.f32.xlu0 %v888_v14  ;;  %v4072_v10 = vadd.s32 128, %v4016_v42 }
 0x262   : > { %vm1619_vm7 = vcmp.ge.s32.totalorder %v4072_v10, 144  ;;  %vm1621_vm2 = vcmp.lt.s32.totalorder %v4072_v10, 160  ;;  %vm1707_vm12 = vcmp.lt.s32.totalorder %v4072_v10, 176  ;;  %vm1793_vm15 = vcmp.lt.s32.totalorder %v4072_v10, 192 }
 0x263   : > { %vm1879_vm13 = vcmp.lt.s32.totalorder %v4072_v10, 208 }
 0x264   : > { %1237 = vmax.xlane.f32.xlu1 %v1236_v18  ;;  %976 = vmax.xlane.f32.xlu0 %v975_v21 }
 0x268   : > { %1411 = vmax.xlane.f32.xlu1 %v1410_v25  ;;  %1063 = vmax.xlane.f32.xlu0 %v1062_v11 }
 0x26c   : > { %1583 = vmax.xlane.f32.xlu1 %v1582_v28  ;;  %1150 = vmax.xlane.f32.xlu0 %v1149_v30  ;;  %v891_v28 = vsel %vm5463_vm4, %v4030_v49, -inf  ;;  %v2098_v30 = vsel %vm5464_vm3, %v3993_v22, -inf  ;;  %vm4108_vm4 = vmand %vm1619_vm7, %vm1621_vm2  ;;  %vm5501_vm2 = vcmask 654848   ;;  %vm5504_vm3 = vcmp.lt.s32.totalorder %v4072_v10, 144 }
 0x26d   : > { %v1139_v33 = vpop.xlane.xlu1 %1138  ;;  %v791_v34 = vpop.xlane.xlu0 %790 }
 0x26e   : > { %v843_v61 = vsel %vm5458_vm11, %v791_v34, 0.0  ;;  %vm4076_vm11 = vmand %vm1185_vm9, %vm1187_vm10  ;;  %v5496_v34 = vmov 0  ;;  %vm5465_vm9 = vcmp.ge.s32.totalorder %v4016_v42, 112  ;;  %vm1705_vm10 = vcmp.ge.s32.totalorder %v4072_v10, 160 }
 0x26f   : > { %v5497_v34 = vsel %vm4090_vm5, 4294967295, %v5496_v34  ;;  %vm4129_vm7 = vmand %vm1705_vm10, %vm1707_vm12  ;;  %vm1965_vm10 = vcmp.lt.s32.totalorder %v4072_v10, 224 }
 0x270   : > { %1755 = vmax.xlane.f32.xlu1 %v1754_v35  ;;  %1324 = vmax.xlane.f32.xlu0 %v1323_v36 }
 0x271   : > { %v4013_v38 = vpop.xlane.xlu1 %1399  ;;  %v878_v4 = vpop.xlane.xlu0 %877 }
 0x272   : > { %v930_v5 = vsel %vm4041_vm1, %v878_v4, %v843_v61 }
 0x274   : > { %1841 = vmax.xlane.f32.xlu1 %v1840_v19  ;;  %1497 = vmax.xlane.f32.xlu0 %v1496_v44 }
 0x275   : > { %v1486_v47 = vpop.xlane.xlu1 %1485  ;;  %v965_v52 = vpop.xlane.xlu0 %964 }
 0x276   : > { %v1017_v8 = vsel %vm4045_vm6, %v965_v52, %v930_v5  ;;  %v4116_v52 = vpop.f32.mrb[23].mxu0 }
 0x278   : > { %2013 = vmax.xlane.f32.xlu1 %v2012_v53  ;;  %1669 = vmax.xlane.f32.xlu0 %v1668_v54  ;;  %v978_v54 = vsel %vm5500_vm14, %v4030_v49, -inf  ;;  %vm5505_vm14 = vcmp.ge.s32.totalorder %v4072_v10, 176 }
 0x279   : > { %v4049_v20 = vpop.xlane.xlu1 %1571  ;;  %v1052_v57 = vpop.xlane.xlu0 %1051 }
 0x27a   : > { %v1104_v14 = vsel %vm4053_vm8, %v1052_v57, %v1017_v8  ;;  %v1152_v57 = vsel %vm5501_vm2, %v4030_v49, -inf  ;;  %vm1963_vm2 = vcmp.ge.s32.totalorder %v4072_v10, 208 }
 0x27b   : > { %v1191_v35 = vsel %vm4076_vm11, %v1139_v33, %v1104_v14  ;;  %v5498_v33 = vmov 0  ;;  %v4157_v14 = vadd.f32 %v3678_v32, %v3622_v6 }
 0x27c   : > { %805 = vmax.xlane.f32.xlu1 %v804_v3  ;;  %1927 = vmax.xlane.f32.xlu0 %v1926_v56  ;;  %v5499_v33 = vsel %vm4108_vm4, 4294967295, %v5498_v33  ;;  %v1539_v3 = vsel %vm5504_vm3, %v1486_v47, 0.0  ;;  %vm5508_vm3 = vcmp.ge.s32.totalorder %v4072_v10, 192 }
 0x27d   : > { %v1744_v18 = vpop.xlane.xlu1 %1743  ;;  %v1226_v25 = vpop.xlane.xlu0 %1225  ;;  %v1625_v56 = vsel %vm4108_vm4, %v4049_v20, %v1539_v3  ;;  %vm4151_vm12 = vmand %vm5508_vm3, %vm1879_vm13  ;;  %vm2049_vm3 = vcmp.ge.s32.totalorder %v4072_v10, 224  ;;  %vm2051_vm4 = vcmp.lt.s32.totalorder %v4072_v10, 240 }
 0x27e   : > { %v1278_v36 = vsel %vm4080_vm0, %v1226_v25, %v1191_v35  ;;  %vm4167_vm13 = vmand %vm1963_vm2, %vm1965_vm10  ;;  %vm5517_vm2 = vcmask 786048   ;;  %vm5518_vm10 = vcmask 130048  }
 0x280   : > { %892 = vmax.xlane.f32.xlu1 %v891_v28  ;;  %2099 = vmax.xlane.f32.xlu0 %v2098_v30 }
 0x281   : > { %v1830_v4 = vpop.xlane.xlu1 %1829  ;;  %v1313_v19 = vpop.xlane.xlu0 %1312 }
 0x282   : > { %v1365_v44 = vsel %vm4090_vm5, %v1313_v19, %v1278_v36 }
 0x283   : > { %v1452_v53 = vsel %vm5465_vm9, %v4013_v38, %v1365_v44  ;;  %vm4138_vm9 = vmand %vm5505_vm14, %vm1793_vm15  ;;  %vm5511_vm15 = vcmask 523648   ;;  %vm5512_vm14 = vcmask 917248  }
 0x284   : > { %v2172_v5 = vsub.f32 %v3617_v2, %v1452_v53  ;;  %979 = vmax.xlane.f32.xlu1 %v978_v54  ;;  %1153 = vmax.xlane.f32.xlu0 %v1152_v57  ;;  %v1065_v20 = vsel %vm5511_vm15, %v4030_v49, -inf  ;;  %v1326_v35 = vsel %vm5512_vm14, %v4030_v49, -inf  ;;  %vm4177_vm15 = vmand %vm2049_vm3, %vm2051_vm4  ;;  %v5515_v53 = vmov 0 }
 0x285   : > { %v2002_v8 = vpop.xlane.xlu1 %2001  ;;  %v1658_v47 = vpop.xlane.xlu0 %1657  ;;  %v5516_v53 = vsel %vm4177_vm15, 4294967295, %v5515_v53  ;;  %v1239_v54 = vsel %vm5517_vm2, %v4030_v49, -inf  ;;  %v1499_v57 = vsel %vm5518_vm10, %v4157_v14, -inf  ;;  %vm5468_vm14 = vcmp.ge.s32.totalorder %v4072_v10, 240 }
 0x286   : > { %v2204_v25 = vmul.f32 1.442695, %v2172_v5  ;;  %v1711_v28 = vsel %vm4129_vm7, %v1658_v47, %v1625_v56  ;;  %vm5519_vm4 = vcmask 1048448   ;;  %vm5520_vm3 = vcmask 392448  }
 0x287   : > { %v1797_v30 = vsel %vm4138_vm9, %v1744_v18, %v1711_v28  ;;  %v1671_v28 = vsel %vm5520_vm3, %v4157_v14, -inf  ;;  %vm5521_vm2 = vcmp.lt.s32.totalorder %v4016_v42, 16  ;;  %vm5522_vm10 = vcmask 261248  }
 0x288   : > { %3226 = vpow2.f32 %v2204_v25  ;;  %1066 = vmax.xlane.f32.xlu1 %v1065_v20  ;;  %1327 = vmax.xlane.f32.xlu0 %v1326_v35  ;;  %v1883_v32 = vsel %vm4151_vm12, %v1830_v4, %v1797_v30  ;;  %v1413_v25 = vsel %vm5519_vm4, %v4030_v49, -inf  ;;  %vm5524_vm4 = vcmask 786048  }
 0x289   : > { %v881_v19 = vpop.xlane.xlu1 %880  ;;  %v1916_v44 = vpop.xlane.xlu0 %1915  ;;  %vm5525_vm3 = vcmask 523648  }
 0x28a   : > { %v1969_v18 = vsel %vm4167_vm13, %v1916_v44, %v1883_v32  ;;  %v1585_v44 = vsel %vm5522_vm10, %v4157_v14, -inf  ;;  %vm5527_vm10 = vcmask 130048  }
 0x28b   : > { %v2055_v3 = vsel %vm4177_vm15, %v2002_v8, %v1969_v18  ;;  %v4199_v18 = vpop.f32.mrb[24].mxu0 }
 0x28c   : > { %1240 = vmax.xlane.f32.xlu1 %v1239_v54  ;;  %1500 = vmax.xlane.f32.xlu0 %v1499_v57  ;;  %v1929_v57 = vsel %vm5524_vm4, %v4157_v14, -inf  ;;  %vm5528_vm4 = vcmp.ge.s32.totalorder %v4016_v42, 112 }
 0x28d   : > { %v968_v4 = vpop.xlane.xlu1 %967  ;;  %v2088_v5 = vpop.xlane.xlu0 %2087 }
 0x28e   : > { %v2141_v56 = vsel %vm5468_vm14, %v2088_v5, %v2055_v3  ;;  %v4212_v5 = vadd.f32 %v3809_v41, %v3604_v60  ;;  %vm5536_vm14 = vcmask 392448  }
 0x28f   : > { %v2173_v47 = vsub.f32 %v3634_v12, %v2141_v56 }
 0x290   : > { %1414 = vmax.xlane.f32.xlu1 %v1413_v25  ;;  %1672 = vmax.xlane.f32.xlu0 %v1671_v28  ;;  %v1757_v25 = vsel %vm5525_vm3, %v4157_v14, -inf  ;;  %vm5529_vm3 = vcmask 654848  }
 0x291   : > { %v2206_v20 = vmul.f32 1.442695, %v2173_v47  ;;  %v1055_v30 = vpop.xlane.xlu1 %1054  ;;  %v794_v35 = vpop.xlane.xlu0 %793 }
 0x292   : > { %v3227_v32 = vpop.eup %3226  ;;  %v845_v8 = vsel %vm5521_vm2, %v794_v35, 0.0  ;;  %vm5526_vm2 = vcmask 1048448  }
 0x293   : > { %3228 = vpow2.f32 %v2206_v20  ;;  %v932_v12 = vsel %vm4041_vm1, %v881_v19, %v845_v8  ;;  %v4204_v54 = vmul.f32 %v3227_v32, %v3822_v48  ;;  %v2101_v28 = vsel %vm5526_vm2, %v4157_v14, -inf }
 0x294   : > { %1586 = vmax.xlane.f32.xlu1 %v1585_v44  ;;  %1930 = vmax.xlane.f32.xlu0 %v1929_v57  ;;  %v1019_v3 = vsel %vm4045_vm6, %v968_v4, %v932_v12  ;;  %v1843_v44 = vsel %vm5529_vm3, %v4157_v14, -inf  ;;  %v4233_v57 = vpop.f32.mrb[25].mxu0  ;;  %vm5531_vm2 = vcmp.lt.s32.totalorder %v4072_v10, 144  ;;  %vm5534_vm3 = vnez %v5499_v33 }
 0x295   : > { %5523 = vst [vmem:[#allocation2_spill] sm:$0xff] %v4204_v54  ;;  %v1229_v56 = vpop.xlane.xlu1 %1228  ;;  %v1106_v47 = vsel %vm4053_vm8, %v1055_v30, %v1019_v3  ;;  %v1142_v19 = vpop.xlane.xlu0 %1141  ;;  %v807_v30 = vsel %vm5527_vm10, %v4212_v5, -inf  ;;  %vm5532_vm10 = vcmask 917248  }
 0x296   : > { %v1193_v48 = vsel %vm4076_vm11, %v1142_v19, %v1106_v47 }
 0x297   : > { %v1280_v41 = vsel %vm4080_vm0, %v1229_v56, %v1193_v48 }
 0x298   : > { %1758 = vmax.xlane.f32.xlu1 %v1757_v25  ;;  %2102 = vmax.xlane.f32.xlu0 %v2101_v28  ;;  %v2015_v28 = vsel %vm5532_vm10, %v4157_v14, -inf  ;;  %vm5537_vm10 = vcmask 1048448  }
 0x299   : > { %v1403_v4 = vpop.xlane.xlu1 %1402  ;;  %v1316_v20 = vpop.xlane.xlu0 %1315 }
 0x29a   : > { %v1367_v35 = vsel %vm4090_vm5, %v1316_v20, %v1280_v41 }
 0x29b   : > { %v1454_v8 = vsel %vm5528_vm4, %v1403_v4, %v1367_v35  ;;  %vm5533_vm4 = vcmask 261248  }
 0x29c   : > { %v2174_v12 = vsub.f32 %v3694_v40, %v1454_v8  ;;  %1844 = vmax.xlane.f32.xlu1 %v1843_v44  ;;  %808 = vmax.xlane.f32.xlu0 %v807_v30  ;;  %v894_v40 = vsel %vm5533_vm4, %v4212_v5, -inf  ;;  %v981_v30 = vsel %vm5536_vm14, %v4212_v5, -inf  ;;  %vm5538_vm4 = vcmask 523648  }
 0x29d   : > { %v3229_v3 = vpop.eup %3228  ;;  %v1575_v56 = vpop.xlane.xlu1 %1574  ;;  %vm5539_vm14 = vcmp.ge.s32.totalorder %v4072_v10, 240 }
 0x29e   : > { %v1489_v47 = vpop.xlane.xlu0 %1488  ;;  %v2208_v19 = vmul.f32 1.442695, %v2174_v12  ;;  %v4236_v48 = vmul.f32 %v3229_v3, %v3876_v13  ;;  %2609 = vmatprep.mubr.f32.mxu0 %v3229_v3  ;;  %v4258_v3 = vadd.f32 %v3817_v45, %v3622_v6 }
 0x29f   : > { %v1541_v25 = vsel %vm5531_vm2, %v1489_v47, 0.0  ;;  %2610 = vmatmul.mubr.f32.vlgmr.msra.gmra.mrb[48].mxu0 %v3227_v32  ;;  %vm5535_vm2 = vcmask 786048   ;;  %v1068_v47 = vsel %vm5538_vm4, %v4212_v5, -inf }
 0x2a0   : > { %5530 = vst [vmem:[#allocation3_spill] sm:$0xff] %v4236_v48  ;;  %3230 = vpow2.f32 %v2208_v19  ;;  %2016 = vmax.xlane.f32.xlu1 %v2015_v28  ;;  %895 = vmax.xlane.f32.xlu0 %v894_v40  ;;  %v1627_v41 = vsel %vm5534_vm3, %v1575_v56, %v1541_v25  ;;  %v1242_v32 = vsel %vm5535_vm2, %v4212_v5, -inf  ;;  %v1416_v56 = vsel %vm5537_vm10, %v4212_v5, -inf }
 0x2a1   : > { %v1747_v4 = vpop.xlane.xlu1 %1746  ;;  %vm5541_vm2 = vcmask 261248   ;;  %vm5542_vm10 = vcmask 654848  }
 0x2a2   : > { %v1661_v13 = vpop.xlane.xlu0 %1660 }
 0x2a3   : > { %v1713_v20 = vsel %vm4129_vm7, %v1661_v13, %v1627_v41  ;;  %v1588_v13 = vsel %vm5541_vm2, %v4258_v3, -inf  ;;  %vm5544_vm2 = vmmov %vm5542_vm10 }
 0x2a4   : > { %1243 = vmax.xlane.f32.xlu1 %v1242_v32  ;;  %982 = vmax.xlane.f32.xlu0 %v981_v30  ;;  %v1799_v8 = vsel %vm4138_vm9, %v1747_v4, %v1713_v20  ;;  %v1155_v20 = vsel %vm5542_vm10, %v4212_v5, -inf  ;;  %v4278_v30 = vpop.f32.mrb[26].mxu0  ;;  %vm5545_vm10 = vcmask 130048  }
 0x2a5   : > { %v1833_v35 = vpop.xlane.xlu1 %1832 }
 0x2a6   : > { %v1919_v44 = vpop.xlane.xlu0 %1918  ;;  %v1885_v12 = vsel %vm4151_vm12, %v1833_v35, %v1799_v8 }
 0x2a7   : > { %v1971_v19 = vsel %vm4167_vm13, %v1919_v44, %v1885_v12  ;;  %v1760_v12 = vsel %vm5538_vm4, %v4258_v3, -inf }
 0x2a8   : > { %1417 = vmax.xlane.f32.xlu1 %v1416_v56  ;;  %1069 = vmax.xlane.f32.xlu0 %v1068_v47 }
 0x2a9   : > { %v2005_v25 = vpop.xlane.xlu1 %2004 }
 0x2aa   : > { %v2091_v28 = vpop.xlane.xlu0 %2090  ;;  %v3231_v40 = vpop.eup %3230  ;;  %v2057_v4 = vsel %vm4177_vm15, %v2005_v25, %v1971_v19  ;;  %v1502_v19 = vsel %vm5545_vm10, %v4258_v3, -inf  ;;  %vm5546_vm15 = vcmp.lt.s32.totalorder %v4016_v42, 16 }
 0x2ab   : > { %v2143_v45 = vsel %vm5539_vm14, %v2091_v28, %v2057_v4  ;;  %v4271_v41 = vmul.f32 %v3231_v40, %v3906_v31  ;;  %vm5543_vm14 = vcmask 917248   ;;  %v4288_v25 = vpop.f32.mrb[24].mxu1 }
 0x2ac   : > { %v2175_v32 = vsub.f32 %v3771_v17, %v2143_v45  ;;  %1589 = vmax.xlane.f32.xlu1 %v1588_v13  ;;  %1156 = vmax.xlane.f32.xlu0 %v1155_v20  ;;  %v1329_v31 = vsel %vm5543_vm14, %v4212_v5, -inf  ;;  %v1846_v17 = vsel %vm5544_vm2, %v4258_v3, -inf  ;;  %v4292_v4 = vpop.f32.mrb[25].mxu1  ;;  %vm5547_vm4 = vmmov %vm5543_vm14  ;;  %vm5551_vm2 = vcmask 786048  }
 0x2ad   : > { %5540 = vst [vmem:[#allocation4_spill] sm:$0xff] %v4271_v41  ;;  %v797_v35 = vpop.xlane.xlu1 %796  ;;  %v4294_v20 = vpop.f32.mrb[26].mxu1  ;;  %vm5550_vm14 = vmmov %vm5545_vm10  ;;  %vm5552_vm10 = vcmp.ge.s32.totalorder %v4016_v42, 112 }
 0x2ae   : > { %v884_v8 = vpop.xlane.xlu0 %883  ;;  %v2210_v44 = vmul.f32 1.442695, %v2175_v32  ;;  %v847_v28 = vsel %vm5546_vm15, %v797_v35, 0.0  ;;  %v4298_v32 = vadd.f32 %v3825_v50, %v3604_v60  ;;  %vm5548_vm15 = vcmask 392448  }
 0x2af   : > { %v1674_v35 = vsel %vm5548_vm15, %v4258_v3, -inf  ;;  %vm5554_vm15 = vcmask 1048448  }
 0x2b0   : > { %3232 = vpow2.f32 %v2210_v44  ;;  %1761 = vmax.xlane.f32.xlu1 %v1760_v12  ;;  %1330 = vmax.xlane.f32.xlu0 %v1329_v31  ;;  %v934_v44 = vsel %vm4041_vm1, %v884_v8, %v847_v28  ;;  %v2018_v12 = vsel %vm5547_vm4, %v4258_v3, -inf  ;;  %v4306_v31 = vpop.f32.mrb[27].mxu1  ;;  %v810_v48 = vsel %vm5550_vm14, %v4298_v32, -inf }
 0x2b1   : > { %v1232_v56 = vpop.xlane.xlu1 %1231  ;;  %vm5553_vm4 = vcmask 261248   ;;  %vm5555_vm14 = vcmp.lt.s32.totalorder %v4072_v10, 144 }
 0x2b2   : > { %v971_v47 = vpop.xlane.xlu0 %970 }
 0x2b4   : > { %1847 = vmax.xlane.f32.xlu1 %v1846_v17  ;;  %1503 = vmax.xlane.f32.xlu0 %v1502_v19  ;;  %v1021_v17 = vsel %vm4045_vm6, %v971_v47, %v934_v44  ;;  %v1932_v47 = vsel %vm5551_vm2, %v4258_v3, -inf  ;;  %vm5556_vm2 = vcmask 392448  }
 0x2b5   : > { %v1406_v45 = vpop.xlane.xlu1 %1405 }
 0x2b6   : > { %v1058_v13 = vpop.xlane.xlu0 %1057 }
 0x2b7   : > { %v1108_v50 = vsel %vm4053_vm8, %v1058_v13, %v1021_v17 }
 0x2b8   : > { %2019 = vmax.xlane.f32.xlu1 %v2018_v12  ;;  %1675 = vmax.xlane.f32.xlu0 %v1674_v35  ;;  %v2104_v35 = vsel %vm5554_vm15, %v4258_v3, -inf  ;;  %vm5559_vm15 = vcmask 917248  }
 0x2b9   : > { %v1578_v19 = vpop.xlane.xlu1 %1577 }
 0x2ba   : > { %v1145_v41 = vpop.xlane.xlu0 %1144  ;;  %v3233_v54 = vpop.eup %3232 }
 0x2bb   : > { %v1195_v8 = vsel %vm4076_vm11, %v1145_v41, %v1108_v50  ;;  %v4315_v28 = vmul.f32 %v3233_v54, %v3925_v39  ;;  %2614 = vmatprep.mubr.f32.mxu0 %v3233_v54  ;;  %v897_v54 = vsel %vm5553_vm4, %v4298_v32, -inf  ;;  %vm5558_vm4 = vcmask 523648  }
 0x2bc   : > { %811 = vmax.xlane.f32.xlu1 %v810_v48  ;;  %1933 = vmax.xlane.f32.xlu0 %v1932_v47  ;;  %v1282_v44 = vsel %vm4080_vm0, %v1232_v56, %v1195_v8  ;;  %v4334_v8 = vpop.f32.mrb[27].mxu0 }
 0x2bd   : > { %5549 = vst [vmem:[#allocation5_spill] sm:$0xff] %v4315_v28  ;;  %2615 = vmatmul.mubr.f32.gmra.mrb[50].mxu0 %v3231_v40  ;;  %v1750_v13 = vpop.xlane.xlu1 %1749 }
 0x2be   : > { %v1319_v12 = vpop.xlane.xlu0 %1318 }
 0x2bf   : > { %v1369_v41 = vsel %vm4090_vm5, %v1319_v12, %v1282_v44 }
 0x2c0   : > { %v1456_v39 = vsel %vm5552_vm10, %v1406_v45, %v1369_v41  ;;  %898 = vmax.xlane.f32.xlu1 %v897_v54  ;;  %2105 = vmax.xlane.f32.xlu0 %v2104_v35  ;;  %v984_v45 = vsel %vm5556_vm2, %v4298_v32, -inf  ;;  %vm5557_vm10 = vcmask 654848   ;;  %v1071_v35 = vsel %vm5558_vm4, %v4298_v32, -inf }
 0x2c1   : > { %v2176_v48 = vsub.f32 %v3844_v59, %v1456_v39  ;;  %v1836_v40 = vpop.xlane.xlu1 %1835  ;;  %v1158_v47 = vsel %vm5557_vm10, %v4298_v32, -inf  ;;  %v4346_v39 = vadd.f32 %v3833_v9, %v3622_v6  ;;  %vm5561_vm2 = vcmask 130048  }
 0x2c2   : > { %v1492_v17 = vpop.xlane.xlu0 %1491  ;;  %vm5562_vm10 = vnez %v5516_v53  ;;  %vm5563_vm4 = vcmp.ge.s32.totalorder %v4072_v10, 240 }
 0x2c3   : > { %v2212_v56 = vmul.f32 1.442695, %v2176_v48  ;;  %v1543_v50 = vsel %vm5555_vm14, %v1492_v17, 0.0  ;;  %v1332_v48 = vsel %vm5559_vm15, %v4298_v32, -inf  ;;  %vm5560_vm14 = vcmask 786048  }
 0x2c4   : > { %985 = vmax.xlane.f32.xlu1 %v984_v45  ;;  %1159 = vmax.xlane.f32.xlu0 %v1158_v47  ;;  %v1629_v44 = vsel %vm5534_vm3, %v1578_v19, %v1543_v50  ;;  %v1245_v50 = vsel %vm5560_vm14, %v4298_v32, -inf  ;;  %vm5565_vm15 = vcmask 1048448   ;;  %vm5566_vm14 = vcmask 392448  }
 0x2c5   : > { %3234 = vpow2.f32 %v2212_v56  ;;  %v2008_v59 = vpop.xlane.xlu1 %2007 }
 0x2c6   : > { %v1664_v12 = vpop.xlane.xlu0 %1663 }
 0x2c7   : > { %v1715_v41 = vsel %vm4129_vm7, %v1664_v12, %v1629_v44 }
 0x2c8   : > { %v1801_v54 = vsel %vm4138_vm9, %v1750_v13, %v1715_v41  ;;  %1072 = vmax.xlane.f32.xlu1 %v1071_v35  ;;  %1333 = vmax.xlane.f32.xlu0 %v1332_v48  ;;  %v1505_v13 = vsel %vm5561_vm2, %v4346_v39, -inf  ;;  %v1419_v35 = vsel %vm5565_vm15, %v4298_v32, -inf  ;;  %v1677_v48 = vsel %vm5566_vm14, %v4346_v39, -inf }
 0x2c9   : > { %v1887_v19 = vsel %vm4151_vm12, %v1836_v40, %v1801_v54  ;;  %v800_v17 = vpop.xlane.xlu1 %799  ;;  %vm5567_vm2 = vcmp.lt.s32.totalorder %v4016_v42, 16  ;;  %vm5571_vm15 = vcmask 523648   ;;  %vm5573_vm14 = vcmask 130048  }
 0x2ca   : > { %v1922_v56 = vpop.xlane.xlu0 %1921 }
 0x2cb   : > { %v1973_v9 = vsel %vm4167_vm13, %v1922_v56, %v1887_v19 }
 0x2cc   : > { %1246 = vmax.xlane.f32.xlu1 %v1245_v50  ;;  %1506 = vmax.xlane.f32.xlu0 %v1505_v13  ;;  %v2059_v47 = vsel %vm5562_vm10, %v2008_v59, %v1973_v9  ;;  %v4374_v9 = vpop.f32.mrb[28].mxu0  ;;  %v849_v50 = vsel %vm5567_vm2, %v800_v17, 0.0  ;;  %vm5569_vm10 = vcmask 786048   ;;  %vm5574_vm2 = vcmask 654848  }
 0x2cd   : > { %v887_v45 = vpop.xlane.xlu1 %886 }
 0x2ce   : > { %v2094_v44 = vpop.xlane.xlu0 %2093  ;;  %v936_v13 = vsel %vm4041_vm1, %v887_v45, %v849_v50 }
 0x2cf   : > { %v3235_v12 = vpop.eup %3234  ;;  %v2145_v40 = vsel %vm5563_vm4, %v2094_v44, %v2059_v47  ;;  %vm5568_vm4 = vcmask 261248   ;;  %v4388_v44 = vadd.f32 %v3961_v63, %v3604_v60 }
 0x2d0   : > { %v2177_v41 = vsub.f32 %v3893_v26, %v2145_v40  ;;  %v4368_v54 = vmul.f32 %v3235_v12, %v3955_v58  ;;  %1420 = vmax.xlane.f32.xlu1 %v1419_v35  ;;  %1678 = vmax.xlane.f32.xlu0 %v1677_v48  ;;  %v1591_v26 = vsel %vm5568_vm4, %v4346_v39, -inf  ;;  %v1935_v58 = vsel %vm5569_vm10, %v4346_v39, -inf }
 0x2d1   : > { %v974_v59 = vpop.xlane.xlu1 %973  ;;  %5570 = vst [vmem:[#allocation7_spill] sm:$0xff] %v4388_v44  ;;  %v1763_v35 = vsel %vm5571_vm15, %v4346_v39, -inf  ;;  %vm5572_vm10 = vcmask 1048448   ;;  %v813_v63 = vsel %vm5573_vm14, %v4388_v44, -inf  ;;  %vm5576_vm4 = vcmp.ge.s32.totalorder %v4016_v42, 112 }
 0x2d2   : > { %5564 = vst [vmem:[#allocation6_spill] sm:$0xff] %v4368_v54  ;;  %v2214_v19 = vmul.f32 1.442695, %v2177_v41  ;;  %v1148_v56 = vpop.xlane.xlu0 %1147  ;;  %v1023_v47 = vsel %vm4045_vm6, %v974_v59, %v936_v13  ;;  %v2107_v45 = vsel %vm5572_vm10, %v4346_v39, -inf  ;;  %vm5578_vm15 = vcmask 917248  }
 0x2d3   : > { %vm5579_vm10 = vcmask 261248  }
 0x2d4   : > { %3236 = vpow2.f32 %v2214_v19  ;;  %1592 = vmax.xlane.f32.xlu1 %v1591_v26  ;;  %1936 = vmax.xlane.f32.xlu0 %v1935_v58  ;;  %v1849_v26 = vsel %vm5574_vm2, %v4346_v39, -inf  ;;  %v4404_v58 = vpop.f32.mrb[29].mxu0  ;;  %vm5580_vm14 = vmmov %vm5579_vm10  ;;  %vm5581_vm2 = vcmask 392448  }
 0x2d5   : > { %v1061_v17 = vpop.xlane.xlu1 %1060 }
 0x2d6   : > { %v1322_v40 = vpop.xlane.xlu0 %1321  ;;  %v1110_v41 = vsel %vm4053_vm8, %v1061_v17, %v1023_v47 }
 0x2d7   : > { %v1197_v19 = vsel %vm4076_vm11, %v1148_v56, %v1110_v41 }
 0x2d8   : > { %1764 = vmax.xlane.f32.xlu1 %v1763_v35  ;;  %2108 = vmax.xlane.f32.xlu0 %v2107_v45  ;;  %v4415_v45 = vadd.f32 %v3963_v0, %v3622_v6  ;;  %v987_v0 = vsel %vm5581_vm2, %v4388_v44, -inf }
 0x2d9   : > { %v1235_v48 = vpop.xlane.xlu1 %1234 }
 0x2da   : > { %v1495_v59 = vpop.xlane.xlu0 %1494  ;;  %v1284_v50 = vsel %vm4080_vm0, %v1235_v48, %v1197_v19  ;;  %5577 = vst [vmem:[#allocation9_spill] sm:$0xff] %v4415_v45  ;;  %v2021_v19 = vsel %vm5578_vm15, %v4346_v39, -inf  ;;  %vm5585_vm15 = vcmask 523648  }
 0x2db   : > { %v1371_v17 = vsel %vm4090_vm5, %v1322_v40, %v1284_v50  ;;  %v900_v40 = vsel %vm5579_vm10, %v4388_v44, -inf  ;;  %vm5586_vm10 = vmmov %vm5585_vm15 }
 0x2dc   : > { %1850 = vmax.xlane.f32.xlu1 %v1849_v26  ;;  %814 = vmax.xlane.f32.xlu0 %v813_v63  ;;  %v1594_v26 = vsel %vm5580_vm14, %v4415_v45, -inf  ;;  %vm5590_vm14 = vcmask 130048  }
 0x2dd   : > { %v1409_v47 = vpop.xlane.xlu1 %1408  ;;  %vm5591_vm2 = vmmov %vm5590_vm14 }
 0x2de   : > { %v3237_v13 = vpop.eup %3236  ;;  %v1667_v56 = vpop.xlane.xlu0 %1666  ;;  %v1458_v35 = vsel %vm5576_vm4, %v1409_v47, %v1371_v17  ;;  %vm5582_vm4 = vcmp.lt.s32.totalorder %v4072_v10, 144 }
 0x2df   : > { %v4409_v41 = vmul.f32 %v3237_v13, %v3981_v23  ;;  %2619 = vmatprep.mubr.f32.mxu0 %v3237_v13  ;;  %v2178_v48 = vsub.f32 %v3919_v37, %v1458_v35  ;;  %v4426_v37 = vpop.f32.mrb[30].mxu0 }
 0x2e0   : > { %2620 = vmatmul.mubr.f32.gmra.mrb[52].mxu0 %v3235_v12  ;;  %2022 = vmax.xlane.f32.xlu1 %v2021_v19  ;;  %v1545_v12 = vsel %vm5582_vm4, %v1495_v59, 0.0  ;;  %v4430_v13 = vpop.f32.mrb[31].mxu0  ;;  %v4438_v19 = vadd.f32 %v3969_v1, %v3604_v60  ;;  %v1074_v59 = vsel %vm5586_vm10, %v4388_v44, -inf  ;;  %vm5593_vm4 = vnez %v5516_v53 }
 0x2e1   : > { %5575 = vst [vmem:[#allocation8_spill] sm:$0xff] %v4409_v41  ;;  %901 = vmax.xlane.f32.xlu0 %v900_v40  ;;  %v2216_v23 = vmul.f32 1.442695, %v2178_v48  ;;  %v1581_v63 = vpop.xlane.xlu1 %1580  ;;  %v4434_v48 = vpop.f32.mrb[32].mxu0  ;;  %v1766_v40 = vsel %vm5585_vm15, %v4415_v45, -inf  ;;  %vm5595_vm15 = vcmp.ge.s32.totalorder %v4072_v10, 240 }
 0x2e2   : > { %v1925_v50 = vpop.xlane.xlu0 %1924  ;;  %v1631_v47 = vsel %vm5534_vm3, %v1581_v63, %v1545_v12  ;;  %5583 = vst [vmem:[#allocation10_spill] sm:$0xff] %v4434_v48  ;;  %5584 = vst [vmem:[#allocation11_spill] sm:$0xff] %v4438_v19  ;;  %vm5596_vm10 = vcmask 261248  }
 0x2e3   : > { %3238 = vpow2.f32 %v2216_v23  ;;  %v4444_v23 = vpop.f32.mrb[33].mxu0 }
 0x2e4   : > { %1595 = vmax.xlane.f32.xlu1 %v1594_v26  ;;  %5587 = vst [vmem:[#allocation12_spill] sm:$0xff] %v4444_v23  ;;  %v1717_v26 = vsel %vm4129_vm7, %v1667_v56, %v1631_v47  ;;  %v4448_v63 = vpop.f32.mrb[34].mxu0  ;;  %v816_v23 = vsel %vm5590_vm14, %v4438_v19, -inf  ;;  %v1508_v56 = vsel %vm5591_vm2, %v4415_v45, -inf  ;;  %vm5597_vm14 = vcmask 392448  }
 0x2e5   : > { %988 = vmax.xlane.f32.xlu0 %v987_v0  ;;  %v1753_v17 = vpop.xlane.xlu1 %1752  ;;  %5588 = vst [vmem:[#allocation13_spill] sm:$0xff] %v4448_v63  ;;  %v4454_v54 = vpop.f32.mrb[35].mxu0  ;;  %v1680_v41 = vsel %vm5597_vm14, %v4415_v45, -inf }
 0x2e6   : > { %v2097_v35 = vpop.xlane.xlu0 %2096  ;;  %v1803_v0 = vsel %vm4138_vm9, %v1753_v17, %v1717_v26  ;;  %5589 = vst [vmem:[#allocation14_spill] sm:$0xff] %v4454_v54  ;;  %v4460_v47 = vpop.f32.mrb[36].mxu0 }
 0x2e8   : > { %1767 = vmax.xlane.f32.xlu1 %v1766_v40  ;;  %v4462_v40 = vpop.f32.mrb[37].mxu0 }
 0x2e9   : > { %1075 = vmax.xlane.f32.xlu0 %v1074_v59  ;;  %v1839_v1 = vpop.xlane.xlu1 %1838  ;;  %v4468_v59 = vadd.f32 %v3999_v27, %v3604_v60  ;;  %v903_v27 = vsel %vm5596_vm10, %v4438_v19, -inf  ;;  %vm5604_vm10 = vcmp.lt.s32.totalorder %v4016_v42, 16 }
 0x2ea   : > { %v803_v12 = vpop.xlane.xlu0 %802  ;;  %v1889_v48 = vsel %vm4151_vm12, %v1839_v1, %v1803_v0 }
 0x2eb   : > { %v1975_v0 = vsel %vm4167_vm13, %v1925_v50, %v1889_v48 }
 0x2ec   : > { %817 = vmax.xlane.f32.xlu1 %v816_v23 }
 0x2ed   : > { %1509 = vmax.xlane.f32.xlu0 %v1508_v56  ;;  %v4464_v17 = vpop.eup %3238  ;;  %v2011_v26 = vpop.xlane.xlu1 %2010 }
 0x2ee   : > { %v890_v1 = vpop.xlane.xlu0 %889  ;;  %v4474_v54 = vmul.f32 %v4464_v17, %v4007_v16  ;;  %v2061_v23 = vsel %vm5593_vm4, %v2011_v26, %v1975_v0  ;;  %v4478_v56 = vpop.f32.mrb[38].mxu0 }
 0x2ef   : > { %5594 = vst [vmem:[#allocation16_spill] sm:$0xff] %v4478_v56  ;;  %v2147_v63 = vsel %vm5595_vm15, %v2097_v35, %v2061_v23  ;;  %v4486_v50 = vpop.f32.mrb[39].mxu0  ;;  %vm5601_vm15 = vmmov %vm5597_vm14  ;;  %vm5606_vm14 = vcmask 523648  }
 0x2f0   : > { %5592 = vst [vmem:[#allocation15_spill] sm:$0xff] %v4474_v54  ;;  %5598 = vst [vmem:[#allocation17_spill] sm:$0xff] %v4486_v50  ;;  %v2179_v48 = vsub.f32 %v3941_v51, %v2147_v63  ;;  %904 = vmax.xlane.f32.xlu1 %v903_v27  ;;  %v4489_v16 = vpop.f32.mrb[40].mxu0  ;;  %v819_v54 = vsel %vm5591_vm2, %v4468_v59, -inf  ;;  %v990_v28 = vsel %vm5601_vm15, %v4438_v19, -inf  ;;  %v4499_v50 = vpop.f32.mrb[28].mxu1 }
 0x2f1   : > { %1681 = vmax.xlane.f32.xlu0 %v1680_v41  ;;  %5599 = vst [vmem:[#allocation18_spill] sm:$0xff] %v4489_v16  ;;  %v1238_v26 = vpop.xlane.xlu1 %1237  ;;  %v4493_v23 = vpop.f32.mrb[41].mxu0  ;;  %vm5607_vm2 = vcmask 261248   ;;  %vm5609_vm15 = vcmask 654848  }
 0x2f2   : > { %v977_v0 = vpop.xlane.xlu0 %976  ;;  %v2218_v35 = vmul.f32 1.442695, %v2179_v48  ;;  %5600 = vst [vmem:[#allocation19_spill] sm:$0xff] %v4493_v23  ;;  %v4497_v56 = vpop.f32.mrb[42].mxu0  ;;  %v851_v48 = vsel %vm5604_vm10, %v803_v12, 0.0  ;;  %vm5610_vm10 = vcmask 392448  }
 0x2f3   : > { %5602 = vst [vmem:[#allocation20_spill] sm:$0xff] %v4497_v56  ;;  %v4501_v51 = vpop.f32.mrb[43].mxu0  ;;  %v4503_v41 = vpop.f32.mrb[29].mxu1  ;;  %v938_v56 = vsel %vm4041_vm1, %v890_v1, %v851_v48 }
 0x2f4   : > { %3240 = vpow2.f32 %v2218_v35  ;;  %991 = vmax.xlane.f32.xlu1 %v990_v28  ;;  %5603 = vst [vmem:[#allocation21_spill] sm:$0xff] %v4501_v51  ;;  %v4507_v23 = vpop.f32.mrb[44].mxu0  ;;  %v4509_v16 = vpop.f32.mrb[30].mxu1  ;;  %v1077_v28 = vsel %vm5606_vm14, %v4438_v19, -inf  ;;  %v1025_v12 = vsel %vm4045_vm6, %v977_v0, %v938_v56  ;;  %v993_v56 = vsel %vm5610_vm10, %v4468_v59, -inf }
 0x2f5   : > { %820 = vmax.xlane.f32.xlu0 %v819_v54  ;;  %v1412_v63 = vpop.xlane.xlu1 %1411  ;;  %5605 = vst [vmem:[#allocation22_spill] sm:$0xff] %v4507_v23  ;;  %v906_v54 = vsel %vm5607_vm2, %v4468_v59, -inf  ;;  %v4517_v35 = vpop.f32.mrb[45].mxu0  ;;  %vm5611_vm14 = vcmp.ge.s32.totalorder %v4016_v42, 112  ;;  %vm5612_vm2 = vcmask 917248   ;;  %vm5614_vm10 = vcmp.lt.s32.totalorder %v4072_v10, 144 }
 0x2f6   : > { %v1064_v27 = vpop.xlane.xlu0 %1063  ;;  %5608 = vst [vmem:[#allocation23_spill] sm:$0xff] %v4517_v35  ;;  %v4519_v51 = vpop.f32.mrb[31].mxu1  ;;  %v1167_v35 = vsel %vm5609_vm15, %v4468_v59, -inf  ;;  %vm5613_vm15 = vcmask 523648  }
 0x2f7   : > { %v4523_v23 = vpop.f32.mrb[46].mxu0  ;;  %v1112_v1 = vsel %vm4053_vm8, %v1064_v27, %v1025_v12 }
 0x2f8   : > { %1078 = vmax.xlane.f32.xlu1 %v1077_v28  ;;  %v4529_v45 = vpop.f32.mrb[47].mxu0 }
 0x2f9   : > { %907 = vmax.xlane.f32.xlu0 %v906_v54  ;;  %v1584_v48 = vpop.xlane.xlu1 %1583 }
 0x2fa   : > { %v1151_v44 = vpop.xlane.xlu0 %1150 }
 0x2fb   : > { %v1199_v19 = vsel %vm4076_vm11, %v1151_v44, %v1112_v1 }
 0x2fc   : > { %1168 = vmax.xlane.f32.xlu1 %v1167_v35  ;;  %v1286_v28 = vsel %vm4080_vm0, %v1238_v26, %v1199_v19  ;;  %v1341_v35 = vsel %vm5612_vm2, %v4468_v59, -inf  ;;  %vm5616_vm2 = vcmask 786048  }
 0x2fd   : > { %994 = vmax.xlane.f32.xlu0 %v993_v56  ;;  %v1756_v0 = vpop.xlane.xlu1 %1755  ;;  %v1080_v56 = vsel %vm5613_vm15, %v4468_v59, -inf  ;;  %vm5617_vm15 = vcmask 261248  }
 0x2fe   : > { %v1325_v27 = vpop.xlane.xlu0 %1324  ;;  %v3241_v54 = vpop.eup %3240 }
 0x2ff   : > { %v1373_v12 = vsel %vm4090_vm5, %v1325_v27, %v1286_v28  ;;  %v4542_v1 = vmul.f32 %v3241_v54, %v4116_v52  ;;  %2624 = vmatprep.mubr.f32.mxu0 %v3241_v54 }
 0x300   : > { %v1460_v44 = vsel %vm5611_vm14, %v1412_v63, %v1373_v12  ;;  %1342 = vmax.xlane.f32.xlu1 %v1341_v35  ;;  %2625 = vmatmul.mubr.f32.gmra.mrb[54].mxu0 %v4464_v17  ;;  %v4554_v63 = vadd.f32 %v4005_v24, %v3622_v6  ;;  %vm5615_vm14 = vcmask 1048448  }
 0x301   : > { %v2180_v19 = vsub.f32 %v3967_v15, %v1460_v44  ;;  %1081 = vmax.xlane.f32.xlu0 %v1080_v56  ;;  %v1842_v26 = vpop.xlane.xlu1 %1841  ;;  %v1428_v54 = vsel %vm5615_vm14, %v4468_v59, -inf  ;;  %v1254_v15 = vsel %vm5616_vm2, %v4468_v59, -inf  ;;  %vm5619_vm14 = vcmask 523648  }
 0x302   : > { %v1498_v28 = vpop.xlane.xlu0 %1497  ;;  %v1600_v56 = vsel %vm5617_vm15, %v4554_v63, -inf  ;;  %vm5620_vm2 = vcmask 392448   ;;  %vm5621_vm15 = vcmp.ge.s32.totalorder %v4072_v10, 240 }
 0x303   : > { %v2220_v27 = vmul.f32 1.442695, %v2180_v19  ;;  %v1547_v52 = vsel %vm5614_vm10, %v1498_v28, 0.0  ;;  %vm5618_vm10 = vcmask 130048  }
 0x304   : > { %1429 = vmax.xlane.f32.xlu1 %v1428_v54  ;;  %v1633_v12 = vsel %vm5534_vm3, %v1584_v48, %v1547_v52  ;;  %v1514_v19 = vsel %vm5618_vm10, %v4554_v63, -inf  ;;  %v1772_v54 = vsel %vm5619_vm14, %v4554_v63, -inf  ;;  %vm5622_vm10 = vcmask 786048  }
 0x305   : > { %3242 = vpow2.f32 %v2220_v27  ;;  %1255 = vmax.xlane.f32.xlu0 %v1254_v15  ;;  %v2014_v17 = vpop.xlane.xlu1 %2013  ;;  %vm5623_vm14 = vcmask 654848  }
 0x306   : > { %v1670_v44 = vpop.xlane.xlu0 %1669 }
 0x307   : > { %v1719_v35 = vsel %vm4129_vm7, %v1670_v44, %v1633_v12 }
 0x308   : > { %v1805_v24 = vsel %vm4138_vm9, %v1756_v0, %v1719_v35  ;;  %1601 = vmax.xlane.f32.xlu1 %v1600_v56  ;;  %v1686_v0 = vsel %vm5620_vm2, %v4554_v63, -inf  ;;  %vm5624_vm2 = vcmp.lt.s32.totalorder %v4016_v42, 16 }
 0x309   : > { %1515 = vmax.xlane.f32.xlu0 %v1514_v19  ;;  %v1891_v28 = vsel %vm4151_vm12, %v1842_v26, %v1805_v24  ;;  %v806_v27 = vpop.xlane.xlu1 %805  ;;  %v1944_v19 = vsel %vm5622_vm10, %v4554_v63, -inf  ;;  %vm5626_vm10 = vcmask 917248  }
 0x30a   : > { %v1928_v48 = vpop.xlane.xlu0 %1927 }
 0x30b   : > { %v1977_v52 = vsel %vm4167_vm13, %v1928_v48, %v1891_v28  ;;  %v1858_v28 = vsel %vm5623_vm14, %v4554_v63, -inf  ;;  %vm5627_vm14 = vcmask 130048  }
 0x30c   : > { %1773 = vmax.xlane.f32.xlu1 %v1772_v54  ;;  %v2063_v12 = vsel %vm5593_vm4, %v2014_v17, %v1977_v52  ;;  %v4592_v54 = vadd.f32 %v4018_v43, %v3604_v60 }
 0x30d   : > { %1687 = vmax.xlane.f32.xlu0 %v1686_v0  ;;  %v893_v15 = vpop.xlane.xlu1 %892  ;;  %v2030_v0 = vsel %vm5626_vm10, %v4554_v63, -inf  ;;  %vm5630_vm10 = vcmask 654848  }
 0x30e   : > { %v2100_v44 = vpop.xlane.xlu0 %2099 }
 0x30f   : > { %v3243_v35 = vpop.eup %3242  ;;  %v2149_v26 = vsel %vm5621_vm15, %v2100_v44, %v2063_v12  ;;  %vm5625_vm15 = vcmask 1048448  }
 0x310   : > { %v2181_v24 = vsub.f32 %v3993_v22, %v2149_v26  ;;  %v4584_v56 = vmul.f32 %v3243_v35, %v4199_v18  ;;  %1945 = vmax.xlane.f32.xlu1 %v1944_v19  ;;  %v853_v22 = vsel %vm5624_vm2, %v806_v27, 0.0  ;;  %v2116_v18 = vsel %vm5625_vm15, %v4554_v63, -inf }
 0x311   : > { %1859 = vmax.xlane.f32.xlu0 %v1858_v28  ;;  %v980_v17 = vpop.xlane.xlu1 %979  ;;  %v940_v12 = vsel %vm4041_vm1, %v893_v15, %v853_v22  ;;  %vm5628_vm2 = vcmask 523648   ;;  %vm5629_vm15 = vcmask 261248  }
 0x312   : > { %v2222_v48 = vmul.f32 1.442695, %v2181_v24  ;;  %v1154_v52 = vpop.xlane.xlu0 %1153  ;;  %v1027_v44 = vsel %vm4045_vm6, %v980_v17, %v940_v12  ;;  %v822_v24 = vsel %vm5627_vm14, %v4592_v54, -inf  ;;  %v1083_v19 = vsel %vm5628_vm2, %v4592_v54, -inf }
 0x313   : > { %v909_v22 = vsel %vm5629_vm15, %v4592_v54, -inf  ;;  %vm5631_vm14 = vcmp.ge.s32.totalorder %v4016_v42, 112  ;;  %vm5632_vm2 = vcmask 392448   ;;  %vm5633_vm15 = vcmask 917248  }
 0x314   : > { %3244 = vpow2.f32 %v2222_v48  ;;  %2117 = vmax.xlane.f32.xlu1 %v2116_v18  ;;  %v1170_v18 = vsel %vm5630_vm10, %v4592_v54, -inf  ;;  %vm5634_vm10 = vcmask 786048  }
 0x315   : > { %2031 = vmax.xlane.f32.xlu0 %v2030_v0  ;;  %v1067_v43 = vpop.xlane.xlu1 %1066 }
 0x316   : > { %v1328_v26 = vpop.xlane.xlu0 %1327  ;;  %v1114_v27 = vsel %vm4053_vm8, %v1067_v43, %v1027_v44 }
 0x317   : > { %v1201_v15 = vsel %vm4076_vm11, %v1154_v52, %v1114_v27 }
 0x318   : > { %823 = vmax.xlane.f32.xlu1 %v822_v24 }
 0x319   : > { %1084 = vmax.xlane.f32.xlu0 %v1083_v19  ;;  %v1241_v28 = vpop.xlane.xlu1 %1240  ;;  %v996_v19 = vsel %vm5632_vm2, %v4592_v54, -inf  ;;  %vm5636_vm2 = vcmp.lt.s32.totalorder %v4072_v10, 144 }
 0x31a   : > { %v1501_v48 = vpop.xlane.xlu0 %1500  ;;  %v1288_v17 = vsel %vm4080_vm0, %v1241_v28, %v1201_v15  ;;  %v1344_v28 = vsel %vm5633_vm15, %v4592_v54, -inf  ;;  %vm5637_vm15 = vcmask 130048  }
 0x31b   : > { %v1375_v44 = vsel %vm4090_vm5, %v1328_v26, %v1288_v17  ;;  %vm5638_vm5 = vcmask 261248  }
 0x31c   : > { %910 = vmax.xlane.f32.xlu1 %v909_v22  ;;  %v1549_v22 = vsel %vm5636_vm2, %v1501_v48, 0.0  ;;  %vm5642_vm2 = vcmask 654848  }
 0x31d   : > { %1171 = vmax.xlane.f32.xlu0 %v1170_v18  ;;  %v1415_v12 = vpop.xlane.xlu1 %1414 }
 0x31e   : > { %v3245_v0 = vpop.eup %3244  ;;  %v1673_v43 = vpop.xlane.xlu0 %1672  ;;  %v1462_v27 = vsel %vm5631_vm14, %v1415_v12, %v1375_v44  ;;  %vm5635_vm14 = vcmask 1048448  }
 0x31f   : > { %v4621_v52 = vmul.f32 %v3245_v0, %v4233_v57  ;;  %2629 = vmatprep.mubr.f32.mxu0 %v3245_v0  ;;  %v2182_v24 = vsub.f32 %v4030_v49, %v1462_v27  ;;  %v4632_v57 = vadd.f32 %v4024_v46, %v3622_v6  ;;  %v1257_v49 = vsel %vm5634_vm10, %v4592_v54, -inf }
 0x320   : > { %2630 = vmatmul.mubr.f32.gmra.mrb[56].mxu0 %v3243_v35  ;;  %997 = vmax.xlane.f32.xlu1 %v996_v19  ;;  %v1431_v35 = vsel %vm5635_vm14, %v4592_v54, -inf  ;;  %vm5639_vm10 = vcmask 392448   ;;  %vm5640_vm14 = vcmask 523648  }
 0x321   : > { %1345 = vmax.xlane.f32.xlu0 %v1344_v28  ;;  %v2224_v26 = vmul.f32 1.442695, %v2182_v24  ;;  %v1587_v15 = vpop.xlane.xlu1 %1586  ;;  %v1517_v46 = vsel %vm5637_vm15, %v4632_v57, -inf  ;;  %v1603_v44 = vsel %vm5638_vm5, %v4632_v57, -inf  ;;  %vm5641_vm5 = vcmp.ge.s32.totalorder %v4072_v10, 240 }
 0x322   : > { %v1931_v17 = vpop.xlane.xlu0 %1930  ;;  %v1635_v18 = vsel %vm5534_vm3, %v1587_v15, %v1549_v22  ;;  %v1775_v15 = vsel %vm5640_vm14, %v4632_v57, -inf  ;;  %vm5643_vm15 = vcmask 786048   ;;  %vm5645_vm14 = vcmask 1048448  }
 0x323   : > { %3246 = vpow2.f32 %v2224_v26  ;;  %v1721_v27 = vsel %vm4129_vm7, %v1673_v43, %v1635_v18  ;;  %v1689_v26 = vsel %vm5639_vm10, %v4632_v57, -inf  ;;  %vm5644_vm10 = vcmask 917248  }
 0x324   : > { %1258 = vmax.xlane.f32.xlu1 %v1257_v49 }
 0x325   : > { %1432 = vmax.xlane.f32.xlu0 %v1431_v35  ;;  %v1759_v0 = vpop.xlane.xlu1 %1758 }
 0x326   : > { %v2103_v12 = vpop.xlane.xlu0 %2102  ;;  %v1807_v48 = vsel %vm4138_vm9, %v1759_v0, %v1721_v27  ;;  %v1947_v27 = vsel %vm5643_vm15, %v4632_v57, -inf  ;;  %vm5648_vm15 = vcmp.lt.s32.totalorder %v4016_v42, 16 }
 0x328   : > { %1518 = vmax.xlane.f32.xlu1 %v1517_v46 }
 0x329   : > { %1604 = vmax.xlane.f32.xlu0 %v1603_v44  ;;  %v1845_v24 = vpop.xlane.xlu1 %1844  ;;  %v1861_v44 = vsel %vm5642_vm2, %v4632_v57, -inf  ;;  %vm5647_vm2 = vcmask 130048  }
 0x32a   : > { %v809_v19 = vpop.xlane.xlu0 %808  ;;  %v1893_v28 = vsel %vm4151_vm12, %v1845_v24, %v1807_v48 }
 0x32b   : > { %v1979_v35 = vsel %vm4167_vm13, %v1931_v17, %v1893_v28 }
 0x32c   : > { %1690 = vmax.xlane.f32.xlu1 %v1689_v26  ;;  %v2119_v26 = vsel %vm5645_vm14, %v4632_v57, -inf  ;;  %vm5650_vm14 = vcmask 261248  }
 0x32d   : > { %1776 = vmax.xlane.f32.xlu0 %v1775_v15  ;;  %v3247_v49 = vpop.eup %3246  ;;  %v2017_v43 = vpop.xlane.xlu1 %2016 }
 0x32e   : > { %v896_v22 = vpop.xlane.xlu0 %895  ;;  %v4659_v18 = vmul.f32 %v3247_v49, %v4278_v30  ;;  %v2065_v0 = vsel %vm5593_vm4, %v2017_v43, %v1979_v35  ;;  %v4672_v30 = vadd.f32 %v4288_v25, %v3604_v60  ;;  %v855_v35 = vsel %vm5648_vm15, %v809_v19, 0.0 }
 0x32f   : > { %v2151_v46 = vsel %vm5641_vm5, %v2103_v12, %v2065_v0  ;;  %v2033_v12 = vsel %vm5644_vm10, %v4632_v57, -inf  ;;  %vm5646_vm5 = vcmask 523648   ;;  %v942_v0 = vsel %vm4041_vm1, %v896_v22, %v855_v35 }
 0x330   : > { %v2183_v48 = vsub.f32 %v4157_v14, %v2151_v46  ;;  %1862 = vmax.xlane.f32.xlu1 %v1861_v44  ;;  %v1086_v43 = vsel %vm5646_vm5, %v4672_v30, -inf  ;;  %v825_v25 = vsel %vm5647_vm2, %v4672_v30, -inf  ;;  %vm5649_vm10 = vcmask 654848  }
 0x331   : > { %1948 = vmax.xlane.f32.xlu0 %v1947_v27  ;;  %v1244_v17 = vpop.xlane.xlu1 %1243  ;;  %v912_v19 = vsel %vm5650_vm14, %v4672_v30, -inf  ;;  %vm5651_vm5 = vnez %v5497_v34  ;;  %vm5652_vm2 = vcmp.ge.s32.totalorder %v4016_v42, 112  ;;  %vm5653_vm15 = vcmask 917248  }
 0x332   : > { %v983_v24 = vpop.xlane.xlu0 %982  ;;  %v2226_v28 = vmul.f32 1.442695, %v2183_v48  ;;  %vm5655_vm14 = vcmp.lt.s32.totalorder %v4072_v10, 144 }
 0x333   : > { %v1029_v46 = vsel %vm4045_vm6, %v983_v24, %v942_v0  ;;  %v1347_v0 = vsel %vm5653_vm15, %v4672_v30, -inf  ;;  %vm5657_vm15 = vcmask 786048  }
 0x334   : > { %3248 = vpow2.f32 %v2226_v28  ;;  %2034 = vmax.xlane.f32.xlu1 %v2033_v12  ;;  %v1173_v12 = vsel %vm5649_vm10, %v4672_v30, -inf  ;;  %vm5654_vm10 = vcmask 392448  }
 0x335   : > { %2120 = vmax.xlane.f32.xlu0 %v2119_v26  ;;  %v1418_v15 = vpop.xlane.xlu1 %1417 }
 0x336   : > { %v1070_v14 = vpop.xlane.xlu0 %1069 }
 0x337   : > { %v1116_v44 = vsel %vm4053_vm8, %v1070_v14, %v1029_v46  ;;  %v999_v46 = vsel %vm5654_vm10, %v4672_v30, -inf  ;;  %vm5658_vm10 = vcmask 261248  }
 0x338   : > { %1087 = vmax.xlane.f32.xlu1 %v1086_v43 }
 0x339   : > { %826 = vmax.xlane.f32.xlu0 %v825_v25  ;;  %v1590_v27 = vpop.xlane.xlu1 %1589 }
 0x33a   : > { %v1157_v48 = vpop.xlane.xlu0 %1156 }
 0x33b   : > { %v1203_v28 = vsel %vm4076_vm11, %v1157_v48, %v1116_v44 }
 0x33c   : > { %1174 = vmax.xlane.f32.xlu1 %v1173_v12  ;;  %v1290_v24 = vsel %vm4080_vm0, %v1244_v17, %v1203_v28 }
 0x33d   : > { %913 = vmax.xlane.f32.xlu0 %v912_v19  ;;  %v1762_v22 = vpop.xlane.xlu1 %1761  ;;  %v1260_v19 = vsel %vm5657_vm15, %v4672_v30, -inf  ;;  %vm5661_vm15 = vcmask 392448  }
 0x33e   : > { %v1331_v26 = vpop.xlane.xlu0 %1330  ;;  %v3249_v43 = vpop.eup %3248 }
 0x33f   : > { %v1377_v14 = vsel %vm5651_vm5, %v1331_v26, %v1290_v24  ;;  %v4703_v35 = vmul.f32 %v3249_v43, %v4334_v8  ;;  %2634 = vmatprep.mubr.f32.mxu0 %v3249_v43  ;;  %v4714_v8 = vadd.f32 %v4292_v4, %v3622_v6 }
 0x340   : > { %v1464_v25 = vsel %vm5652_vm2, %v1418_v15, %v1377_v14  ;;  %1348 = vmax.xlane.f32.xlu1 %v1347_v0  ;;  %2635 = vmatmul.mubr.f32.gmra.mrb[58].mxu0 %v3247_v49  ;;  %vm5656_vm2 = vcmask 1048448  }
 0x341   : > { %v2184_v17 = vsub.f32 %v4212_v5, %v1464_v25  ;;  %1000 = vmax.xlane.f32.xlu0 %v999_v46  ;;  %v1848_v44 = vpop.xlane.xlu1 %1847  ;;  %v1434_v12 = vsel %vm5656_vm2, %v4672_v30, -inf  ;;  %v1606_v43 = vsel %vm5658_vm10, %v4714_v8, -inf  ;;  %vm5660_vm2 = vcmask 523648  }
 0x342   : > { %v1504_v48 = vpop.xlane.xlu0 %1503  ;;  %vm5662_vm10 = vcmp.ge.s32.totalorder %v4072_v10, 240 }
 0x343   : > { %v2228_v28 = vmul.f32 1.442695, %v2184_v17  ;;  %v1551_v15 = vsel %vm5655_vm14, %v1504_v48, 0.0  ;;  %vm5659_vm14 = vcmask 130048   ;;  %v1778_v17 = vsel %vm5660_vm2, %v4714_v8, -inf }
 0x344   : > { %1435 = vmax.xlane.f32.xlu1 %v1434_v12  ;;  %v1637_v49 = vsel %vm5534_vm3, %v1590_v27, %v1551_v15  ;;  %v1520_v14 = vsel %vm5659_vm14, %v4714_v8, -inf  ;;  %vm5663_vm14 = vcmask 786048   ;;  %vm5664_vm2 = vcmask 654848  }
 0x345   : > { %3250 = vpow2.f32 %v2228_v28  ;;  %1261 = vmax.xlane.f32.xlu0 %v1260_v19  ;;  %v2020_v5 = vpop.xlane.xlu1 %2019 }
 0x346   : > { %v1676_v24 = vpop.xlane.xlu0 %1675 }
 0x347   : > { %v1723_v26 = vsel %vm4129_vm7, %v1676_v24, %v1637_v49  ;;  %v1950_v24 = vsel %vm5663_vm14, %v4714_v8, -inf  ;;  %vm5667_vm14 = vcmask 917248  }
 0x348   : > { %v1809_v4 = vsel %vm4138_vm9, %v1762_v22, %v1723_v26  ;;  %1607 = vmax.xlane.f32.xlu1 %v1606_v43  ;;  %v1692_v22 = vsel %vm5661_vm15, %v4714_v8, -inf  ;;  %v1864_v26 = vsel %vm5664_vm2, %v4714_v8, -inf  ;;  %vm5665_vm15 = vcmp.lt.s32.totalorder %v4016_v42, 16 }
 0x349   : > { %1521 = vmax.xlane.f32.xlu0 %v1520_v14  ;;  %v1895_v25 = vsel %vm4151_vm12, %v1848_v44, %v1809_v4  ;;  %v812_v0 = vpop.xlane.xlu1 %811  ;;  %v4752_v14 = vadd.f32 %v4294_v20, %v3604_v60  ;;  %vm5668_vm2 = vcmask 130048  }
 0x34a   : > { %v1934_v27 = vpop.xlane.xlu0 %1933 }
 0x34b   : > { %v1981_v46 = vsel %vm4167_vm13, %v1934_v27, %v1895_v25  ;;  %v2036_v25 = vsel %vm5667_vm14, %v4714_v8, -inf  ;;  %vm5671_vm14 = vcmask 654848  }
 0x34c   : > { %1779 = vmax.xlane.f32.xlu1 %v1778_v17  ;;  %v2067_v28 = vsel %vm5593_vm4, %v2020_v5, %v1981_v46 }
 0x34d   : > { %1693 = vmax.xlane.f32.xlu0 %v1692_v22  ;;  %v899_v48 = vpop.xlane.xlu1 %898  ;;  %v828_v22 = vsel %vm5668_vm2, %v4752_v14, -inf  ;;  %vm5672_vm2 = vcmp.ge.s32.totalorder %v4016_v42, 112 }
 0x34e   : > { %v2106_v15 = vpop.xlane.xlu0 %2105 }
 0x34f   : > { %v3251_v12 = vpop.eup %3250  ;;  %v2153_v44 = vsel %vm5662_vm10, %v2106_v15, %v2067_v28  ;;  %vm5666_vm10 = vcmask 1048448  }
 0x350   : > { %v2185_v19 = vsub.f32 %v4258_v3, %v2153_v44  ;;  %v4744_v49 = vmul.f32 %v3251_v12, %v4374_v9  ;;  %1951 = vmax.xlane.f32.xlu1 %v1950_v24  ;;  %v857_v3 = vsel %vm5665_vm15, %v812_v0, 0.0  ;;  %v2122_v9 = vsel %vm5666_vm10, %v4714_v8, -inf }
 0x351   : > { %1865 = vmax.xlane.f32.xlu0 %v1864_v26  ;;  %v986_v5 = vpop.xlane.xlu1 %985  ;;  %v944_v27 = vsel %vm4041_vm1, %v899_v48, %v857_v3  ;;  %vm5669_vm15 = vcmask 523648   ;;  %vm5670_vm10 = vcmask 261248   ;;  %v1176_v26 = vsel %vm5671_vm14, %v4752_v14, -inf }
 0x352   : > { %v2230_v4 = vmul.f32 1.442695, %v2185_v19  ;;  %v1160_v43 = vpop.xlane.xlu0 %1159  ;;  %v1031_v46 = vsel %vm4045_vm6, %v986_v5, %v944_v27  ;;  %v1089_v28 = vsel %vm5669_vm15, %v4752_v14, -inf  ;;  %v915_v24 = vsel %vm5670_vm10, %v4752_v14, -inf }
 0x353   : > { %vm5673_vm15 = vcmask 392448   ;;  %vm5674_vm10 = vcmask 917248   ;;  %vm5675_vm14 = vcmask 786048  }
 0x354   : > { %3252 = vpow2.f32 %v2230_v4  ;;  %2123 = vmax.xlane.f32.xlu1 %v2122_v9 }
 0x355   : > { %2037 = vmax.xlane.f32.xlu0 %v2036_v25  ;;  %v1073_v20 = vpop.xlane.xlu1 %1072 }
 0x356   : > { %v1334_v17 = vpop.xlane.xlu0 %1333  ;;  %v1118_v0 = vsel %vm4053_vm8, %v1073_v20, %v1031_v46  ;;  %v1002_v46 = vsel %vm5673_vm15, %v4752_v14, -inf  ;;  %v1350_v20 = vsel %vm5674_vm10, %v4752_v14, -inf  ;;  %vm5677_vm15 = vcmp.lt.s32.totalorder %v4072_v10, 144 }
 0x357   : > { %v1205_v48 = vsel %vm4076_vm11, %v1160_v43, %v1118_v0  ;;  %vm5678_vm10 = vcmask 130048  }
 0x358   : > { %829 = vmax.xlane.f32.xlu1 %v828_v22 }
 0x359   : > { %1090 = vmax.xlane.f32.xlu0 %v1089_v28  ;;  %v1247_v15 = vpop.xlane.xlu1 %1246 }
 0x35a   : > { %v1507_v44 = vpop.xlane.xlu0 %1506  ;;  %v1292_v19 = vsel %vm4080_vm0, %v1247_v15, %v1205_v48 }
 0x35b   : > { %v1379_v3 = vsel %vm5651_vm5, %v1334_v17, %v1292_v19  ;;  %v1553_v28 = vsel %vm5677_vm15, %v1507_v44, 0.0  ;;  %vm5679_vm5 = vcmask 261248   ;;  %vm5683_vm15 = vcmp.ge.s32.totalorder %v4072_v10, 240 }
 0x35c   : > { %916 = vmax.xlane.f32.xlu1 %v915_v24 }
 0x35d   : > { %1177 = vmax.xlane.f32.xlu0 %v1176_v26  ;;  %v1421_v5 = vpop.xlane.xlu1 %1420 }
 0x35e   : > { %v3253_v4 = vpop.eup %3252  ;;  %v1679_v9 = vpop.xlane.xlu0 %1678  ;;  %v1466_v25 = vsel %vm5672_vm2, %v1421_v5, %v1379_v3  ;;  %vm5676_vm2 = vcmask 1048448  }
 0x35f   : > { %v4781_v43 = vmul.f32 %v3253_v4, %v4404_v58  ;;  %2639 = vmatprep.mubr.f32.mxu0 %v3253_v4  ;;  %v2186_v27 = vsub.f32 %v4298_v32, %v1466_v25  ;;  %v4792_v58 = vadd.f32 %v4306_v31, %v3622_v6  ;;  %v1263_v32 = vsel %vm5675_vm14, %v4752_v14, -inf }
 0x360   : > { %2640 = vmatmul.mubr.f32.gmra.mrb[60].mxu0 %v3251_v12  ;;  %1003 = vmax.xlane.f32.xlu1 %v1002_v46  ;;  %v1437_v12 = vsel %vm5676_vm2, %v4752_v14, -inf  ;;  %vm5680_vm14 = vcmask 392448   ;;  %vm5681_vm2 = vcmask 523648  }
 0x361   : > { %1351 = vmax.xlane.f32.xlu0 %v1350_v20  ;;  %v2232_v17 = vmul.f32 1.442695, %v2186_v27  ;;  %v1593_v0 = vpop.xlane.xlu1 %1592  ;;  %v1523_v31 = vsel %vm5678_vm10, %v4792_v58, -inf  ;;  %v1609_v24 = vsel %vm5679_vm5, %v4792_v58, -inf  ;;  %v1695_v25 = vsel %vm5680_vm14, %v4792_v58, -inf }
 0x362   : > { %v1937_v22 = vpop.xlane.xlu0 %1936  ;;  %v1639_v15 = vsel %vm5534_vm3, %v1593_v0, %v1553_v28  ;;  %v1781_v27 = vsel %vm5681_vm2, %v4792_v58, -inf  ;;  %vm5682_vm5 = vcmp.lt.s32.totalorder %v4016_v42, 16  ;;  %vm5684_vm10 = vcmask 654848  }
 0x363   : > { %3254 = vpow2.f32 %v2232_v17  ;;  %v1725_v26 = vsel %vm4129_vm7, %v1679_v9, %v1639_v15  ;;  %vm5685_vm14 = vcmask 786048   ;;  %vm5686_vm2 = vcmask 917248  }
 0x364   : > { %1264 = vmax.xlane.f32.xlu1 %v1263_v32 }
 0x365   : > { %1438 = vmax.xlane.f32.xlu0 %v1437_v12  ;;  %v1765_v48 = vpop.xlane.xlu1 %1764 }
 0x366   : > { %v2109_v19 = vpop.xlane.xlu0 %2108  ;;  %v1811_v44 = vsel %vm4138_vm9, %v1765_v48, %v1725_v26  ;;  %v1867_v48 = vsel %vm5684_vm10, %v4792_v58, -inf  ;;  %vm5689_vm10 = vcmask 130048  }
 0x368   : > { %1524 = vmax.xlane.f32.xlu1 %v1523_v31  ;;  %v1953_v31 = vsel %vm5685_vm14, %v4792_v58, -inf  ;;  %vm5690_vm14 = vcmp.lt.s32.totalorder %v4072_v10, 144 }
 0x369   : > { %1610 = vmax.xlane.f32.xlu0 %v1609_v24  ;;  %v1851_v4 = vpop.xlane.xlu1 %1850 }
 0x36a   : > { %v815_v5 = vpop.xlane.xlu0 %814  ;;  %v1897_v3 = vsel %vm4151_vm12, %v1851_v4, %v1811_v44 }
 0x36b   : > { %v859_v9 = vsel %vm5682_vm5, %v815_v5, 0.0  ;;  %v1983_v17 = vsel %vm4167_vm13, %v1937_v22, %v1897_v3  ;;  %v2039_v3 = vsel %vm5686_vm2, %v4792_v58, -inf  ;;  %vm5687_vm5 = vcmask 1048448  }
 0x36c   : > { %1696 = vmax.xlane.f32.xlu1 %v1695_v25  ;;  %vm5691_vm2 = vcmask 654848  }
 0x36d   : > { %1782 = vmax.xlane.f32.xlu0 %v1781_v27  ;;  %v3255_v46 = vpop.eup %3254  ;;  %v2023_v20 = vpop.xlane.xlu1 %2022 }
 0x36e   : > { %v902_v0 = vpop.xlane.xlu0 %901  ;;  %v4821_v32 = vmul.f32 %v3255_v46, %v4426_v37  ;;  %v2069_v12 = vsel %vm5593_vm4, %v2023_v20, %v1983_v17  ;;  %v4836_v37 = vadd.f32 %v4499_v50, %v3604_v60  ;;  %v5754_v20 = vld [vmem:[#allocation17_spill] sm:$0xff] }
 0x36f   : > { %v946_v28 = vsel %vm4041_vm1, %v902_v0, %v859_v9  ;;  %v2155_v15 = vsel %vm5683_vm15, %v2109_v19, %v2069_v12  ;;  %vm5688_vm15 = vcmask 523648  }
 0x370   : > { %v2187_v22 = vsub.f32 %v4346_v39, %v2155_v15  ;;  %1868 = vmax.xlane.f32.xlu1 %v1867_v48  ;;  %v2125_v39 = vsel %vm5687_vm5, %v4792_v58, -inf  ;;  %v1092_v27 = vsel %vm5688_vm15, %v4836_v37, -inf  ;;  %v831_v9 = vsel %vm5689_vm10, %v4836_v37, -inf }
 0x371   : > { %1954 = vmax.xlane.f32.xlu0 %v1953_v31  ;;  %v1596_v24 = vpop.xlane.xlu1 %1595  ;;  %vm5692_vm5 = vcmask 261248   ;;  %vm5693_vm15 = vcmp.lt.s32.totalorder %v4016_v42, 16  ;;  %vm5694_vm10 = vcmask 1048448  }
 0x372   : > { %v989_v26 = vpop.xlane.xlu0 %988  ;;  %v2234_v44 = vmul.f32 1.442695, %v2187_v22  ;;  %v4842_v4 = vpop.f32.mrb[48].mxu0  ;;  %v918_v15 = vsel %vm5692_vm5, %v4836_v37, -inf }
 0x373   : > { %v4840_v19 = vsel %vm4045_vm6, %v989_v26, %v946_v28  ;;  %v2613_v5 = vpop.f32.mrb[49].mxu0  ;;  %v1179_v28 = vsel %vm5691_vm2, %v4836_v37, -inf  ;;  %vm5696_vm2 = vmmov %vm5692_vm5  ;;  %vm5697_vm5 = vcmask 786048  }
 0x374   : > { %3256 = vpow2.f32 %v2234_v44  ;;  %2040 = vmax.xlane.f32.xlu1 %v2039_v3  ;;  %v4872_v5 = vadd.f32 %v4503_v41, %v3622_v6 }
 0x375   : > { %2126 = vmax.xlane.f32.xlu0 %v2125_v39  ;;  %v4848_v50 = vpop.xlane.xlu1 %1767 }
 0x376   : > { %v4850_v25 = vpop.xlane.xlu0 %1075 }
 0x378   : > { %1093 = vmax.xlane.f32.xlu1 %v1092_v27 }
 0x379   : > { %832 = vmax.xlane.f32.xlu0 %v831_v9  ;;  %v818_v17 = vpop.xlane.xlu1 %817 }
 0x37a   : > { %v1510_v0 = vpop.xlane.xlu0 %1509  ;;  %v861_v31 = vsel %vm5693_vm15, %v818_v17, 0.0  ;;  %vm5698_vm15 = vcmask 523648  }
 0x37b   : > { %v1555_v12 = vsel %vm5690_vm14, %v1510_v0, 0.0  ;;  %vm5695_vm14 = vcmask 392448  }
 0x37c   : > { %v1641_v48 = vsel %vm5534_vm3, %v1596_v24, %v1555_v12  ;;  %1180 = vmax.xlane.f32.xlu1 %v1179_v28  ;;  %v1440_v24 = vsel %vm5694_vm10, %v4836_v37, -inf  ;;  %v1005_v27 = vsel %vm5695_vm14, %v4836_v37, -inf  ;;  %v1612_v28 = vsel %vm5696_vm2, %v4872_v5, -inf  ;;  %vm5700_vm14 = vmmov %vm5697_vm5 }
 0x37d   : > { %919 = vmax.xlane.f32.xlu0 %v918_v15  ;;  %v905_v22 = vpop.xlane.xlu1 %904  ;;  %v1266_v15 = vsel %vm5697_vm5, %v4836_v37, -inf  ;;  %vm5699_vm10 = vcmask 917248   ;;  %vm5701_vm2 = vcmask 130048   ;;  %vm5702_vm5 = vcmp.lt.s32.totalorder %v4016_v42, 16 }
 0x37e   : > { %v1682_v26 = vpop.xlane.xlu0 %1681  ;;  %v3257_v44 = vpop.eup %3256  ;;  %v948_v3 = vsel %vm4041_vm1, %v905_v22, %v861_v31  ;;  %v1784_v31 = vsel %vm5698_vm15, %v4872_v5, -inf  ;;  %v1353_v22 = vsel %vm5699_vm10, %v4836_v37, -inf  ;;  %vm5703_vm15 = vmmov %vm5699_vm10  ;;  %vm5704_vm10 = vcmask 392448  }
 0x37f   : > { %v4878_v39 = vsel %vm4129_vm7, %v1682_v26, %v1641_v48  ;;  %2644 = vmatprep.mubr.f32.mxu0 %v3257_v44  ;;  %v4889_v9 = vmul.f32 %v3257_v44, %v4430_v13  ;;  %v1698_v41 = vsel %vm5704_vm10, %v4872_v5, -inf  ;;  %vm5710_vm10 = vcmp.lt.s32.totalorder %v4072_v10, 144 }
 0x380   : > { %1441 = vmax.xlane.f32.xlu1 %v1440_v24  ;;  %2645 = vmatmul.mubr.f32.gmra.mrb[62].mxu0 %v3255_v46  ;;  %v1526_v24 = vsel %vm5701_vm2, %v4872_v5, -inf  ;;  %v2042_v46 = vsel %vm5703_vm15, %v4872_v5, -inf  ;;  %vm5707_vm2 = vcmask 654848   ;;  %vm5709_vm15 = vcmp.ge.s32.totalorder %v4016_v42, 112 }
 0x381   : > { %1006 = vmax.xlane.f32.xlu0 %v1005_v27  ;;  %v992_v17 = vpop.xlane.xlu1 %991 }
 0x382   : > { %v821_v0 = vpop.xlane.xlu0 %820  ;;  %v4893_v12 = vsel %vm4045_vm6, %v992_v17, %v948_v3  ;;  %v1956_v3 = vsel %vm5700_vm14, %v4872_v5, -inf  ;;  %vm5706_vm14 = vcmask 1048448  }
 0x383   : > { %v863_v27 = vsel %vm5702_vm5, %v821_v0, 0.0  ;;  %vm5708_vm5 = vnez %v5497_v34 }
 0x384   : > { %1613 = vmax.xlane.f32.xlu1 %v1612_v28 }
 0x385   : > { %1267 = vmax.xlane.f32.xlu0 %v1266_v15  ;;  %v4899_v48 = vpop.xlane.xlu1 %1078 }
 0x386   : > { %v908_v13 = vpop.xlane.xlu0 %907 }
 0x387   : > { %v950_v17 = vsel %vm4041_vm1, %v908_v13, %v863_v27 }
 0x388   : > { %1785 = vmax.xlane.f32.xlu1 %v1784_v31 }
 0x389   : > { %1354 = vmax.xlane.f32.xlu0 %v1353_v22  ;;  %v1169_v26 = vpop.xlane.xlu1 %1168 }
 0x38a   : > { %v995_v44 = vpop.xlane.xlu0 %994 }
 0x38b   : > { %v1037_v31 = vsel %vm4045_vm6, %v995_v44, %v950_v17  ;;  %v4931_v44 = vadd.f32 %v4509_v16, %v3604_v60 }
 0x38c   : > { %1957 = vmax.xlane.f32.xlu1 %v1956_v3 }
 0x38d   : > { %1527 = vmax.xlane.f32.xlu0 %v1526_v24  ;;  %v1343_v28 = vpop.xlane.xlu1 %1342 }
 0x38e   : > { %v1082_v15 = vpop.xlane.xlu0 %1081 }
 0x38f   : > { %v1124_v22 = vsel %vm4053_vm8, %v1082_v15, %v1037_v31  ;;  %v2128_v15 = vsel %vm5706_vm14, %v4872_v5, -inf  ;;  %vm5711_vm14 = vcmask 130048  }
 0x390   : > { %v4925_v0 = vpop.f32.mrb[50].mxu0  ;;  %2043 = vmax.xlane.f32.xlu1 %v2042_v46  ;;  %v1211_v24 = vsel %vm4076_vm11, %v1169_v26, %v1124_v22  ;;  %v1870_v46 = vsel %vm5707_vm2, %v4872_v5, -inf  ;;  %vm5712_vm2 = vcmask 523648  }
 0x391   : > { %5705 = vst [vmem:[#allocation24_spill] sm:$0xff] %v4925_v0  ;;  %1699 = vmax.xlane.f32.xlu0 %v1698_v41  ;;  %v2618_v3 = vpop.f32.mrb[51].mxu0  ;;  %v1430_v13 = vpop.xlane.xlu1 %1429 }
 0x392   : > { %v1256_v27 = vpop.xlane.xlu0 %1255  ;;  %v834_v3 = vsel %vm5711_vm14, %v4931_v44, -inf  ;;  %vm5715_vm14 = vcmask 392448  }
 0x393   : > { %v1298_v17 = vsel %vm4080_vm0, %v1256_v27, %v1211_v24  ;;  %v1095_v24 = vsel %vm5712_vm2, %v4931_v44, -inf  ;;  %vm5716_vm2 = vcmask 917248  }
 0x394   : > { %v1385_v41 = vsel %vm5708_vm5, %v1343_v28, %v1298_v17  ;;  %2129 = vmax.xlane.f32.xlu1 %v2128_v15 }
 0x395   : > { %1871 = vmax.xlane.f32.xlu0 %v1870_v46  ;;  %v1472_v26 = vsel %vm5709_vm15, %v1430_v13, %v1385_v41  ;;  %v1602_v31 = vpop.xlane.xlu1 %1601  ;;  %vm5713_vm15 = vcmask 261248  }
 0x396   : > { %v2192_v60 = vsub.f32 %v4468_v59, %v1472_v26  ;;  %v1516_v16 = vpop.xlane.xlu0 %1515  ;;  %v921_v15 = vsel %vm5713_vm15, %v4931_v44, -inf  ;;  %vm5717_vm15 = vcmask 786048  }
 0x397   : > { %v1559_v22 = vsel %vm5710_vm10, %v1516_v16, 0.0  ;;  %vm5714_vm10 = vcmask 654848  }
 0x398   : > { %v2244_v27 = vmul.f32 1.442695, %v2192_v60  ;;  %835 = vmax.xlane.f32.xlu1 %v834_v3  ;;  %v1645_v13 = vsel %vm5534_vm3, %v1602_v31, %v1559_v22  ;;  %v1182_v46 = vsel %vm5714_vm10, %v4931_v44, -inf  ;;  %v4962_v31 = vadd.f32 %v4519_v51, %v3622_v6 }
 0x399   : > { %1096 = vmax.xlane.f32.xlu0 %v1095_v24  ;;  %v1774_v28 = vpop.xlane.xlu1 %1773  ;;  %v1008_v22 = vsel %vm5715_vm14, %v4931_v44, -inf  ;;  %v1356_v3 = vsel %vm5716_vm2, %v4931_v44, -inf  ;;  %vm5718_vm10 = vcmask 261248   ;;  %vm5719_vm14 = vcmp.ge.s32.totalorder %v4072_v10, 240 }
 0x39a   : > { %3258 = vpow2.f32 %v2244_v27  ;;  %v1688_v17 = vpop.xlane.xlu0 %1687  ;;  %vm5720_vm2 = vcmask 1048448  }
 0x39b   : > { %v1731_v59 = vsel %vm4129_vm7, %v1688_v17, %v1645_v13  ;;  %v1269_v13 = vsel %vm5717_vm15, %v4931_v44, -inf  ;;  %v1615_v17 = vsel %vm5718_vm10, %v4962_v31, -inf  ;;  %vm5721_vm15 = vcmask 392448  }
 0x39c   : > { %922 = vmax.xlane.f32.xlu1 %v921_v15  ;;  %v1817_v26 = vsel %vm4138_vm9, %v1774_v28, %v1731_v59  ;;  %vm5722_vm10 = vcmask 130048  }
 0x39d   : > { %1183 = vmax.xlane.f32.xlu0 %v1182_v46  ;;  %v1946_v41 = vpop.xlane.xlu1 %1945 }
 0x39e   : > { %v1860_v60 = vpop.xlane.xlu0 %1859 }
 0x39f   : > { %v1903_v16 = vsel %vm4151_vm12, %v1860_v60, %v1817_v26 }
 0x3a0   : > { %1009 = vmax.xlane.f32.xlu1 %v1008_v22  ;;  %v1989_v27 = vsel %vm4167_vm13, %v1946_v41, %v1903_v16  ;;  %v1443_v22 = vsel %vm5720_vm2, %v4931_v44, -inf  ;;  %vm5725_vm2 = vcmask 654848  }
 0x3a1   : > { %1357 = vmax.xlane.f32.xlu0 %v1356_v3  ;;  %v2118_v24 = vpop.xlane.xlu1 %2117  ;;  %v1701_v3 = vsel %vm5721_vm15, %v4962_v31, -inf  ;;  %vm5726_vm15 = vcmask 786048  }
 0x3a2   : > { %v2032_v28 = vpop.xlane.xlu0 %2031 }
 0x3a3   : > { %v2075_v51 = vsel %vm5593_vm4, %v2032_v28, %v1989_v27  ;;  %vm5724_vm4 = vcmp.lt.s32.totalorder %v4016_v42, 16 }
 0x3a4   : > { %v3259_v59 = vpop.eup %3258  ;;  %v2161_v15 = vsel %vm5719_vm14, %v2118_v24, %v2075_v51  ;;  %1270 = vmax.xlane.f32.xlu1 %v1269_v13  ;;  %vm5723_vm14 = vcmask 523648  }
 0x3a5   : > { %1616 = vmax.xlane.f32.xlu0 %v1615_v17  ;;  %v2193_v46 = vsub.f32 %v4554_v63, %v2161_v15  ;;  %v824_v26 = vpop.xlane.xlu1 %823  ;;  %v4982_v41 = vmul.f32 %v3259_v59, %v4460_v47  ;;  %v1529_v63 = vsel %vm5722_vm10, %v4962_v31, -inf  ;;  %v1787_v47 = vsel %vm5723_vm14, %v4962_v31, -inf }
 0x3a6   : > { %v1085_v60 = vpop.xlane.xlu0 %1084  ;;  %v865_v28 = vsel %vm5724_vm4, %v824_v26, 0.0  ;;  %vm5728_vm4 = vcmask 1048448   ;;  %vm5729_vm10 = vcmp.ge.s32.totalorder %v4016_v42, 112  ;;  %vm5730_vm14 = vcmask 917248  }
 0x3a7   : > { %v2246_v16 = vmul.f32 1.442695, %v2193_v46 }
 0x3a8   : > { %1444 = vmax.xlane.f32.xlu1 %v1443_v22  ;;  %v1959_v22 = vsel %vm5726_vm15, %v4962_v31, -inf  ;;  %vm5733_vm15 = vcmask 654848  }
 0x3a9   : > { %1702 = vmax.xlane.f32.xlu0 %v1701_v3  ;;  %3260 = vpow2.f32 %v2246_v16  ;;  %v911_v24 = vpop.xlane.xlu1 %910  ;;  %v1873_v16 = vsel %vm5725_vm2, %v4962_v31, -inf  ;;  %vm5731_vm2 = vcmp.lt.s32.totalorder %v4072_v10, 144 }
 0x3aa   : > { %v1172_v27 = vpop.xlane.xlu0 %1171  ;;  %v952_v51 = vsel %vm4041_vm1, %v911_v24, %v865_v28 }
 0x3ac   : > { %1530 = vmax.xlane.f32.xlu1 %v1529_v63 }
 0x3ad   : > { %1788 = vmax.xlane.f32.xlu0 %v1787_v47  ;;  %v998_v13 = vpop.xlane.xlu1 %997 }
 0x3ae   : > { %v1039_v17 = vsel %vm4045_vm6, %v998_v13, %v952_v51  ;;  %v1346_v15 = vpop.xlane.xlu0 %1345  ;;  %v2131_v13 = vsel %vm5728_vm4, %v4962_v31, -inf  ;;  %vm5734_vm4 = vcmask 130048  }
 0x3af   : > { %v1126_v46 = vsel %vm4053_vm8, %v1085_v60, %v1039_v17  ;;  %v5016_v17 = vadd.f32 %v3975_v7, %v3622_v6 }
 0x3b0   : > { %1874 = vmax.xlane.f32.xlu1 %v1873_v16  ;;  %v1213_v26 = vsel %vm4076_vm11, %v1172_v27, %v1126_v46  ;;  %v2045_v46 = vsel %vm5730_vm14, %v4962_v31, -inf  ;;  %vm5737_vm14 = vmmov %vm5733_vm15 }
 0x3b1   : > { %1960 = vmax.xlane.f32.xlu0 %v1959_v22  ;;  %v1259_v3 = vpop.xlane.xlu1 %1258 }
 0x3b2   : > { %v1300_v24 = vsel %vm4080_vm0, %v1259_v3, %v1213_v26  ;;  %v1433_v63 = vpop.xlane.xlu0 %1432  ;;  %v5732_v3 = vld [vmem:[#allocation9_spill] sm:$0xff] }
 0x3b3   : > { %v5008_v47 = vpop.f32.mrb[52].mxu0  ;;  %v3261_v28 = vpop.eup %3260  ;;  %v1387_v60 = vsel %vm5708_vm5, %v1346_v15, %v1300_v24  ;;  %v1852_v24 = vsel %vm5733_vm15, %v5732_v3, -inf }
 0x3b4   : > { %5727 = vst [vmem:[#allocation25_spill] sm:$0xff] %v5008_v47  ;;  %v2623_v51 = vpop.f32.mrb[53].mxu0  ;;  %v1474_v27 = vsel %vm5729_vm10, %v1433_v63, %v1387_v60  ;;  %2659 = vmatprep.mubr.f32.mxu1 %v3261_v28  ;;  %2132 = vmax.xlane.f32.xlu1 %v2131_v13  ;;  %v5023_v16 = vmul.f32 %v3261_v28, %v4462_v40  ;;  %v1511_v63 = vsel %vm5734_vm4, %v5016_v17, -inf  ;;  %vm5735_vm10 = vcmask 261248  }
 0x3b5   : > { %v2194_v15 = vsub.f32 %v4592_v54, %v1474_v27  ;;  %2046 = vmax.xlane.f32.xlu0 %v2045_v46  ;;  %2660 = vmatmul.mubr.f32.vlgmr.msra.gmra.mrb[32].mxu1 %v3259_v59  ;;  %v1519_v22 = vpop.xlane.xlu1 %1518  ;;  %v1597_v60 = vsel %vm5735_vm10, %v5016_v17, -inf  ;;  %v5736_v51 = vld [vmem:[#allocation7_spill] sm:$0xff]  ;;  %vm5740_vm4 = vnez %v5516_v53  ;;  %vm5741_vm10 = vcmp.ge.s32.totalorder %v4072_v10, 240 }
 0x3b6   : > { %v1561_v6 = vsel %vm5731_vm2, %v1519_v22, 0.0  ;;  %v1605_v7 = vpop.xlane.xlu0 %1604  ;;  %v1161_v13 = vsel %vm5737_vm14, %v5736_v51, -inf  ;;  %vm5738_vm2 = vcmask 786048   ;;  %vm5742_vm14 = vcmask 917248  }
 0x3b7   : > { %v2248_v26 = vmul.f32 1.442695, %v2194_v15  ;;  %v1647_v40 = vsel %vm5534_vm3, %v1605_v7, %v1561_v6  ;;  %v1248_v6 = vsel %vm5738_vm2, %v5736_v51, -inf  ;;  %vm5739_vm15 = vmmov %vm5738_vm2  ;;  %vm5743_vm2 = vcmask 392448  }
 0x3b8   : > { %1853 = vmax.xlane.f32.xlu1 %v1852_v24  ;;  %v1938_v7 = vsel %vm5739_vm15, %v5732_v3, -inf  ;;  %vm5745_vm15 = vcmask 523648  }
 0x3b9   : > { %3262 = vpow2.f32 %v2248_v26  ;;  %1512 = vmax.xlane.f32.xlu0 %v1511_v63  ;;  %v1691_v54 = vpop.xlane.xlu1 %1690 }
 0x3ba   : > { %v1733_v59 = vsel %vm4129_vm7, %v1691_v54, %v1647_v40  ;;  %v1777_v28 = vpop.xlane.xlu0 %1776 }
 0x3bb   : > { %v1819_v27 = vsel %vm4138_vm9, %v1777_v28, %v1733_v59  ;;  %v2024_v28 = vsel %vm5742_vm14, %v5732_v3, -inf }
 0x3bc   : > { %1598 = vmax.xlane.f32.xlu1 %v1597_v60 }
 0x3bd   : > { %1162 = vmax.xlane.f32.xlu0 %v1161_v13  ;;  %v1863_v46 = vpop.xlane.xlu1 %1862  ;;  %v1683_v13 = vsel %vm5743_vm2, %v5016_v17, -inf }
 0x3be   : > { %v1905_v15 = vsel %vm4151_vm12, %v1863_v46, %v1819_v27  ;;  %v1949_v22 = vpop.xlane.xlu0 %1948  ;;  %v5744_v27 = vld [vmem:[#allocation16_spill] sm:$0xff] }
 0x3bf   : > { %v1991_v26 = vsel %vm4167_vm13, %v1949_v22, %v1905_v15 }
 0x3c0   : > { %1249 = vmax.xlane.f32.xlu1 %v1248_v6 }
 0x3c1   : > { %1939 = vmax.xlane.f32.xlu0 %v1938_v7  ;;  %v2035_v24 = vpop.xlane.xlu1 %2034  ;;  %v1769_v7 = vsel %vm5745_vm15, %v5016_v17, -inf  ;;  %vm5751_vm15 = vcmask 654848  }
 0x3c2   : > { %v2077_v63 = vsel %vm5740_vm4, %v2035_v24, %v1991_v26  ;;  %v2121_v40 = vpop.xlane.xlu0 %2120  ;;  %vm5749_vm4 = vcmp.lt.s32.totalorder %v4016_v42, 16 }
 0x3c3   : > { %v3263_v54 = vpop.eup %3262  ;;  %v2163_v59 = vsel %vm5741_vm10, %v2121_v40, %v2077_v63  ;;  %vm5746_vm10 = vmmov %vm5742_vm14  ;;  %vm5747_vm14 = vcmask 1048448  }
 0x3c4   : > { %v2195_v60 = vsub.f32 %v4632_v57, %v2163_v59  ;;  %2025 = vmax.xlane.f32.xlu1 %v2024_v28  ;;  %v5060_v46 = vmul.f32 %v3263_v54, %v5744_v27  ;;  %v1335_v26 = vsel %vm5746_vm10, %v5736_v51, -inf  ;;  %v1422_v63 = vsel %vm5747_vm14, %v5736_v51, -inf  ;;  %vm5748_vm2 = vmmov %vm5747_vm14 }
 0x3c5   : > { %1684 = vmax.xlane.f32.xlu0 %v1683_v13  ;;  %v1088_v15 = vpop.xlane.xlu1 %1087  ;;  %v2110_v40 = vsel %vm5748_vm2, %v5732_v3, -inf  ;;  %vm5752_vm10 = vmmov %vm5751_vm15  ;;  %vm5757_vm2 = vcmp.ge.s32.totalorder %v4016_v42, 112 }
 0x3c6   : > { %v2250_v22 = vmul.f32 1.442695, %v2195_v60  ;;  %v827_v6 = vpop.xlane.xlu0 %826 }
 0x3c7   : > { %v867_v59 = vsel %vm5749_vm4, %v827_v6, 0.0  ;;  %vm5753_vm4 = vcmask 786048  }
 0x3c8   : > { %3264 = vpow2.f32 %v2250_v22  ;;  %1770 = vmax.xlane.f32.xlu1 %v1769_v7  ;;  %v5750_v22 = vld [vmem:[#allocation11_spill] sm:$0xff]  ;;  %vm5756_vm14 = vmmov %vm5753_vm4 }
 0x3c9   : > { %1336 = vmax.xlane.f32.xlu0 %v1335_v26  ;;  %v1175_v57 = vpop.xlane.xlu1 %1174  ;;  %v1164_v7 = vsel %vm5751_vm15, %v5750_v22, -inf  ;;  %vm5758_vm15 = vcmp.lt.s32.totalorder %v4072_v10, 144 }
 0x3ca   : > { %v914_v24 = vpop.xlane.xlu0 %913 }
 0x3cb   : > { %v954_v60 = vsel %vm4041_vm1, %v914_v24, %v867_v59 }
 0x3cc   : > { %1423 = vmax.xlane.f32.xlu1 %v1422_v63  ;;  %v1855_v63 = vsel %vm5752_vm10, %v5016_v17, -inf  ;;  %vm5759_vm10 = vcmask 917248  }
 0x3cd   : > { %2111 = vmax.xlane.f32.xlu0 %v2110_v40  ;;  %v1349_v28 = vpop.xlane.xlu1 %1348 }
 0x3ce   : > { %v1001_v13 = vpop.xlane.xlu0 %1000 }
 0x3cf   : > { %v1041_v27 = vsel %vm4045_vm6, %v1001_v13, %v954_v60  ;;  %v1251_v13 = vsel %vm5753_vm4, %v5750_v22, -inf  ;;  %vm5760_vm4 = vmmov %vm5759_vm10 }
 0x3d0   : > { %v1128_v26 = vsel %vm4053_vm8, %v1088_v15, %v1041_v27  ;;  %1165 = vmax.xlane.f32.xlu1 %v1164_v7 }
 0x3d1   : > { %1856 = vmax.xlane.f32.xlu0 %v1855_v63  ;;  %v1436_v6 = vpop.xlane.xlu1 %1435  ;;  %v1215_v40 = vsel %vm4076_vm11, %v1175_v57, %v1128_v26  ;;  %v1941_v57 = vsel %vm5756_vm14, %v5016_v17, -inf  ;;  %vm5761_vm14 = vcmask 1048448  }
 0x3d2   : > { %v3265_v24 = vpop.eup %3264  ;;  %v1262_v59 = vpop.xlane.xlu0 %1261 }
 0x3d3   : > { %v1302_v60 = vsel %vm4080_vm0, %v1262_v59, %v1215_v40  ;;  %2664 = vmatprep.mubr.f32.mxu1 %v3265_v24  ;;  %v5089_v15 = vmul.f32 %v3265_v24, %v5754_v20  ;;  %v5093_v7 = vpop.f32.mrb[54].mxu0 }
 0x3d4   : > { %v1389_v27 = vsel %vm5708_vm5, %v1349_v28, %v1302_v60  ;;  %5755 = vst [vmem:[#allocation9_spill] sm:$0xff] %v5093_v7  ;;  %1252 = vmax.xlane.f32.xlu1 %v1251_v13  ;;  %2665 = vmatmul.mubr.f32.gmra.mrb[34].mxu1 %v3263_v54  ;;  %v2628_v63 = vpop.f32.mrb[55].mxu0  ;;  %v1338_v28 = vsel %vm5759_vm10, %v5750_v22, -inf  ;;  %v2027_v54 = vsel %vm5760_vm4, %v5016_v17, -inf  ;;  %vm5764_vm10 = vcmp.ge.s32.totalorder %v4072_v10, 240 }
 0x3d5   : > { %v1476_v26 = vsel %vm5757_vm2, %v1436_v6, %v1389_v27  ;;  %1942 = vmax.xlane.f32.xlu0 %v1941_v57  ;;  %v1608_v40 = vpop.xlane.xlu1 %1607  ;;  %v1425_v57 = vsel %vm5761_vm14, %v5750_v22, -inf  ;;  %vm5762_vm2 = vmmov %vm5761_vm14  ;;  %vm5766_vm4 = vcmp.lt.s32.totalorder %v4016_v42, 16  ;;  %vm5768_vm14 = vcmp.ge.s32.totalorder %v4016_v42, 112 }
 0x3d6   : > { %v2196_v59 = vsub.f32 %v4672_v30, %v1476_v26  ;;  %v1522_v20 = vpop.xlane.xlu0 %1521  ;;  %v2113_v26 = vsel %vm5762_vm2, %v5016_v17, -inf  ;;  %vm5770_vm2 = vcmp.lt.s32.totalorder %v4072_v10, 144 }
 0x3d7   : > { %v1563_v24 = vsel %vm5758_vm15, %v1522_v20, 0.0  ;;  %vm5763_vm15 = vnez %v5516_v53 }
 0x3d8   : > { %v2252_v60 = vmul.f32 1.442695, %v2196_v59  ;;  %1339 = vmax.xlane.f32.xlu1 %v1338_v28  ;;  %v1649_v6 = vsel %vm5534_vm3, %v1608_v40, %v1563_v24 }
 0x3d9   : > { %2028 = vmax.xlane.f32.xlu0 %v2027_v54  ;;  %v1780_v13 = vpop.xlane.xlu1 %1779 }
 0x3da   : > { %3266 = vpow2.f32 %v2252_v60  ;;  %v1694_v27 = vpop.xlane.xlu0 %1693 }
 0x3db   : > { %v1735_v30 = vsel %vm4129_vm7, %v1694_v27, %v1649_v6 }
 0x3dc   : > { %1426 = vmax.xlane.f32.xlu1 %v1425_v57  ;;  %v1821_v59 = vsel %vm4138_vm9, %v1780_v13, %v1735_v30  ;;  %v5765_v13 = vld [vmem:[#allocation18_spill] sm:$0xff] }
 0x3dd   : > { %2114 = vmax.xlane.f32.xlu0 %v2113_v26  ;;  %v1952_v63 = vpop.xlane.xlu1 %1951 }
 0x3de   : > { %v1866_v20 = vpop.xlane.xlu0 %1865 }
 0x3df   : > { %v1907_v40 = vsel %vm4151_vm12, %v1866_v20, %v1821_v59 }
 0x3e0   : > { %v1993_v28 = vsel %vm4167_vm13, %v1952_v63, %v1907_v40 }
 0x3e1   : > { %v2124_v24 = vpop.xlane.xlu1 %2123 }
 0x3e2   : > { %v2038_v60 = vpop.xlane.xlu0 %2037 }
 0x3e3   : > { %v2079_v54 = vsel %vm5763_vm15, %v2038_v60, %v1993_v28 }
 0x3e4   : > { %v3267_v6 = vpop.eup %3266  ;;  %v2165_v27 = vsel %vm5764_vm10, %v2124_v24, %v2079_v54 }
 0x3e5   : > { %v2197_v57 = vsub.f32 %v4714_v8, %v2165_v27  ;;  %v830_v26 = vpop.xlane.xlu1 %829  ;;  %v5126_v30 = vmul.f32 %v3267_v6, %v5765_v13 }
 0x3e6   : > { %v1091_v7 = vpop.xlane.xlu0 %1090  ;;  %v869_v63 = vsel %vm5766_vm4, %v830_v26, 0.0 }
 0x3e7   : > { %v2254_v59 = vmul.f32 1.442695, %v2197_v57 }
 0x3e9   : > { %3268 = vpow2.f32 %v2254_v59  ;;  %v917_v20 = vpop.xlane.xlu1 %916 }
 0x3ea   : > { %v1178_v47 = vpop.xlane.xlu0 %1177  ;;  %v956_v40 = vsel %vm4041_vm1, %v917_v20, %v869_v63 }
 0x3ed   : > { %v1004_v28 = vpop.xlane.xlu1 %1003 }
 0x3ee   : > { %v1043_v24 = vsel %vm4045_vm6, %v1004_v28, %v956_v40  ;;  %v1352_v8 = vpop.xlane.xlu0 %1351 }
 0x3ef   : > { %v1130_v60 = vsel %vm4053_vm8, %v1091_v7, %v1043_v24  ;;  %v5769_v7 = vld [vmem:[#allocation19_spill] sm:$0xff] }
 0x3f0   : > { %v1217_v54 = vsel %vm4076_vm11, %v1178_v47, %v1130_v60 }
 0x3f1   : > { %v1265_v27 = vpop.xlane.xlu1 %1264 }
 0x3f2   : > { %v1304_v57 = vsel %vm4080_vm0, %v1265_v27, %v1217_v54  ;;  %v1439_v13 = vpop.xlane.xlu0 %1438 }
 0x3f3   : > { %v5140_v26 = vpop.f32.mrb[56].mxu0  ;;  %v3269_v59 = vpop.eup %3268  ;;  %v1391_v20 = vsel %vm5708_vm5, %v1352_v8, %v1304_v57 }
 0x3f4   : > { %5767 = vst [vmem:[#allocation7_spill] sm:$0xff] %v5140_v26  ;;  %v2633_v63 = vpop.f32.mrb[57].mxu0  ;;  %v1478_v40 = vsel %vm5768_vm14, %v1439_v13, %v1391_v20  ;;  %2669 = vmatprep.mubr.f32.mxu1 %v3269_v59  ;;  %v5147_v28 = vmul.f32 %v3269_v59, %v5769_v7 }
 0x3f5   : > { %v2198_v47 = vsub.f32 %v4752_v14, %v1478_v40  ;;  %2670 = vmatmul.mubr.f32.gmra.mrb[36].mxu1 %v3267_v6  ;;  %v1525_v24 = vpop.xlane.xlu1 %1524 }
 0x3f6   : > { %v1565_v60 = vsel %vm5770_vm2, %v1525_v24, 0.0  ;;  %v1611_v54 = vpop.xlane.xlu0 %1610 }
 0x3f7   : > { %v2256_v27 = vmul.f32 1.442695, %v2198_v47  ;;  %v1651_v8 = vsel %vm5534_vm3, %v1611_v54, %v1565_v60 }
 0x3f9   : > { %3270 = vpow2.f32 %v2256_v27  ;;  %v1697_v57 = vpop.xlane.xlu1 %1696 }
 0x3fa   : > { %v1737_v13 = vsel %vm4129_vm7, %v1697_v57, %v1651_v8  ;;  %v1783_v20 = vpop.xlane.xlu0 %1782  ;;  %v5771_v8 = vld [vmem:[#allocation20_spill] sm:$0xff] }
 0x3fb   : > { %v1823_v59 = vsel %vm4138_vm9, %v1783_v20, %v1737_v13 }
 0x3fd   : > { %v1869_v14 = vpop.xlane.xlu1 %1868 }
 0x3fe   : > { %v1909_v6 = vsel %vm4151_vm12, %v1869_v14, %v1823_v59  ;;  %v1955_v63 = vpop.xlane.xlu0 %1954 }
 0x3ff   : > { %v1995_v40 = vsel %vm4167_vm13, %v1955_v63, %v1909_v6 }
 0x401   : > { %v2041_v7 = vpop.xlane.xlu1 %2040 }
 0x402   : > { %v2081_v47 = vsel %vm5763_vm15, %v2041_v7, %v1995_v40  ;;  %v2127_v24 = vpop.xlane.xlu0 %2126 }
 0x403   : > { %v3271_v60 = vpop.eup %3270  ;;  %v2167_v54 = vsel %vm5764_vm10, %v2127_v24, %v2081_v47 }
 0x404   : > { %v2199_v27 = vsub.f32 %v4792_v58, %v2167_v54  ;;  %v5168_v57 = vmul.f32 %v3271_v60, %v5771_v8 }
 0x405   : > { %v1094_v13 = vpop.xlane.xlu1 %1093 }
 0x406   : > { %v2258_v20 = vmul.f32 1.442695, %v2199_v27  ;;  %v833_v59 = vpop.xlane.xlu0 %832 }
 0x407   : > { %v871_v63 = vsel %vm5766_vm4, %v833_v59, 0.0 }
 0x408   : > { %3272 = vpow2.f32 %v2258_v20  ;;  %v5772_v20 = vld [vmem:[#allocation21_spill] sm:$0xff] }
 0x409   : > { %v1181_v14 = vpop.xlane.xlu1 %1180 }
 0x40a   : > { %v920_v6 = vpop.xlane.xlu0 %919 }
 0x40b   : > { %v958_v7 = vsel %vm4041_vm1, %v920_v6, %v871_v63 }
 0x40d   : > { %v1442_v40 = vpop.xlane.xlu1 %1441 }
 0x40e   : > { %v1007_v26 = vpop.xlane.xlu0 %1006 }
 0x40f   : > { %v1045_v58 = vsel %vm4045_vm6, %v1007_v26, %v958_v7 }
 0x410   : > { %v1132_v47 = vsel %vm4053_vm8, %v1094_v13, %v1045_v58 }
 0x411   : > { %v1614_v24 = vpop.xlane.xlu1 %1613  ;;  %v1219_v8 = vsel %vm4076_vm11, %v1181_v14, %v1132_v47 }
 0x412   : > { %v3273_v54 = vpop.eup %3272  ;;  %v1268_v27 = vpop.xlane.xlu0 %1267 }
 0x413   : > { %2674 = vmatprep.mubr.f32.mxu1 %v3273_v54  ;;  %v5181_v59 = vmul.f32 %v3273_v54, %v5772_v20  ;;  %v5183_v0 = vpop.f32.mrb[58].mxu0  ;;  %v1306_v26 = vsel %vm4080_vm0, %v1268_v27, %v1219_v8 }
 0x414   : > { %5773 = vst [vmem:[#allocation16_spill] sm:$0xff] %v5183_v0  ;;  %2675 = vmatmul.mubr.f32.gmra.mrb[38].mxu1 %v3271_v60  ;;  %v2638_v6 = vpop.f32.mrb[59].mxu0 }
 0x415   : > { %v1786_v63 = vpop.xlane.xlu1 %1785 }
 0x416   : > { %v1355_v7 = vpop.xlane.xlu0 %1354 }
 0x417   : > { %v1393_v13 = vsel %vm5708_vm5, %v1355_v7, %v1306_v26 }
 0x418   : > { %v1480_v58 = vsel %vm5768_vm14, %v1442_v40, %v1393_v13 }
 0x419   : > { %v2200_v14 = vsub.f32 %v4836_v37, %v1480_v58  ;;  %v1958_v47 = vpop.xlane.xlu1 %1957 }
 0x41a   : > { %v1528_v54 = vpop.xlane.xlu0 %1527 }
 0x41b   : > { %v2260_v20 = vmul.f32 1.442695, %v2200_v14  ;;  %v1567_v60 = vsel %vm5770_vm2, %v1528_v54, 0.0 }
 0x41c   : > { %v1653_v27 = vsel %vm5534_vm3, %v1614_v24, %v1567_v60 }
 0x41d   : > { %3274 = vpow2.f32 %v2260_v20  ;;  %v2044_v6 = vpop.xlane.xlu1 %2043 }
 0x41e   : > { %v1700_v8 = vpop.xlane.xlu0 %1699 }
 0x41f   : > { %v1739_v26 = vsel %vm4129_vm7, %v1700_v8, %v1653_v27  ;;  %v5774_v8 = vld [vmem:[#allocation22_spill] sm:$0xff] }
 0x420   : > { %v1825_v40 = vsel %vm4138_vm9, %v1786_v63, %v1739_v26 }
 0x421   : > { %v2130_v7 = vpop.xlane.xlu1 %2129 }
 0x422   : > { %v1872_v37 = vpop.xlane.xlu0 %1871 }
 0x423   : > { %v1911_v13 = vsel %vm4151_vm12, %v1872_v37, %v1825_v40 }
 0x424   : > { %v1997_v58 = vsel %vm4167_vm13, %v1958_v47, %v1911_v13 }
 0x425   : > { %v2083_v14 = vsel %vm5763_vm15, %v2044_v6, %v1997_v58  ;;  %v836_v54 = vpop.xlane.xlu1 %835 }
 0x426   : > { %v2169_v24 = vsel %vm5764_vm10, %v2130_v7, %v2083_v14  ;;  %v1097_v20 = vpop.xlane.xlu0 %1096  ;;  %v873_v47 = vsel %vm5766_vm4, %v836_v54, 0.0 }
 0x427   : > { %v3275_v60 = vpop.eup %3274  ;;  %v2201_v27 = vsub.f32 %v4872_v5, %v2169_v24 }
 0x428   : > { %v5210_v63 = vmul.f32 %v3275_v60, %v5774_v8 }
 0x429   : > { %v2262_v26 = vmul.f32 1.442695, %v2201_v27  ;;  %v923_v0 = vpop.xlane.xlu1 %922 }
 0x42a   : > { %v1184_v40 = vpop.xlane.xlu0 %1183  ;;  %v960_v6 = vsel %vm4041_vm1, %v923_v0, %v873_v47  ;;  %v5776_v47 = vld [vmem:[#allocation23_spill] sm:$0xff]  ;;  %vm5777_vm1 = vmmov %vm5770_vm2 }
 0x42b   : > { %3276 = vpow2.f32 %v2262_v26  ;;  %vm5788_vm4 = vmmov %vm5777_vm1 }
 0x42d   : > { %v1010_v37 = vpop.xlane.xlu1 %1009 }
 0x42e   : > { %v1047_v7 = vsel %vm4045_vm6, %v1010_v37, %v960_v6  ;;  %v1358_v13 = vpop.xlane.xlu0 %1357  ;;  %vm5775_vm6 = vmmov %vm5768_vm14 }
 0x42f   : > { %v1134_v5 = vsel %vm4053_vm8, %v1097_v20, %v1047_v7  ;;  %vm5778_vm14 = vmmov %vm5764_vm10 }
 0x430   : > { %v1221_v58 = vsel %vm4076_vm11, %v1184_v40, %v1134_v5  ;;  %vm5783_vm2 = vmmov %vm5775_vm6 }
 0x431   : > { %v1271_v14 = vpop.xlane.xlu1 %1270 }
 0x432   : > { %v1308_v24 = vsel %vm4080_vm0, %v1271_v14, %v1221_v58  ;;  %v1617_v27 = vpop.xlane.xlu0 %1616 }
 0x433   : > { %v5224_v54 = vpop.f32.mrb[60].mxu0  ;;  %v1395_v29 = vsel %vm5708_vm5, %v1358_v13, %v1308_v24 }
 0x434   : > { %v2643_v55 = vpop.f32.mrb[61].mxu0 }
 0x435   : > { %v3277_v0 = vpop.eup %3276  ;;  %v1445_v8 = vpop.xlane.xlu1 %1444 }
 0x436   : > { %v1482_v26 = vsel %vm5775_vm6, %v1445_v8, %v1395_v29  ;;  %2679 = vmatprep.mubr.f32.mxu1 %v3277_v0  ;;  %v1703_v20 = vpop.xlane.xlu0 %1702  ;;  %v5231_v40 = vmul.f32 %v3277_v0, %v5776_v47 }
 0x437   : > { %v2202_v6 = vsub.f32 %v4931_v44, %v1482_v26  ;;  %2680 = vmatmul.mubr.f32.gmra.mrb[40].mxu1 %v3275_v60 }
 0x439   : > { %v2264_v37 = vmul.f32 1.442695, %v2202_v6  ;;  %v1531_v7 = vpop.xlane.xlu1 %1530 }
 0x43a   : > { %v1569_v5 = vsel %vm5777_vm1, %v1531_v7, 0.0  ;;  %v1789_v58 = vpop.xlane.xlu0 %1788 }
 0x43b   : > { %3278 = vpow2.f32 %v2264_v37  ;;  %v1655_v13 = vsel %vm5534_vm3, %v1617_v27, %v1569_v5 }
 0x43c   : > { %v1741_v14 = vsel %vm4129_vm7, %v1703_v20, %v1655_v13 }
 0x43d   : > { %v1827_v24 = vsel %vm4138_vm9, %v1789_v58, %v1741_v14  ;;  %v1875_v55 = vpop.xlane.xlu1 %1874 }
 0x43e   : > { %v1961_v0 = vpop.xlane.xlu0 %1960  ;;  %v1913_v44 = vsel %vm4151_vm12, %v1875_v55, %v1827_v24 }
 0x43f   : > { %v1999_v8 = vsel %vm4167_vm13, %v1961_v0, %v1913_v44 }
 0x441   : > { %v2133_v60 = vpop.xlane.xlu1 %2132 }
 0x442   : > { %v2047_v29 = vpop.xlane.xlu0 %2046 }
 0x443   : > { %v2085_v26 = vsel %vm5763_vm15, %v2047_v29, %v1999_v8 }
 0x444   : > { %v2171_v27 = vsel %vm5778_vm14, %v2133_v60, %v2085_v26 }
 0x445   : > { %v3279_v20 = vpop.eup %3278  ;;  %v2203_v47 = vsub.f32 %v4962_v31, %v2171_v27  ;;  %v1854_v6 = vpop.xlane.xlu1 %1853  ;;  %v5780_v27 = vsel %vm4053_vm8, %v4850_v25, %v4840_v19  ;;  %v5782_v25 = vld [vmem:[#allocation2_spill] sm:$0xff] }
 0x446   : > { %v1513_v37 = vpop.xlane.xlu0 %1512  ;;  %v5252_v7 = vmul.f32 %v3279_v20, %v4523_v23  ;;  %v5779_v23 = vld [vmem:[#allocation3_spill] sm:$0xff] }
 0x447   : > { %v2266_v5 = vmul.f32 1.442695, %v2203_v47 }
 0x449   : > { %3280 = vpow2.f32 %v2266_v5  ;;  %v1599_v58 = vpop.xlane.xlu1 %1598 }
 0x44a   : > { %v1163_v13 = vpop.xlane.xlu0 %1162 }
 0x44b   : > { %v1207_v47 = vsel %vm4076_vm11, %v1163_v13, %v5780_v27  ;;  %v5785_v27 = vld [vmem:[#allocation4_spill] sm:$0xff] }
 0x44d   : > { %v1250_v14 = vpop.xlane.xlu1 %1249 }
 0x44e   : > { %v1940_v24 = vpop.xlane.xlu0 %1939  ;;  %v1294_v5 = vsel %vm4080_vm0, %v1250_v14, %v1207_v47 }
 0x451   : > { %v2026_v55 = vpop.xlane.xlu1 %2025 }
 0x452   : > { %v1685_v0 = vpop.xlane.xlu0 %1684 }
 0x453   : > { %v3281_v44 = vpop.eup %3280  ;;  %v5254_v8 = vpop.f32.mrb[62].mxu0 }
 0x454   : > { %2684 = vmatprep.mubr.f32.mxu1 %v3281_v44  ;;  %v5257_v60 = vmul.f32 %v3281_v44, %v4529_v45  ;;  %v2648_v31 = vpop.f32.mrb[63].mxu0  ;;  %v5781_v45 = vsel %vm4138_vm9, %v4848_v50, %v4878_v39  ;;  %v5784_v39 = vld [vmem:[#allocation5_spill] sm:$0xff] }
 0x455   : > { %2685 = vmatmul.mubr.f32.gmra.mrb[42].mxu1 %v3279_v20  ;;  %v1771_v29 = vpop.xlane.xlu1 %1770  ;;  %v1899_v20 = vsel %vm4151_vm12, %v1854_v6, %v5781_v45 }
 0x456   : > { %2689 = vmatprep.mubr.f32.mxu1 %v5779_v23  ;;  %v1337_v26 = vpop.xlane.xlu0 %1336  ;;  %v1985_v44 = vsel %vm4167_vm13, %v1940_v24, %v1899_v20  ;;  %v5786_v20 = vld [vmem:[#allocation8_spill] sm:$0xff] }
 0x457   : > { %v1381_v19 = vsel %vm5708_vm5, %v1337_v26, %v1294_v5  ;;  %v2071_v31 = vsel %vm5763_vm15, %v2026_v55, %v1985_v44  ;;  %v5787_v5 = vld [vmem:[#allocation6_spill] sm:$0xff] }
 0x459   : > { %2690 = vmatmul.mubr.f32.gmra.mrb[44].mxu1 %v5782_v25  ;;  %v1424_v13 = vpop.xlane.xlu1 %1423  ;;  %v5789_v25 = vld [vmem:[#allocation15_spill] sm:$0xff] }
 0x45a   : > { %v1468_v50 = vsel %vm5783_vm2, %v1424_v13, %v1381_v19  ;;  %2694 = vmatprep.mubr.f32.mxu1 %v5784_v39  ;;  %v2112_v6 = vpop.xlane.xlu0 %2111  ;;  %v1557_v19 = vsel %vm5788_vm4, %v1513_v37, 0.0 }
 0x45b   : > { %v2188_v14 = vsub.f32 %v5736_v51, %v1468_v50  ;;  %v2157_v24 = vsel %vm5764_vm10, %v2112_v6, %v2071_v31 }
 0x45c   : > { %v2189_v23 = vsub.f32 %v5732_v3, %v2157_v24  ;;  %v1643_v3 = vsel %vm5534_vm3, %v1599_v58, %v1557_v19  ;;  %v5800_v24 = vld [vmem:[#allocation7_spill] sm:$0xff] }
 0x45d   : > { %v2236_v26 = vmul.f32 1.442695, %v2188_v14  ;;  %2695 = vmatmul.mubr.f32.gmra.mrb[46].mxu1 %v5785_v27  ;;  %v1166_v47 = vpop.xlane.xlu1 %1165  ;;  %v1729_v31 = vsel %vm4129_vm7, %v1685_v0, %v1643_v3  ;;  %v5796_v14 = vld [vmem:[#allocation14_spill] sm:$0xff] }
 0x45e   : > { %v2238_v45 = vmul.f32 1.442695, %v2189_v23  ;;  %2699 = vmatprep.mubr.f32.mxu1 %v5786_v20  ;;  %v1857_v55 = vpop.xlane.xlu0 %1856  ;;  %v1815_v39 = vsel %vm4138_vm9, %v1771_v29, %v1729_v31  ;;  %v3322_v31 = vld [vmem:[%s3538_s10] sm:$0xff] }
 0x45f   : > { %3282 = vpow2.f32 %v2236_v26  ;;  %v1901_v37 = vsel %vm4151_vm12, %v1857_v55, %v1815_v39 }
 0x460   : > { %3284 = vpow2.f32 %v2238_v45  ;;  %v5801_v45 = vld [vmem:[#allocation16_spill] sm:$0xff] }
 0x461   : > { %2700 = vmatmul.mubr.f32.gmra.mrb[48].mxu1 %v5787_v5  ;;  %v1253_v44 = vpop.xlane.xlu1 %1252 }
 0x462   : > { %2704 = vmatprep.mubr.f32.mxu1 %v4542_v1  ;;  %v1943_v51 = vpop.xlane.xlu0 %1942  ;;  %v5790_v1 = vsel %vm4053_vm8, %v4899_v48, %v4893_v12  ;;  %vm5791_vm8 = vmmov %vm5783_vm2  ;;  %v5792_v48 = vld [vmem:[#allocation10_spill] sm:$0xff] }
 0x463   : > { %v1209_v33 = vsel %vm4076_vm11, %v1166_v47, %v5790_v1  ;;  %vm5802_vm11 = vcmask 130048  }
 0x464   : > { %v1296_v61 = vsel %vm4080_vm0, %v1253_v44, %v1209_v33  ;;  %vm5793_vm0 = vmmov %vm5764_vm10 }
 0x465   : > { %2705 = vmatmul.mubr.f32.gmra.mrb[50].mxu1 %v5789_v25  ;;  %v1340_v13 = vpop.xlane.xlu1 %1339  ;;  %vm5803_vm9 = vmmov %vm5802_vm11 }
 0x466   : > { %2709 = vmatprep.mubr.f32.mxu1 %v4621_v52  ;;  %v2029_v50 = vpop.xlane.xlu0 %2028  ;;  %v1987_v52 = vsel %vm4167_vm13, %v1943_v51, %v1901_v37  ;;  %v1383_v38 = vsel %vm5708_vm5, %v1340_v13, %v1296_v61  ;;  %vm5804_vm7 = vmmov %vm5803_vm9 }
 0x467   : > { %v2073_v21 = vsel %vm5763_vm15, %v2029_v50, %v1987_v52  ;;  %vm5805_vm12 = vmmov %vm5804_vm7 }
 0x468   : > { %vm5806_vm13 = vmmov %vm5804_vm7 }
 0x469   : > { %v3283_v58 = vpop.eup %3282  ;;  %2710 = vmatmul.mubr.f32.gmra.mrb[52].mxu1 %v4584_v56  ;;  %v1427_v62 = vpop.xlane.xlu1 %1426  ;;  %v5794_v56 = vld [vmem:[#allocation12_spill] sm:$0xff]  ;;  %vm5807_vm3 = vmmov %vm5804_vm7 }
 0x46a   : > { %v3285_v12 = vpop.eup %3284  ;;  %v1470_v2 = vsel %vm5791_vm8, %v1427_v62, %v1383_v38  ;;  %2714 = vmatprep.mubr.f32.mxu1 %v4703_v35  ;;  %v2115_v11 = vpop.xlane.xlu0 %2114  ;;  %v2497_v0 = vmul.f32 %v3283_v58, %v5792_v48  ;;  %v3323_v62 = vld [vmem:[%s3538_s10 + $0x8] sm:$0xff]  ;;  %vm5808_vm5 = vmmov %vm5807_vm3 }
 0x46b   : > { %v2190_v36 = vsub.f32 %v5750_v22, %v1470_v2  ;;  %v2159_v34 = vsel %vm5793_vm0, %v2115_v11, %v2073_v21  ;;  %2649 = vmatprep.mubr.f32.mxu0 %v3285_v12  ;;  %v2498_v29 = vmul.f32 %v3285_v12, %v5794_v56  ;;  %vm5809_vm15 = vmmov %vm5807_vm3 }
 0x46c   : > { %v2191_v6 = vsub.f32 %v5016_v17, %v2159_v34  ;;  %2650 = vmatmul.mubr.f32.gmra.mrb[64].mxu0 %v3283_v58  ;;  %v5795_v17 = vld [vmem:[#allocation13_spill] sm:$0xff]  ;;  %v3324_v34 = vld [vmem:[%s3538_s10 + $0x10] sm:$0xff]  ;;  %vm5810_vm6 = vmmov %vm5807_vm3 }
 0x46d   : > { %v2240_v53 = vmul.f32 1.442695, %v2190_v36  ;;  %2715 = vmatmul.mubr.f32.gmra.mrb[54].mxu1 %v4659_v18  ;;  %vm5811_vm1 = vmmov %vm5807_vm3 }
 0x46e   : > { %v2242_v42 = vmul.f32 1.442695, %v2191_v6  ;;  %2719 = vmatprep.mubr.f32.mxu1 %v4781_v43  ;;  %vm5812_vm14 = vmmov %vm5811_vm1 }
 0x46f   : > { %3286 = vpow2.f32 %v2240_v53  ;;  %vm5813_vm2 = vmmov %vm5811_vm1 }
 0x470   : > { %3288 = vpow2.f32 %v2242_v42  ;;  %vm5814_vm10 = vmmov %vm5811_vm1 }
 0x471   : > { %2720 = vmatmul.mubr.f32.gmra.mrb[56].mxu1 %v4744_v49  ;;  %3290 = vrcp.f32 %v4842_v4  ;;  %vm5815_vm4 = vmmov %vm5811_vm1 }
 0x472   : > { %2724 = vmatprep.mubr.f32.mxu1 %v4889_v9  ;;  %vm5816_vm8 = vmmov %vm5811_vm1 }
 0x473   : > { %vm5817_vm0 = vmmov %vm5811_vm1 }
 0x475   : > { %2725 = vmatmul.mubr.f32.gmra.mrb[58].mxu1 %v4821_v32 }
 0x476   : > { %2729 = vmatprep.mubr.f32.mxu1 %v2498_v29 }
 0x479   : > { %v3287_v10 = vpop.eup %3286  ;;  %2730 = vmatmul.mubr.f32.gmra.mrb[60].mxu1 %v2497_v0 }
 0x47a   : > { %v3289_v35 = vpop.eup %3288  ;;  %v2499_v22 = vmul.f32 %v3287_v10, %v5795_v17 }
 0x47b   : > { %2654 = vmatprep.mubr.f32.mxu0 %v3289_v35  ;;  %v2500_v18 = vmul.f32 %v3289_v35, %v5796_v14 }
 0x47c   : > { %2655 = vmatmul.mubr.f32.gmra.mrb[66].mxu0 %v3287_v10 }
 0x47d   : > { %2734 = vmatprep.mubr.f32.mxu1 %v2500_v18 }
 0x47e   : > { %2735 = vmatmul.mubr.f32.gmra.mrb[62].mxu1 %v2499_v22  ;;  %v3325_v22 = vld [vmem:[%s3538_s10 + $0x18] sm:$0xff] }
 0x47f   : > { %2739 = vmatprep.mubr.f32.mxu1 %v5023_v16 }
 0x482   : > { %2740 = vmatmul.mubr.f32.gmra.mrb[64].mxu1 %v4982_v41 }
 0x483   : > { %2744 = vmatprep.mubr.f32.mxu1 %v5089_v15 }
 0x486   : > { %2745 = vmatmul.mubr.f32.gmra.mrb[66].mxu1 %v5060_v46 }
 0x487   : > { %2749 = vmatprep.mubr.f32.mxu1 %v5147_v28 }
 0x488   : > { %v5343_v49 = vpop.f32.mrb[32].mxu1 }
 0x489   : > { %v2663_v43 = vpop.f32.mrb[33].mxu1 }
 0x48a   : > { %2750 = vmatmul.mubr.f32.gmra.mrb[68].mxu1 %v5126_v30 }
 0x48b   : > { %2754 = vmatprep.mubr.f32.mxu1 %v5181_v59  ;;  %v5798_v59 = vld [vmem:[#allocation25_spill] sm:$0xff] }
 0x48e   : > { %2755 = vmatmul.mubr.f32.gmra.mrb[70].mxu1 %v5168_v57  ;;  %v5797_v57 = vld [vmem:[#allocation24_spill] sm:$0xff] }
 0x48f   : > { %2759 = vmatprep.mubr.f32.mxu1 %v5231_v40  ;;  %3292 = vrcp.f32 %v5797_v57  ;;  %v5799_v40 = vld [vmem:[#allocation9_spill] sm:$0xff] }
 0x490   : > { %3294 = vrcp.f32 %v5798_v59 }
 0x491   : > { %3296 = vrcp.f32 %v5799_v40 }
 0x492   : > { %2760 = vmatmul.mubr.f32.gmra.mrb[72].mxu1 %v5210_v63  ;;  %v3291_v63 = vpop.eup %3290  ;;  %3298 = vrcp.f32 %v5800_v24 }
 0x493   : > { %2764 = vmatprep.mubr.f32.mxu1 %v5257_v60  ;;  %3300 = vrcp.f32 %v5801_v45 }
 0x494   : > { %3302 = vrcp.f32 %v5224_v54 }
 0x495   : > { %3304 = vrcp.f32 %v5254_v8 }
 0x496   : > { %2765 = vmatmul.mubr.f32.gmra.mrb[74].mxu1 %v5252_v7  ;;  %v2786_v7 = vmul.f32 %v3291_v63, %v4842_v4  ;;  %3306 = vrcp.f32 %v5343_v49 }
 0x498   : > { %v2802_v23 = vsub.f32 2.0, %v2786_v7 }
 0x499   : > { %v3293_v60 = vpop.eup %3292 }
 0x49a   : > { %v2787_v26 = vmul.f32 %v3293_v60, %v5797_v57  ;;  %v3295_v27 = vpop.eup %3294  ;;  %v2818_v44 = vmul.f32 %v3291_v63, %v2802_v23  ;;  %v3326_v63 = vld [vmem:[%s3538_s10 + $0x20] sm:$0xff] }
 0x49b   : > { %v2788_v5 = vmul.f32 %v3295_v27, %v5798_v59  ;;  %v3297_v51 = vpop.eup %3296 }
 0x49c   : > { %v2803_v55 = vsub.f32 2.0, %v2787_v26  ;;  %v2789_v13 = vmul.f32 %v3297_v51, %v5799_v40  ;;  %v3299_v1 = vpop.eup %3298 }
 0x49d   : > { %v2804_v25 = vsub.f32 2.0, %v2788_v5  ;;  %v3301_v58 = vpop.eup %3300  ;;  %v2790_v38 = vmul.f32 %v3299_v1, %v5800_v24 }
 0x49e   : > { %v2819_v39 = vmul.f32 %v3293_v60, %v2803_v55  ;;  %v2805_v52 = vsub.f32 2.0, %v2789_v13  ;;  %v2791_v0 = vmul.f32 %v3301_v58, %v5801_v45  ;;  %v3303_v6 = vpop.eup %3302 }
 0x49f   : > { %v2820_v21 = vmul.f32 %v3295_v27, %v2804_v25  ;;  %v2806_v36 = vsub.f32 2.0, %v2790_v38  ;;  %v2792_v17 = vmul.f32 %v3303_v6, %v5224_v54  ;;  %v3305_v43 = vpop.eup %3304  ;;  %v3327_v27 = vld [vmem:[%s3538_s10 + $0x28] sm:$0xff] }
 0x4a0   : > { %v2821_v29 = vmul.f32 %v3297_v51, %v2805_v52  ;;  %v2807_v35 = vsub.f32 2.0, %v2791_v0  ;;  %v2793_v59 = vmul.f32 %v3305_v43, %v5254_v8 }
 0x4a1   : > { %v2822_v18 = vmul.f32 %v3299_v1, %v2806_v36  ;;  %v2808_v57 = vsub.f32 2.0, %v2792_v17  ;;  %v3330_v36 = vld [vmem:[%s3538_s10 + $0x40] sm:$0xff] }
 0x4a2   : > { %v2809_v26 = vsub.f32 2.0, %v2793_v59 }
 0x4a3   : > { %v2824_v45 = vmul.f32 %v3303_v6, %v2808_v57 }
 0x4a7   : > { %v5352_v32 = vpop.f32.mrb[34].mxu1 }
 0x4a8   : > { %v2668_v9 = vpop.f32.mrb[35].mxu1 }
 0x4c8   : > { %v5354_v41 = vpop.f32.mrb[36].mxu1 }
 0x4c9   : > { %v2673_v16 = vpop.f32.mrb[37].mxu1 }
 0x4e7   : > { %v5356_v46 = vpop.f32.mrb[38].mxu1 }
 0x4e8   : > { %v2678_v15 = vpop.f32.mrb[39].mxu1 }
 0x50a   : > { %v5358_v30 = vpop.f32.mrb[40].mxu1 }
 0x50b   : > { %v2683_v28 = vpop.f32.mrb[41].mxu1 }
 0x50c   : > { %v2823_v28 = vmul.f32 %v3301_v58, %v2807_v35 }
 0x528   : > { %v5367_v47 = vpop.f32.mrb[42].mxu1 }
 0x529   : > { %v2688_v20 = vpop.f32.mrb[43].mxu1 }
 0x52c   : > { %v2691_v4 = vpop.f32.mrb[44].mxu1 }
 0x52d   : > { %v2834_v19 = vmul.f32 %v2818_v44, %v2691_v4  ;;  %v2693_v3 = vpop.f32.mrb[45].mxu1  ;;  %v3328_v44 = vld [vmem:[%s3538_s10 + $0x30] sm:$0xff]  ;;  %v2825_v4 = vmul.f32 %v3305_v43, %v2809_v26 }
 0x52e   : > { %v3307_v3 = vpop.eup %3306 }
 0x52f   : > { %v2850_v50 = vadd.f32 %v3322_v31, %v2834_v19 }
 0x530   : > { %v2696_v33 = vpop.f32.mrb[46].mxu1 }
 0x531   : > { %2866 = vst.msk [vmem:[%s5375_s21] sm:$0xff] %vm5802_vm11, %v2850_v50  ;;  %v2835_v37 = vmul.f32 %v2819_v39, %v2696_v33  ;;  %v2698_v61 = vpop.f32.mrb[47].mxu1  ;;  %v3329_v39 = vld [vmem:[%s3538_s10 + $0x38] sm:$0xff]  ;;  %v2796_v33 = vmul.f32 %v3307_v3, %v5343_v49 }
 0x533   : > { %v2851_v12 = vadd.f32 %v3323_v62, %v2835_v37 }
 0x534   : > { %v2701_v2 = vpop.f32.mrb[48].mxu1 }
 0x535   : > { %2867 = vst.msk [vmem:[%s5375_s21 + $0x8] sm:$0xff] %vm5803_vm9, %v2851_v12  ;;  %v2836_v11 = vmul.f32 %v2820_v21, %v2701_v2  ;;  %v2703_v48 = vpop.f32.mrb[49].mxu1  ;;  %v2812_v12 = vsub.f32 2.0, %v2796_v33 }
 0x537   : > { %v2852_v56 = vadd.f32 %v3324_v34, %v2836_v11  ;;  %v2828_v6 = vmul.f32 %v3307_v3, %v2812_v12 }
 0x538   : > { %v2706_v53 = vpop.f32.mrb[50].mxu1 }
 0x539   : > { %2868 = vst.msk [vmem:[%s5375_s21 + $0x10] sm:$0xff] %vm5804_vm7, %v2852_v56  ;;  %v2837_v42 = vmul.f32 %v2821_v29, %v2706_v53  ;;  %v2708_v10 = vpop.f32.mrb[51].mxu1 }
 0x53b   : > { %v2853_v14 = vadd.f32 %v3325_v22, %v2837_v42  ;;  %v3331_v22 = vld [vmem:[%s3538_s10 + $0x50] sm:$0xff] }
 0x53c   : > { %v2711_v9 = vpop.f32.mrb[52].mxu1 }
 0x53d   : > { %2869 = vst.msk [vmem:[%s5375_s21 + $0x18] sm:$0xff] %vm5805_vm12, %v2853_v14  ;;  %v2838_v16 = vmul.f32 %v2822_v18, %v2711_v9  ;;  %v2713_v15 = vpop.f32.mrb[53].mxu1 }
 0x53f   : > { %v2854_v54 = vadd.f32 %v3326_v63, %v2838_v16  ;;  %v2651_v40 = vpop.f32.mrb[64].mxu0  ;;  %v3332_v63 = vld [vmem:[%s3538_s10 + $0x58] sm:$0xff] }
 0x540   : > { %3308 = vrcp.f32 %v2651_v40  ;;  %v2653_v7 = vpop.f32.mrb[65].mxu0  ;;  %v2716_v60 = vpop.f32.mrb[54].mxu1 }
 0x541   : > { %2870 = vst.msk [vmem:[%s5375_s21 + $0x20] sm:$0xff] %vm5806_vm13, %v2854_v54  ;;  %v2839_v24 = vmul.f32 %v2823_v28, %v2716_v60  ;;  %v2718_v23 = vpop.f32.mrb[55].mxu1  ;;  %3310 = vrcp.f32 %v5352_v32 }
 0x542   : > { %3312 = vrcp.f32 %v5354_v41 }
 0x543   : > { %v2855_v8 = vadd.f32 %v3327_v27, %v2839_v24  ;;  %3314 = vrcp.f32 %v5356_v46 }
 0x544   : > { %v2721_v20 = vpop.f32.mrb[56].mxu1  ;;  %3316 = vrcp.f32 %v5358_v30 }
 0x545   : > { %2871 = vst.msk [vmem:[%s5375_s21 + $0x28] sm:$0xff] %vm5807_vm3, %v2855_v8  ;;  %v2840_v55 = vmul.f32 %v2824_v45, %v2721_v20  ;;  %v2723_v5 = vpop.f32.mrb[57].mxu1  ;;  %v3333_v45 = vld [vmem:[%s3538_s10 + $0x60] sm:$0xff] }
 0x547   : > { %v2856_v51 = vadd.f32 %v3328_v44, %v2840_v55 }
 0x548   : > { %v2726_v19 = vpop.f32.mrb[58].mxu1 }
 0x549   : > { %2872 = vst.msk [vmem:[%s5375_s21 + $0x30] sm:$0xff] %vm5808_vm5, %v2856_v51  ;;  %v2841_v25 = vmul.f32 %v2825_v4, %v2726_v19  ;;  %v2728_v13 = vpop.f32.mrb[59].mxu1  ;;  %v3334_v4 = vld [vmem:[%s3538_s10 + $0x48] sm:$0xff] }
 0x54a   : > { %v3309_v31 = vpop.eup %3308 }
 0x54b   : > { %v2794_v50 = vmul.f32 %v3309_v31, %v2651_v40  ;;  %v2857_v1 = vadd.f32 %v3329_v39, %v2841_v25  ;;  %v3311_v61 = vpop.eup %3310  ;;  %v3335_v25 = vld [vmem:[%s3538_s10 + $0x68] sm:$0xff] }
 0x54c   : > { %v2731_v37 = vpop.f32.mrb[60].mxu1  ;;  %v2797_v21 = vmul.f32 %v3311_v61, %v5352_v32  ;;  %v3313_v11 = vpop.eup %3312 }
 0x54d   : > { %v2810_v58 = vsub.f32 2.0, %v2794_v50  ;;  %2873 = vst.msk [vmem:[%s5375_s21 + $0x38] sm:$0xff] %vm5809_vm15, %v2857_v1  ;;  %v2733_v52 = vpop.f32.mrb[61].mxu1  ;;  %v2798_v29 = vmul.f32 %v3313_v11, %v5354_v41  ;;  %v3315_v53 = vpop.eup %3314  ;;  %v3336_v1 = vld [vmem:[%s3538_s10 + $0x70] sm:$0xff] }
 0x54e   : > { %v2813_v56 = vsub.f32 2.0, %v2797_v21  ;;  %v2799_v17 = vmul.f32 %v3315_v53, %v5356_v46  ;;  %v3317_v43 = vpop.eup %3316 }
 0x54f   : > { %v2826_v38 = vmul.f32 %v3309_v31, %v2810_v58  ;;  %v2656_v62 = vpop.f32.mrb[66].mxu0  ;;  %v2814_v35 = vsub.f32 2.0, %v2798_v29  ;;  %v2800_v59 = vmul.f32 %v3317_v43, %v5358_v30 }
 0x550   : > { %3318 = vrcp.f32 %v2656_v62  ;;  %v2658_v2 = vpop.f32.mrb[67].mxu0  ;;  %v2829_v18 = vmul.f32 %v3311_v61, %v2813_v56  ;;  %v2815_v57 = vsub.f32 2.0, %v2799_v17 }
 0x551   : > { %v2842_v48 = vmul.f32 %v2826_v38, %v2731_v37  ;;  %v2736_v49 = vpop.f32.mrb[62].mxu1  ;;  %3320 = vrcp.f32 %v5367_v47  ;;  %v2830_v46 = vmul.f32 %v3313_v11, %v2814_v35  ;;  %v2816_v27 = vsub.f32 2.0, %v2800_v59  ;;  %v3337_v38 = vld [vmem:[%s3538_s10 + $0x78] sm:$0xff] }
 0x552   : > { %v2738_v0 = vpop.f32.mrb[63].mxu1  ;;  %v2831_v20 = vmul.f32 %v3315_v53, %v2815_v57 }
 0x553   : > { %v2858_v34 = vadd.f32 %v3330_v36, %v2842_v48 }
 0x555   : > { %2874 = vst.msk [vmem:[%s5375_s21 + $0x40] sm:$0xff] %vm5810_vm6, %v2858_v34  ;;  %v2741_v32 = vpop.f32.mrb[64].mxu1 }
 0x556   : > { %v2844_v42 = vmul.f32 %v2828_v6, %v2741_v32  ;;  %v2743_v10 = vpop.f32.mrb[65].mxu1 }
 0x558   : > { %v2860_v14 = vadd.f32 %v3331_v22, %v2844_v42 }
 0x559   : > { %v2746_v9 = vpop.f32.mrb[66].mxu1 }
 0x55a   : > { %v3319_v16 = vpop.eup %3318  ;;  %2876 = vst.msk [vmem:[%s5375_s21 + $0x50] sm:$0xff] %vm5811_vm1, %v2860_v14  ;;  %v2845_v41 = vmul.f32 %v2829_v18, %v2746_v9  ;;  %v2748_v15 = vpop.f32.mrb[67].mxu1 }
 0x55b   : > { %v2795_v28 = vmul.f32 %v3319_v16, %v2656_v62  ;;  %v3321_v40 = vpop.eup %3320 }
 0x55c   : > { %v2861_v54 = vadd.f32 %v3332_v63, %v2845_v41  ;;  %v2801_v8 = vmul.f32 %v3321_v40, %v5367_v47  ;;  %v2832_v47 = vmul.f32 %v3317_v43, %v2816_v27 }
 0x55d   : > { %v2811_v7 = vsub.f32 2.0, %v2795_v28  ;;  %v2751_v60 = vpop.f32.mrb[68].mxu1 }
 0x55e   : > { %2877 = vst.msk [vmem:[%s5375_s21 + $0x58] sm:$0xff] %vm5812_vm14, %v2861_v54  ;;  %v2846_v24 = vmul.f32 %v2830_v46, %v2751_v60  ;;  %v2753_v23 = vpop.f32.mrb[69].mxu1  ;;  %v2817_v3 = vsub.f32 2.0, %v2801_v8 }
 0x55f   : > { %v2827_v26 = vmul.f32 %v3319_v16, %v2811_v7 }
 0x560   : > { %v2862_v30 = vadd.f32 %v3333_v45, %v2846_v24  ;;  %v2833_v37 = vmul.f32 %v3321_v40, %v2817_v3 }
 0x561   : > { %v2843_v55 = vmul.f32 %v2827_v26, %v2736_v49  ;;  %v2756_v5 = vpop.f32.mrb[70].mxu1 }
 0x562   : > { %2878 = vst.msk [vmem:[%s5375_s21 + $0x60] sm:$0xff] %vm5813_vm2, %v2862_v30  ;;  %v2847_v44 = vmul.f32 %v2831_v20, %v2756_v5  ;;  %v2758_v51 = vpop.f32.mrb[71].mxu1 }
 0x563   : > { %v2859_v19 = vadd.f32 %v3334_v4, %v2843_v55 }
 0x564   : > { %v2863_v13 = vadd.f32 %v3335_v25, %v2847_v44 }
 0x565   : > { %2875 = vst.msk [vmem:[%s5375_s21 + $0x48] sm:$0xff] %vm5814_vm10, %v2859_v19  ;;  %v2761_v31 = vpop.f32.mrb[72].mxu1 }
 0x566   : > { %2879 = vst.msk [vmem:[%s5375_s21 + $0x68] sm:$0xff] %vm5815_vm4, %v2863_v13  ;;  %v2848_v50 = vmul.f32 %v2832_v47, %v2761_v31  ;;  %v2763_v39 = vpop.f32.mrb[73].mxu1 }
 0x568   : > { %v2864_v33 = vadd.f32 %v3336_v1, %v2848_v50 }
 0x569   : > { %v2766_v61 = vpop.f32.mrb[74].mxu1 }
 0x56a   : > { %2880 = vst.msk [vmem:[%s5375_s21 + $0x70] sm:$0xff] %vm5816_vm8, %v2864_v33  ;;  %v2849_v58 = vmul.f32 %v2833_v37, %v2766_v61  ;;  %v2768_v52 = vpop.f32.mrb[75].mxu1 }
 0x56c   : > { %v2865_v62 = vadd.f32 %v3337_v38, %v2849_v58 }
 0x56e   : > { %2881 = vst.msk [vmem:[%s5375_s21 + $0x78] sm:$0xff] %vm5817_vm0, %v2865_v62 }
 0x56f PF: > { %s18_s27 = sadd.s32 1, %s3344_s27  }
 0x570   : > { %p15_p4 = scmp.ge.s32.totalorder %s18_s27, 4  }
 0x572   :  { %17 = sbr.rel (!%p15_p4) target bundleno = 1 (0x1), region = 85 }

</bundles_post_ra>
